<compile_context>
chip_gen: v7x
topology: tpu7x:2x2x1
jax: 0.10.0
libtpu: 0.0.40
codegen_flags: <defaults>
</compile_context>

<pallas_src>
import functools

import jax
import jax.numpy as jnp
from jax.experimental import pallas as pl
from jax.experimental.pallas import tpu as pltpu

LANE = 128                      # TPU lane width; all padded dims are multiples.
SMALL_GRAPH_MAX_NPAD = 512      # at/below this, use the fully-fused no-grid path


def _round_up(x, m):
    return ((x + m - 1) // m) * m


def _pad2(a, rows, cols):
    a = a.astype(jnp.float32)
    return jnp.zeros((rows, cols), jnp.float32).at[: a.shape[0], : a.shape[1]].set(a)


def _physical_vmem_bytes():
    try:
        return int(pltpu.get_tpu_info().vmem_capacity_bytes)
    except Exception:
        return 64 * 1024 * 1024     # conservative default (v7x per-core VMEM)


def _vmem_limit_bytes(n_pad, h_pad, n_layers, streamed):
    adj_b = n_pad * n_pad * 2                            # bf16 A'^T, single copy
    act_b = 4 * h_pad * n_pad * 4                        # h^T + matmul temporaries (f32)
    x_b = (2 if streamed else 1) * h_pad * n_pad * 2     # bf16 input features
    per_layer_w = 2 * (h_pad * h_pad * 2 + h_pad * LANE * 4)   # W^T + lane-padded bias
    w_b = (2 if streamed else n_layers) * per_layer_w    # double-buffered vs. resident
    need = adj_b + act_b + x_b + w_b + (4 << 20)         # + headroom
    cap = (_physical_vmem_bytes() * 7) // 8
    return int(min(max(need, 32 << 20), cap))


# --------------------------------------------------------------------------
# Path A: small graphs -- single pallas_call (no grid), unrolled layer loop,
# all weights resident in VMEM.
# --------------------------------------------------------------------------
def _small_kernel(n_layers, at_ref, xt_ref, w1_ref, b1_ref, w2_ref, b2_ref, o_ref):
    at = at_ref[...]                               # (n_pad, n_pad) bf16, A'^T (loaded once)
    h = xt_ref[...].astype(jnp.float32)            # (h_pad, n_pad) running activation
    for l in range(n_layers):
        # aggregation (A' = A + I folds the eps=0 self term):
        #   agg^T = h^T @ A'^T  -- bf16 x bf16 operands, f32 accumulate, lane width n_pad
        agg = jnp.dot(h.astype(jnp.bfloat16), at,
                      preferred_element_type=jnp.float32)
        # GIN MLP (transposed): h1^T = W1^T @ agg^T + b1^T ; ReLU ; W2^T @ . + b2^T
        h1 = jnp.dot(w1_ref[l], agg.astype(jnp.bfloat16),
                     preferred_element_type=jnp.float32) + b1_ref[l]
        h1 = jnp.maximum(h1, 0.0)
        h2 = jnp.dot(w2_ref[l], h1.astype(jnp.bfloat16),
                     preferred_element_type=jnp.float32) + b2_ref[l]
        # outer self.activation (ReLU) after every layer except the last
        h = jnp.maximum(h2, 0.0) if l < n_layers - 1 else h2
    o_ref[...] = h


# --------------------------------------------------------------------------
# Path B: larger graphs -- grid over layers; A'^T single-buffered in a VMEM
# scratch (one HBM DMA total), h^T resident in the output block, per-layer
# weights streamed with default double-buffering.
# --------------------------------------------------------------------------
def _streamed_kernel(n_layers, a_hbm_ref, xt_ref, w1_ref, b1_ref, w2_ref, b2_ref,
                     o_ref, a_vmem, dma_sem):
    l = pl.program_id(0)

    @pl.when(l == 0)
    def _init():
        # One-time DMA of A'^T into a single-buffered VMEM scratch.
        cp = pltpu.make_async_copy(a_hbm_ref, a_vmem, dma_sem)
        cp.start()
        cp.wait()
        # Seed the resident activation (h^T lives in the output block's VMEM).
        o_ref[...] = xt_ref[...].astype(jnp.float32)

    h = o_ref[...]
    agg = jnp.dot(h.astype(jnp.bfloat16), a_vmem[...],
                  preferred_element_type=jnp.float32)
    h1 = jnp.dot(w1_ref[0], agg.astype(jnp.bfloat16),
                 preferred_element_type=jnp.float32) + b1_ref[0]
    h1 = jnp.maximum(h1, 0.0)
    h2 = jnp.dot(w2_ref[0], h1.astype(jnp.bfloat16),
                 preferred_element_type=jnp.float32) + b2_ref[0]

    @pl.when(l < n_layers - 1)
    def _mid():
        o_ref[...] = jnp.maximum(h2, 0.0)

    @pl.when(l == n_layers - 1)
    def _last():
        o_ref[...] = h2


# --------------------------------------------------------------------------
# Host-side wrapper.
# --------------------------------------------------------------------------
def gin_classifier_8_layer(x, edge_index, params,
                           small_graph_max_npad=SMALL_GRAPH_MAX_NPAD):
    n, in_dim = x.shape
    out_dim = params[-1][2].shape[1]
    n_layers = len(params)

    n_pad = _round_up(n, LANE)
    max_dim = max([in_dim]
                  + [w1.shape[1] for (w1, _, _, _) in params]
                  + [w2.shape[1] for (_, _, w2, _) in params])
    h_pad = _round_up(max_dim, LANE)

    # A'^T = (A + I_real)^T in bf16.  A[dst, src] += 1  =>  A^T[src, dst] += 1.
    # Identity only on real nodes; no jnp.eye / extra dense temporary.
    src, dst = edge_index[0], edge_index[1]
    adj_t = jnp.zeros((n_pad, n_pad), jnp.float32).at[src, dst].add(1.0)
    diag = jnp.arange(n)
    adj_t = adj_t.at[diag, diag].add(1.0)
    adj_t = adj_t.astype(jnp.bfloat16)

    # Feature-major (transposed), zero-padded operands; weights in bf16.
    x_t = _pad2(x.T, h_pad, n_pad).astype(jnp.bfloat16)
    w1_all = jnp.stack([_pad2(w1.T, h_pad, h_pad) for (w1, _, _, _) in params]
                       ).astype(jnp.bfloat16)
    b1_all = jnp.stack([_pad2(b1.reshape(-1, 1), h_pad, 1) for (_, b1, _, _) in params])
    w2_all = jnp.stack([_pad2(w2.T, h_pad, h_pad) for (_, _, w2, _) in params]
                       ).astype(jnp.bfloat16)
    b2_all = jnp.stack([_pad2(b2.reshape(-1, 1), h_pad, 1) for (_, _, _, b2) in params])

    streamed = n_pad > small_graph_max_npad
    vmem_limit = _vmem_limit_bytes(n_pad, h_pad, n_layers, streamed)
    out_shape = jax.ShapeDtypeStruct((h_pad, n_pad), jnp.float32)

    if not streamed:
        out_t = pl.pallas_call(
            functools.partial(_small_kernel, n_layers),
            out_shape=out_shape,
            compiler_params=pltpu.CompilerParams(vmem_limit_bytes=vmem_limit),
        )(adj_t, x_t, w1_all, b1_all, w2_all, b2_all)
    else:
        out_t = pl.pallas_call(
            functools.partial(_streamed_kernel, n_layers),
            out_shape=out_shape,
            grid_spec=pltpu.PrefetchScalarGridSpec(
                num_scalar_prefetch=0,
                grid=(n_layers,),
                in_specs=[
                    pl.BlockSpec(memory_space=pl.ANY),                     # A'^T (HBM, copied once)
                    pl.BlockSpec((h_pad, n_pad), lambda l: (0, 0)),        # x^T   (resident)
                    pl.BlockSpec((1, h_pad, h_pad), lambda l: (l, 0, 0)),  # W1^T per layer (streamed)
                    pl.BlockSpec((1, h_pad, 1), lambda l: (l, 0, 0)),      # b1^T per layer
                    pl.BlockSpec((1, h_pad, h_pad), lambda l: (l, 0, 0)),  # W2^T per layer
                    pl.BlockSpec((1, h_pad, 1), lambda l: (l, 0, 0)),      # b2^T per layer
                ],
                out_specs=pl.BlockSpec((h_pad, n_pad), lambda l: (0, 0)),  # h^T (resident, 1 writeback)
                scratch_shapes=[
                    pltpu.VMEM((n_pad, n_pad), jnp.bfloat16),              # single-buffered A'^T
                    pltpu.SemaphoreType.DMA,
                ],
            ),
            compiler_params=pltpu.CompilerParams(
                dimension_semantics=("arbitrary",),   # layer axis is sequential
                vmem_limit_bytes=vmem_limit,
            ),
        )(adj_t, x_t, w1_all, b1_all, w2_all, b2_all)

    return out_t[:out_dim, :n].T


# --------------------------------------------------------------------------
# Parameter construction (deterministic, PyTorch-Linear-style uniform init).
# --------------------------------------------------------------------------
def init_linear(key, fan_in, fan_out):
    kw, kb = jax.random.split(key)
    bound = 1.0 / jnp.sqrt(jnp.float32(fan_in))
    w = jax.random.uniform(kw, (fan_in, fan_out), jnp.float32, -bound, bound)
    b = jax.random.uniform(kb, (1, fan_out), jnp.float32, -bound, bound)
    return w, b


def init_gin_params(key, input_dim, output_dim, hidden_dim, n_layers=8):
    dims = ([(input_dim, hidden_dim)]
            + [(hidden_dim, hidden_dim)] * (n_layers - 2)
            + [(hidden_dim, output_dim)])
    params = []
    for (cin, cout) in dims:
        key, k1, k2 = jax.random.split(key, 3)
        w1, b1 = init_linear(k1, cin, cout)
        w2, b2 = init_linear(k2, cout, cout)
        params.append((w1, b1, w2, b2))
    return params


# --------------------------------------------------------------------------
# Pure-JAX f32 reference (unpadded, untransposed) for a sanity check.
# --------------------------------------------------------------------------
def reference_forward(x, edge_index, params):
    n = x.shape[0]
    src, dst = edge_index[0], edge_index[1]
    adj = jnp.zeros((n, n), jnp.float32).at[dst, src].add(1.0)
    h = x
    for i, (w1, b1, w2, b2) in enumerate(params):
        h = h + adj @ h
        h = jnp.maximum(h @ w1 + b1, 0.0)
        h = h @ w2 + b2
        if i < len(params) - 1:
            h = jnp.maximum(h, 0.0)
    return h


if __name__ == "__main__":
    key = jax.random.PRNGKey(0)
    k_x, k_e, k_p = jax.random.split(key, 3)

    num_nodes = 64
    num_edges = 256
    input_dim = 16
    hidden_dim = 32
    output_dim = 8

    x = jax.random.normal(k_x, (num_nodes, input_dim), jnp.float32)
    edge_index = jax.random.randint(k_e, (2, num_edges), 0, num_nodes,
                                    dtype=jnp.int32)
    params = init_gin_params(k_p, input_dim, output_dim, hidden_dim)

    ref = reference_forward(x, edge_index, params)
    ref_scale = float(jnp.max(jnp.abs(ref))) + 1e-6

    # Path A: fully fused single-call kernel (small-graph path).
    out_small = jax.block_until_ready(gin_classifier_8_layer(x, edge_index, params))
    assert out_small.shape == (num_nodes, output_dim)
    err_small = float(jnp.max(jnp.abs(out_small - ref))) / ref_scale
    assert err_small < 8e-2, f"small-path mismatch: rel err {err_small}"

    # Path B: layer-streamed kernel (forced here to validate it at small scale).
    out_stream = jax.block_until_ready(
        gin_classifier_8_layer(x, edge_index, params, small_graph_max_npad=0))
    assert out_stream.shape == (num_nodes, output_dim)
    err_stream = float(jnp.max(jnp.abs(out_stream - ref))) / ref_scale
    assert err_stream < 8e-2, f"streamed-path mismatch: rel err {err_stream}"

    print("KERNEL_OK")
</pallas_src>

<mosaic_0001>
module attributes {stable_mosaic.version = 11 : i64} {
  func.func @_small_kernel(%arg0: memref<128x128xbf16, #tpu.memory_space<vmem>>, %arg1: memref<128x128xbf16, #tpu.memory_space<vmem>>, %arg2: memref<8x128x128xbf16, #tpu.memory_space<vmem>>, %arg3: memref<8x128x1xf32, #tpu.memory_space<vmem>>, %arg4: memref<8x128x128xbf16, #tpu.memory_space<vmem>>, %arg5: memref<8x128x1xf32, #tpu.memory_space<vmem>>, %arg6: memref<128x128xf32, #tpu.memory_space<vmem>>) attributes {dimension_semantics = [], scalar_prefetch = 0 : i64, scratch_operands = 0 : i64, tpu.core_type = #tpu.core_type<tc>} {
    %c0 = arith.constant 0 : index
    %c0_0 = arith.constant 0 : index
    %0 = vector.load %arg0[%c0, %c0_0] : memref<128x128xbf16, #tpu.memory_space<vmem>>, vector<128x128xbf16>
    %c0_1 = arith.constant 0 : index
    %c0_2 = arith.constant 0 : index
    %1 = vector.load %arg1[%c0_1, %c0_2] : memref<128x128xbf16, #tpu.memory_space<vmem>>, vector<128x128xbf16>
    %2 = arith.extf %1 : vector<128x128xbf16> to vector<128x128xf32>
    %3 = arith.truncf %2 : vector<128x128xf32> to vector<128x128xbf16>
    %cst = arith.constant dense<0.000000e+00> : vector<128x128xf32>
    %4 = tpu.matmul %3, %0, %cst {dimension_numbers = #tpu.dot_dimension_numbers<[1], [0], [0], [1], [0, 0, 1, 1], [], []>} : vector<128x128xbf16>, vector<128x128xbf16>, vector<128x128xf32> -> vector<128x128xf32>
    %c0_3 = arith.constant 0 : index
    %c0_4 = arith.constant 0 : index
    %c0_5 = arith.constant 0 : index
    %5 = vector.load %arg2[%c0_3, %c0_4, %c0_5] : memref<8x128x128xbf16, #tpu.memory_space<vmem>>, vector<1x128x128xbf16>
    %6 = vector.shape_cast %5 : vector<1x128x128xbf16> to vector<128x128xbf16>
    %7 = arith.truncf %4 : vector<128x128xf32> to vector<128x128xbf16>
    %cst_6 = arith.constant dense<0.000000e+00> : vector<128x128xf32>
    %8 = tpu.matmul %6, %7, %cst_6 {dimension_numbers = #tpu.dot_dimension_numbers<[1], [0], [0], [1], [0, 0, 1, 1], [], []>} : vector<128x128xbf16>, vector<128x128xbf16>, vector<128x128xf32> -> vector<128x128xf32>
    %c0_7 = arith.constant 0 : index
    %c0_8 = arith.constant 0 : index
    %c0_9 = arith.constant 0 : index
    %9 = vector.load %arg3[%c0_7, %c0_8, %c0_9] : memref<8x128x1xf32, #tpu.memory_space<vmem>>, vector<1x128x1xf32>
    %10 = vector.shape_cast %9 : vector<1x128x1xf32> to vector<128x1xf32>
    %11 = vector.broadcast %10 : vector<128x1xf32> to vector<128x128xf32>
    %12 = arith.addf %8, %11 : vector<128x128xf32>
    %cst_10 = arith.constant 0.000000e+00 : f32
    %13 = vector.broadcast %cst_10 : f32 to vector<128x128xf32>
    %14 = arith.maximumf %12, %13 : vector<128x128xf32>
    %c0_11 = arith.constant 0 : index
    %c0_12 = arith.constant 0 : index
    %c0_13 = arith.constant 0 : index
    %15 = vector.load %arg4[%c0_11, %c0_12, %c0_13] : memref<8x128x128xbf16, #tpu.memory_space<vmem>>, vector<1x128x128xbf16>
    %16 = vector.shape_cast %15 : vector<1x128x128xbf16> to vector<128x128xbf16>
    %17 = arith.truncf %14 : vector<128x128xf32> to vector<128x128xbf16>
    %cst_14 = arith.constant dense<0.000000e+00> : vector<128x128xf32>
    %18 = tpu.matmul %16, %17, %cst_14 {dimension_numbers = #tpu.dot_dimension_numbers<[1], [0], [0], [1], [0, 0, 1, 1], [], []>} : vector<128x128xbf16>, vector<128x128xbf16>, vector<128x128xf32> -> vector<128x128xf32>
    %c0_15 = arith.constant 0 : index
    %c0_16 = arith.constant 0 : index
    %c0_17 = arith.constant 0 : index
    %19 = vector.load %arg5[%c0_15, %c0_16, %c0_17] : memref<8x128x1xf32, #tpu.memory_space<vmem>>, vector<1x128x1xf32>
    %20 = vector.shape_cast %19 : vector<1x128x1xf32> to vector<128x1xf32>
    %21 = vector.broadcast %20 : vector<128x1xf32> to vector<128x128xf32>
    %22 = arith.addf %18, %21 : vector<128x128xf32>
    %cst_18 = arith.constant 0.000000e+00 : f32
    %23 = vector.broadcast %cst_18 : f32 to vector<128x128xf32>
    %24 = arith.maximumf %22, %23 : vector<128x128xf32>
    %25 = arith.truncf %24 : vector<128x128xf32> to vector<128x128xbf16>
    %cst_19 = arith.constant dense<0.000000e+00> : vector<128x128xf32>
    %26 = tpu.matmul %25, %0, %cst_19 {dimension_numbers = #tpu.dot_dimension_numbers<[1], [0], [0], [1], [0, 0, 1, 1], [], []>} : vector<128x128xbf16>, vector<128x128xbf16>, vector<128x128xf32> -> vector<128x128xf32>
    %c1 = arith.constant 1 : index
    %c0_20 = arith.constant 0 : index
    %c0_21 = arith.constant 0 : index
    %27 = vector.load %arg2[%c1, %c0_20, %c0_21] : memref<8x128x128xbf16, #tpu.memory_space<vmem>>, vector<1x128x128xbf16>
    %28 = vector.shape_cast %27 : vector<1x128x128xbf16> to vector<128x128xbf16>
    %29 = arith.truncf %26 : vector<128x128xf32> to vector<128x128xbf16>
    %cst_22 = arith.constant dense<0.000000e+00> : vector<128x128xf32>
    %30 = tpu.matmul %28, %29, %cst_22 {dimension_numbers = #tpu.dot_dimension_numbers<[1], [0], [0], [1], [0, 0, 1, 1], [], []>} : vector<128x128xbf16>, vector<128x128xbf16>, vector<128x128xf32> -> vector<128x128xf32>
    %c1_23 = arith.constant 1 : index
    %c0_24 = arith.constant 0 : index
    %c0_25 = arith.constant 0 : index
    %31 = vector.load %arg3[%c1_23, %c0_24, %c0_25] : memref<8x128x1xf32, #tpu.memory_space<vmem>>, vector<1x128x1xf32>
    %32 = vector.shape_cast %31 : vector<1x128x1xf32> to vector<128x1xf32>
    %33 = vector.broadcast %32 : vector<128x1xf32> to vector<128x128xf32>
    %34 = arith.addf %30, %33 : vector<128x128xf32>
    %cst_26 = arith.constant 0.000000e+00 : f32
    %35 = vector.broadcast %cst_26 : f32 to vector<128x128xf32>
    %36 = arith.maximumf %34, %35 : vector<128x128xf32>
    %c1_27 = arith.constant 1 : index
    %c0_28 = arith.constant 0 : index
    %c0_29 = arith.constant 0 : index
    %37 = vector.load %arg4[%c1_27, %c0_28, %c0_29] : memref<8x128x128xbf16, #tpu.memory_space<vmem>>, vector<1x128x128xbf16>
    %38 = vector.shape_cast %37 : vector<1x128x128xbf16> to vector<128x128xbf16>
    %39 = arith.truncf %36 : vector<128x128xf32> to vector<128x128xbf16>
    %cst_30 = arith.constant dense<0.000000e+00> : vector<128x128xf32>
    %40 = tpu.matmul %38, %39, %cst_30 {dimension_numbers = #tpu.dot_dimension_numbers<[1], [0], [0], [1], [0, 0, 1, 1], [], []>} : vector<128x128xbf16>, vector<128x128xbf16>, vector<128x128xf32> -> vector<128x128xf32>
    %c1_31 = arith.constant 1 : index
    %c0_32 = arith.constant 0 : index
    %c0_33 = arith.constant 0 : index
    %41 = vector.load %arg5[%c1_31, %c0_32, %c0_33] : memref<8x128x1xf32, #tpu.memory_space<vmem>>, vector<1x128x1xf32>
    %42 = vector.shape_cast %41 : vector<1x128x1xf32> to vector<128x1xf32>
    %43 = vector.broadcast %42 : vector<128x1xf32> to vector<128x128xf32>
    %44 = arith.addf %40, %43 : vector<128x128xf32>
    %cst_34 = arith.constant 0.000000e+00 : f32
    %45 = vector.broadcast %cst_34 : f32 to vector<128x128xf32>
    %46 = arith.maximumf %44, %45 : vector<128x128xf32>
    %47 = arith.truncf %46 : vector<128x128xf32> to vector<128x128xbf16>
    %cst_35 = arith.constant dense<0.000000e+00> : vector<128x128xf32>
    %48 = tpu.matmul %47, %0, %cst_35 {dimension_numbers = #tpu.dot_dimension_numbers<[1], [0], [0], [1], [0, 0, 1, 1], [], []>} : vector<128x128xbf16>, vector<128x128xbf16>, vector<128x128xf32> -> vector<128x128xf32>
    %c2 = arith.constant 2 : index
    %c0_36 = arith.constant 0 : index
    %c0_37 = arith.constant 0 : index
    %49 = vector.load %arg2[%c2, %c0_36, %c0_37] : memref<8x128x128xbf16, #tpu.memory_space<vmem>>, vector<1x128x128xbf16>
    %50 = vector.shape_cast %49 : vector<1x128x128xbf16> to vector<128x128xbf16>
    %51 = arith.truncf %48 : vector<128x128xf32> to vector<128x128xbf16>
    %cst_38 = arith.constant dense<0.000000e+00> : vector<128x128xf32>
    %52 = tpu.matmul %50, %51, %cst_38 {dimension_numbers = #tpu.dot_dimension_numbers<[1], [0], [0], [1], [0, 0, 1, 1], [], []>} : vector<128x128xbf16>, vector<128x128xbf16>, vector<128x128xf32> -> vector<128x128xf32>
    %c2_39 = arith.constant 2 : index
    %c0_40 = arith.constant 0 : index
    %c0_41 = arith.constant 0 : index
    %53 = vector.load %arg3[%c2_39, %c0_40, %c0_41] : memref<8x128x1xf32, #tpu.memory_space<vmem>>, vector<1x128x1xf32>
    %54 = vector.shape_cast %53 : vector<1x128x1xf32> to vector<128x1xf32>
    %55 = vector.broadcast %54 : vector<128x1xf32> to vector<128x128xf32>
    %56 = arith.addf %52, %55 : vector<128x128xf32>
    %cst_42 = arith.constant 0.000000e+00 : f32
    %57 = vector.broadcast %cst_42 : f32 to vector<128x128xf32>
    %58 = arith.maximumf %56, %57 : vector<128x128xf32>
    %c2_43 = arith.constant 2 : index
    %c0_44 = arith.constant 0 : index
    %c0_45 = arith.constant 0 : index
    %59 = vector.load %arg4[%c2_43, %c0_44, %c0_45] : memref<8x128x128xbf16, #tpu.memory_space<vmem>>, vector<1x128x128xbf16>
    %60 = vector.shape_cast %59 : vector<1x128x128xbf16> to vector<128x128xbf16>
    %61 = arith.truncf %58 : vector<128x128xf32> to vector<128x128xbf16>
    %cst_46 = arith.constant dense<0.000000e+00> : vector<128x128xf32>
    %62 = tpu.matmul %60, %61, %cst_46 {dimension_numbers = #tpu.dot_dimension_numbers<[1], [0], [0], [1], [0, 0, 1, 1], [], []>} : vector<128x128xbf16>, vector<128x128xbf16>, vector<128x128xf32> -> vector<128x128xf32>
    %c2_47 = arith.constant 2 : index
    %c0_48 = arith.constant 0 : index
    %c0_49 = arith.constant 0 : index
    %63 = vector.load %arg5[%c2_47, %c0_48, %c0_49] : memref<8x128x1xf32, #tpu.memory_space<vmem>>, vector<1x128x1xf32>
    %64 = vector.shape_cast %63 : vector<1x128x1xf32> to vector<128x1xf32>
    %65 = vector.broadcast %64 : vector<128x1xf32> to vector<128x128xf32>
    %66 = arith.addf %62, %65 : vector<128x128xf32>
    %cst_50 = arith.constant 0.000000e+00 : f32
    %67 = vector.broadcast %cst_50 : f32 to vector<128x128xf32>
    %68 = arith.maximumf %66, %67 : vector<128x128xf32>
    %69 = arith.truncf %68 : vector<128x128xf32> to vector<128x128xbf16>
    %cst_51 = arith.constant dense<0.000000e+00> : vector<128x128xf32>
    %70 = tpu.matmul %69, %0, %cst_51 {dimension_numbers = #tpu.dot_dimension_numbers<[1], [0], [0], [1], [0, 0, 1, 1], [], []>} : vector<128x128xbf16>, vector<128x128xbf16>, vector<128x128xf32> -> vector<128x128xf32>
    %c3 = arith.constant 3 : index
    %c0_52 = arith.constant 0 : index
    %c0_53 = arith.constant 0 : index
    %71 = vector.load %arg2[%c3, %c0_52, %c0_53] : memref<8x128x128xbf16, #tpu.memory_space<vmem>>, vector<1x128x128xbf16>
    %72 = vector.shape_cast %71 : vector<1x128x128xbf16> to vector<128x128xbf16>
    %73 = arith.truncf %70 : vector<128x128xf32> to vector<128x128xbf16>
    %cst_54 = arith.constant dense<0.000000e+00> : vector<128x128xf32>
    %74 = tpu.matmul %72, %73, %cst_54 {dimension_numbers = #tpu.dot_dimension_numbers<[1], [0], [0], [1], [0, 0, 1, 1], [], []>} : vector<128x128xbf16>, vector<128x128xbf16>, vector<128x128xf32> -> vector<128x128xf32>
    %c3_55 = arith.constant 3 : index
    %c0_56 = arith.constant 0 : index
    %c0_57 = arith.constant 0 : index
    %75 = vector.load %arg3[%c3_55, %c0_56, %c0_57] : memref<8x128x1xf32, #tpu.memory_space<vmem>>, vector<1x128x1xf32>
    %76 = vector.shape_cast %75 : vector<1x128x1xf32> to vector<128x1xf32>
    %77 = vector.broadcast %76 : vector<128x1xf32> to vector<128x128xf32>
    %78 = arith.addf %74, %77 : vector<128x128xf32>
    %cst_58 = arith.constant 0.000000e+00 : f32
    %79 = vector.broadcast %cst_58 : f32 to vector<128x128xf32>
    %80 = arith.maximumf %78, %79 : vector<128x128xf32>
    %c3_59 = arith.constant 3 : index
    %c0_60 = arith.constant 0 : index
    %c0_61 = arith.constant 0 : index
    %81 = vector.load %arg4[%c3_59, %c0_60, %c0_61] : memref<8x128x128xbf16, #tpu.memory_space<vmem>>, vector<1x128x128xbf16>
    %82 = vector.shape_cast %81 : vector<1x128x128xbf16> to vector<128x128xbf16>
    %83 = arith.truncf %80 : vector<128x128xf32> to vector<128x128xbf16>
    %cst_62 = arith.constant dense<0.000000e+00> : vector<128x128xf32>
    %84 = tpu.matmul %82, %83, %cst_62 {dimension_numbers = #tpu.dot_dimension_numbers<[1], [0], [0], [1], [0, 0, 1, 1], [], []>} : vector<128x128xbf16>, vector<128x128xbf16>, vector<128x128xf32> -> vector<128x128xf32>
    %c3_63 = arith.constant 3 : index
    %c0_64 = arith.constant 0 : index
    %c0_65 = arith.constant 0 : index
    %85 = vector.load %arg5[%c3_63, %c0_64, %c0_65] : memref<8x128x1xf32, #tpu.memory_space<vmem>>, vector<1x128x1xf32>
    %86 = vector.shape_cast %85 : vector<1x128x1xf32> to vector<128x1xf32>
    %87 = vector.broadcast %86 : vector<128x1xf32> to vector<128x128xf32>
    %88 = arith.addf %84, %87 : vector<128x128xf32>
    %cst_66 = arith.constant 0.000000e+00 : f32
    %89 = vector.broadcast %cst_66 : f32 to vector<128x128xf32>
    %90 = arith.maximumf %88, %89 : vector<128x128xf32>
    %91 = arith.truncf %90 : vector<128x128xf32> to vector<128x128xbf16>
    %cst_67 = arith.constant dense<0.000000e+00> : vector<128x128xf32>
    %92 = tpu.matmul %91, %0, %cst_67 {dimension_numbers = #tpu.dot_dimension_numbers<[1], [0], [0], [1], [0, 0, 1, 1], [], []>} : vector<128x128xbf16>, vector<128x128xbf16>, vector<128x128xf32> -> vector<128x128xf32>
    %c4 = arith.constant 4 : index
    %c0_68 = arith.constant 0 : index
    %c0_69 = arith.constant 0 : index
    %93 = vector.load %arg2[%c4, %c0_68, %c0_69] : memref<8x128x128xbf16, #tpu.memory_space<vmem>>, vector<1x128x128xbf16>
    %94 = vector.shape_cast %93 : vector<1x128x128xbf16> to vector<128x128xbf16>
    %95 = arith.truncf %92 : vector<128x128xf32> to vector<128x128xbf16>
    %cst_70 = arith.constant dense<0.000000e+00> : vector<128x128xf32>
    %96 = tpu.matmul %94, %95, %cst_70 {dimension_numbers = #tpu.dot_dimension_numbers<[1], [0], [0], [1], [0, 0, 1, 1], [], []>} : vector<128x128xbf16>, vector<128x128xbf16>, vector<128x128xf32> -> vector<128x128xf32>
    %c4_71 = arith.constant 4 : index
    %c0_72 = arith.constant 0 : index
    %c0_73 = arith.constant 0 : index
    %97 = vector.load %arg3[%c4_71, %c0_72, %c0_73] : memref<8x128x1xf32, #tpu.memory_space<vmem>>, vector<1x128x1xf32>
    %98 = vector.shape_cast %97 : vector<1x128x1xf32> to vector<128x1xf32>
    %99 = vector.broadcast %98 : vector<128x1xf32> to vector<128x128xf32>
    %100 = arith.addf %96, %99 : vector<128x128xf32>
    %cst_74 = arith.constant 0.000000e+00 : f32
    %101 = vector.broadcast %cst_74 : f32 to vector<128x128xf32>
    %102 = arith.maximumf %100, %101 : vector<128x128xf32>
    %c4_75 = arith.constant 4 : index
    %c0_76 = arith.constant 0 : index
    %c0_77 = arith.constant 0 : index
    %103 = vector.load %arg4[%c4_75, %c0_76, %c0_77] : memref<8x128x128xbf16, #tpu.memory_space<vmem>>, vector<1x128x128xbf16>
    %104 = vector.shape_cast %103 : vector<1x128x128xbf16> to vector<128x128xbf16>
    %105 = arith.truncf %102 : vector<128x128xf32> to vector<128x128xbf16>
    %cst_78 = arith.constant dense<0.000000e+00> : vector<128x128xf32>
    %106 = tpu.matmul %104, %105, %cst_78 {dimension_numbers = #tpu.dot_dimension_numbers<[1], [0], [0], [1], [0, 0, 1, 1], [], []>} : vector<128x128xbf16>, vector<128x128xbf16>, vector<128x128xf32> -> vector<128x128xf32>
    %c4_79 = arith.constant 4 : index
    %c0_80 = arith.constant 0 : index
    %c0_81 = arith.constant 0 : index
    %107 = vector.load %arg5[%c4_79, %c0_80, %c0_81] : memref<8x128x1xf32, #tpu.memory_space<vmem>>, vector<1x128x1xf32>
    %108 = vector.shape_cast %107 : vector<1x128x1xf32> to vector<128x1xf32>
    %109 = vector.broadcast %108 : vector<128x1xf32> to vector<128x128xf32>
    %110 = arith.addf %106, %109 : vector<128x128xf32>
    %cst_82 = arith.constant 0.000000e+00 : f32
    %111 = vector.broadcast %cst_82 : f32 to vector<128x128xf32>
    %112 = arith.maximumf %110, %111 : vector<128x128xf32>
    %113 = arith.truncf %112 : vector<128x128xf32> to vector<128x128xbf16>
    %cst_83 = arith.constant dense<0.000000e+00> : vector<128x128xf32>
    %114 = tpu.matmul %113, %0, %cst_83 {dimension_numbers = #tpu.dot_dimension_numbers<[1], [0], [0], [1], [0, 0, 1, 1], [], []>} : vector<128x128xbf16>, vector<128x128xbf16>, vector<128x128xf32> -> vector<128x128xf32>
    %c5 = arith.constant 5 : index
    %c0_84 = arith.constant 0 : index
    %c0_85 = arith.constant 0 : index
    %115 = vector.load %arg2[%c5, %c0_84, %c0_85] : memref<8x128x128xbf16, #tpu.memory_space<vmem>>, vector<1x128x128xbf16>
    %116 = vector.shape_cast %115 : vector<1x128x128xbf16> to vector<128x128xbf16>
    %117 = arith.truncf %114 : vector<128x128xf32> to vector<128x128xbf16>
    %cst_86 = arith.constant dense<0.000000e+00> : vector<128x128xf32>
    %118 = tpu.matmul %116, %117, %cst_86 {dimension_numbers = #tpu.dot_dimension_numbers<[1], [0], [0], [1], [0, 0, 1, 1], [], []>} : vector<128x128xbf16>, vector<128x128xbf16>, vector<128x128xf32> -> vector<128x128xf32>
    %c5_87 = arith.constant 5 : index
    %c0_88 = arith.constant 0 : index
    %c0_89 = arith.constant 0 : index
    %119 = vector.load %arg3[%c5_87, %c0_88, %c0_89] : memref<8x128x1xf32, #tpu.memory_space<vmem>>, vector<1x128x1xf32>
    %120 = vector.shape_cast %119 : vector<1x128x1xf32> to vector<128x1xf32>
    %121 = vector.broadcast %120 : vector<128x1xf32> to vector<128x128xf32>
    %122 = arith.addf %118, %121 : vector<128x128xf32>
    %cst_90 = arith.constant 0.000000e+00 : f32
    %123 = vector.broadcast %cst_90 : f32 to vector<128x128xf32>
    %124 = arith.maximumf %122, %123 : vector<128x128xf32>
    %c5_91 = arith.constant 5 : index
    %c0_92 = arith.constant 0 : index
    %c0_93 = arith.constant 0 : index
    %125 = vector.load %arg4[%c5_91, %c0_92, %c0_93] : memref<8x128x128xbf16, #tpu.memory_space<vmem>>, vector<1x128x128xbf16>
    %126 = vector.shape_cast %125 : vector<1x128x128xbf16> to vector<128x128xbf16>
    %127 = arith.truncf %124 : vector<128x128xf32> to vector<128x128xbf16>
    %cst_94 = arith.constant dense<0.000000e+00> : vector<128x128xf32>
    %128 = tpu.matmul %126, %127, %cst_94 {dimension_numbers = #tpu.dot_dimension_numbers<[1], [0], [0], [1], [0, 0, 1, 1], [], []>} : vector<128x128xbf16>, vector<128x128xbf16>, vector<128x128xf32> -> vector<128x128xf32>
    %c5_95 = arith.constant 5 : index
    %c0_96 = arith.constant 0 : index
    %c0_97 = arith.constant 0 : index
    %129 = vector.load %arg5[%c5_95, %c0_96, %c0_97] : memref<8x128x1xf32, #tpu.memory_space<vmem>>, vector<1x128x1xf32>
    %130 = vector.shape_cast %129 : vector<1x128x1xf32> to vector<128x1xf32>
    %131 = vector.broadcast %130 : vector<128x1xf32> to vector<128x128xf32>
    %132 = arith.addf %128, %131 : vector<128x128xf32>
    %cst_98 = arith.constant 0.000000e+00 : f32
    %133 = vector.broadcast %cst_98 : f32 to vector<128x128xf32>
    %134 = arith.maximumf %132, %133 : vector<128x128xf32>
    %135 = arith.truncf %134 : vector<128x128xf32> to vector<128x128xbf16>
    %cst_99 = arith.constant dense<0.000000e+00> : vector<128x128xf32>
    %136 = tpu.matmul %135, %0, %cst_99 {dimension_numbers = #tpu.dot_dimension_numbers<[1], [0], [0], [1], [0, 0, 1, 1], [], []>} : vector<128x128xbf16>, vector<128x128xbf16>, vector<128x128xf32> -> vector<128x128xf32>
    %c6 = arith.constant 6 : index
    %c0_100 = arith.constant 0 : index
    %c0_101 = arith.constant 0 : index
    %137 = vector.load %arg2[%c6, %c0_100, %c0_101] : memref<8x128x128xbf16, #tpu.memory_space<vmem>>, vector<1x128x128xbf16>
    %138 = vector.shape_cast %137 : vector<1x128x128xbf16> to vector<128x128xbf16>
    %139 = arith.truncf %136 : vector<128x128xf32> to vector<128x128xbf16>
    %cst_102 = arith.constant dense<0.000000e+00> : vector<128x128xf32>
    %140 = tpu.matmul %138, %139, %cst_102 {dimension_numbers = #tpu.dot_dimension_numbers<[1], [0], [0], [1], [0, 0, 1, 1], [], []>} : vector<128x128xbf16>, vector<128x128xbf16>, vector<128x128xf32> -> vector<128x128xf32>
    %c6_103 = arith.constant 6 : index
    %c0_104 = arith.constant 0 : index
    %c0_105 = arith.constant 0 : index
    %141 = vector.load %arg3[%c6_103, %c0_104, %c0_105] : memref<8x128x1xf32, #tpu.memory_space<vmem>>, vector<1x128x1xf32>
    %142 = vector.shape_cast %141 : vector<1x128x1xf32> to vector<128x1xf32>
    %143 = vector.broadcast %142 : vector<128x1xf32> to vector<128x128xf32>
    %144 = arith.addf %140, %143 : vector<128x128xf32>
    %cst_106 = arith.constant 0.000000e+00 : f32
    %145 = vector.broadcast %cst_106 : f32 to vector<128x128xf32>
    %146 = arith.maximumf %144, %145 : vector<128x128xf32>
    %c6_107 = arith.constant 6 : index
    %c0_108 = arith.constant 0 : index
    %c0_109 = arith.constant 0 : index
    %147 = vector.load %arg4[%c6_107, %c0_108, %c0_109] : memref<8x128x128xbf16, #tpu.memory_space<vmem>>, vector<1x128x128xbf16>
    %148 = vector.shape_cast %147 : vector<1x128x128xbf16> to vector<128x128xbf16>
    %149 = arith.truncf %146 : vector<128x128xf32> to vector<128x128xbf16>
    %cst_110 = arith.constant dense<0.000000e+00> : vector<128x128xf32>
    %150 = tpu.matmul %148, %149, %cst_110 {dimension_numbers = #tpu.dot_dimension_numbers<[1], [0], [0], [1], [0, 0, 1, 1], [], []>} : vector<128x128xbf16>, vector<128x128xbf16>, vector<128x128xf32> -> vector<128x128xf32>
    %c6_111 = arith.constant 6 : index
    %c0_112 = arith.constant 0 : index
    %c0_113 = arith.constant 0 : index
    %151 = vector.load %arg5[%c6_111, %c0_112, %c0_113] : memref<8x128x1xf32, #tpu.memory_space<vmem>>, vector<1x128x1xf32>
    %152 = vector.shape_cast %151 : vector<1x128x1xf32> to vector<128x1xf32>
    %153 = vector.broadcast %152 : vector<128x1xf32> to vector<128x128xf32>
    %154 = arith.addf %150, %153 : vector<128x128xf32>
    %cst_114 = arith.constant 0.000000e+00 : f32
    %155 = vector.broadcast %cst_114 : f32 to vector<128x128xf32>
    %156 = arith.maximumf %154, %155 : vector<128x128xf32>
    %157 = arith.truncf %156 : vector<128x128xf32> to vector<128x128xbf16>
    %cst_115 = arith.constant dense<0.000000e+00> : vector<128x128xf32>
    %158 = tpu.matmul %157, %0, %cst_115 {dimension_numbers = #tpu.dot_dimension_numbers<[1], [0], [0], [1], [0, 0, 1, 1], [], []>} : vector<128x128xbf16>, vector<128x128xbf16>, vector<128x128xf32> -> vector<128x128xf32>
    %c7 = arith.constant 7 : index
    %c0_116 = arith.constant 0 : index
    %c0_117 = arith.constant 0 : index
    %159 = vector.load %arg2[%c7, %c0_116, %c0_117] : memref<8x128x128xbf16, #tpu.memory_space<vmem>>, vector<1x128x128xbf16>
    %160 = vector.shape_cast %159 : vector<1x128x128xbf16> to vector<128x128xbf16>
    %161 = arith.truncf %158 : vector<128x128xf32> to vector<128x128xbf16>
    %cst_118 = arith.constant dense<0.000000e+00> : vector<128x128xf32>
    %162 = tpu.matmul %160, %161, %cst_118 {dimension_numbers = #tpu.dot_dimension_numbers<[1], [0], [0], [1], [0, 0, 1, 1], [], []>} : vector<128x128xbf16>, vector<128x128xbf16>, vector<128x128xf32> -> vector<128x128xf32>
    %c7_119 = arith.constant 7 : index
    %c0_120 = arith.constant 0 : index
    %c0_121 = arith.constant 0 : index
    %163 = vector.load %arg3[%c7_119, %c0_120, %c0_121] : memref<8x128x1xf32, #tpu.memory_space<vmem>>, vector<1x128x1xf32>
    %164 = vector.shape_cast %163 : vector<1x128x1xf32> to vector<128x1xf32>
    %165 = vector.broadcast %164 : vector<128x1xf32> to vector<128x128xf32>
    %166 = arith.addf %162, %165 : vector<128x128xf32>
    %cst_122 = arith.constant 0.000000e+00 : f32
    %167 = vector.broadcast %cst_122 : f32 to vector<128x128xf32>
    %168 = arith.maximumf %166, %167 : vector<128x128xf32>
    %c7_123 = arith.constant 7 : index
    %c0_124 = arith.constant 0 : index
    %c0_125 = arith.constant 0 : index
    %169 = vector.load %arg4[%c7_123, %c0_124, %c0_125] : memref<8x128x128xbf16, #tpu.memory_space<vmem>>, vector<1x128x128xbf16>
    %170 = vector.shape_cast %169 : vector<1x128x128xbf16> to vector<128x128xbf16>
    %171 = arith.truncf %168 : vector<128x128xf32> to vector<128x128xbf16>
    %cst_126 = arith.constant dense<0.000000e+00> : vector<128x128xf32>
    %172 = tpu.matmul %170, %171, %cst_126 {dimension_numbers = #tpu.dot_dimension_numbers<[1], [0], [0], [1], [0, 0, 1, 1], [], []>} : vector<128x128xbf16>, vector<128x128xbf16>, vector<128x128xf32> -> vector<128x128xf32>
    %c7_127 = arith.constant 7 : index
    %c0_128 = arith.constant 0 : index
    %c0_129 = arith.constant 0 : index
    %173 = vector.load %arg5[%c7_127, %c0_128, %c0_129] : memref<8x128x1xf32, #tpu.memory_space<vmem>>, vector<1x128x1xf32>
    %174 = vector.shape_cast %173 : vector<1x128x1xf32> to vector<128x1xf32>
    %175 = vector.broadcast %174 : vector<128x1xf32> to vector<128x128xf32>
    %176 = arith.addf %172, %175 : vector<128x128xf32>
    %c0_130 = arith.constant 0 : index
    %c0_131 = arith.constant 0 : index
    %177 = vector.load %arg6[%c0_130, %c0_131] : memref<128x128xf32, #tpu.memory_space<vmem>>, vector<128x128xf32>
    tpu.vector_store %arg6[%c0_130, %c0_131], %176 {strides = array<i32>} : memref<128x128xf32, #tpu.memory_space<vmem>>, vector<128x128xf32>,
    return
  }
}

</mosaic_0001>

<bundles_post_ra>
// kernel: tpu_custom_call.1
= control target key start
LH: loop header
LB: loop body
LE: loop exit
PB: predicated region body
PF: predicated region fallthrough
CT: control target
= control target key end

     0   :  { %v7467_v2 = vmov 0   ;;  %s9408_s0 = inlined_call_operand.vmem [shape: bf16[128,128], index: 0, kind: input, shape index: {}]   ;;  %s9409_s1 = inlined_call_operand.vmem [shape: bf16[128,128], index: 1, kind: input, shape index: {}]   ;;  %s9410_s2 = inlined_call_operand.vmem [shape: bf16[8,128,128], index: 2, kind: input, shape index: {}]   ;;  %s9411_s3 = inlined_call_operand.vmem [shape: f32[8,128,1], index: 3, kind: input, shape index: {}]   ;;  %s9412_s4 = inlined_call_operand.vmem [shape: bf16[8,128,128], index: 4, kind: input, shape index: {}]   ;;  %s9413_s5 = inlined_call_operand.vmem [shape: f32[8,128,1], index: 5, kind: input, shape index: {}]   ;;  %s9414_s6 = inlined_call_operand.hbm [shape: f32[128,128], index: 6, kind: output, shape index: {}]  }
   0x1   :  { %v276_v0 = vld [vmem:[%s9411_s3 + $0x10] sm:$0xff]  ;;  %v274_v1 = vld [vmem:[%s9411_s3] sm:$0xff]  ;;  %7274 = vset.pattern.permute.xlu1 %v7467_v2  ;;  %7273 = vset.pattern.permute.xlu0 %v7467_v2  ;;  %v277_v4 = vld [vmem:[%s9411_s3 + $0x18] sm:$0xff] }
   0x2   :  { %v7275_v3 = vld [vmem:[%s9408_s0] sm:$0xff]   ;;  %302 = vperm.xlu1 %7274, %v276_v0   ;;  %292 = vperm.xlu0 %7273, %v274_v1   ;;  %v275_v5 = vld [vmem:[%s9411_s3 + $0x8] sm:$0xff]  ;;  %v7277_v7 = vld [vmem:[%s9408_s0 + $0x10] sm:$0xff]  }
   0x3   :  { %6501 = vmatprep.subr.bf16.mxu0 %v7275_v3  ;;  %v7276_v6 = vld [vmem:[%s9408_s0 + $0x8] sm:$0xff]   ;;  %v278_v9 = vld [vmem:[%s9411_s3 + $0x20] sm:$0xff]  ;;  %v7278_v10 = vld [vmem:[%s9408_s0 + $0x18] sm:$0xff]  }
   0x4   :  { %6502 = vmatpush3.bf16.msra.mxu0 %v7275_v3  ;;  %v279_v8 = vld [vmem:[%s9411_s3 + $0x28] sm:$0xff]  ;;  %v281_v11 = vld [vmem:[%s9411_s3 + $0x38] sm:$0xff]  ;;  %v280_v12 = vld [vmem:[%s9411_s3 + $0x30] sm:$0xff] }
   0x5   :  { %6503 = vmatprep.subr.bf16.mxu0 %v7276_v6  ;;  %v283_v13 = vld [vmem:[%s9411_s3 + $0x48] sm:$0xff]  ;;  %v7279_v14 = vld [vmem:[%s9408_s0 + $0x20] sm:$0xff]   ;;  %v285_v18 = vld [vmem:[%s9411_s3 + $0x58] sm:$0xff] }
   0x6   :  { %307 = vperm.xlu1 %7274, %v277_v4   ;;  %297 = vperm.xlu0 %7273, %v275_v5   ;;  %v7283_v15 = vld [vmem:[%s9409_s1] sm:$0xff]   ;;  %v7280_v17 = vld [vmem:[%s9408_s0 + $0x28] sm:$0xff]   ;;  %v284_v19 = vld [vmem:[%s9411_s3 + $0x50] sm:$0xff] }
   0x7   :  { %v282_v16 = vld [vmem:[%s9411_s3 + $0x40] sm:$0xff]  ;;  %6517 = vmatprep.mubr.bf16.mxu0 %v7283_v15  ;;  %v7281_v20 = vld [vmem:[%s9408_s0 + $0x30] sm:$0xff]   ;;  %v287_v21 = vld [vmem:[%s9411_s3 + $0x68] sm:$0xff] }
   0x8   :  { %6504 = vmatpush3.bf16.msra.mxu0 %v7276_v6  ;;  %v286_v22 = vld [vmem:[%s9411_s3 + $0x60] sm:$0xff]  ;;  %v7282_v23 = vld [vmem:[%s9408_s0 + $0x38] sm:$0xff]   ;;  %v288_v25 = vld [vmem:[%s9411_s3 + $0x70] sm:$0xff] }
   0x9   :  { %6505 = vmatprep.subr.bf16.mxu0 %v7277_v7  ;;  %v289_v24 = vld [vmem:[%s9411_s3 + $0x78] sm:$0xff]  ;;  %v556_v26 = vld [vmem:[%s9413_s5 + $0x8] sm:$0xff]  ;;  %v555_v27 = vld [vmem:[%s9413_s5] sm:$0xff] }
   0xa   :  { %317 = vperm.xlu1 %7274, %v279_v8   ;;  %312 = vperm.xlu0 %7273, %v278_v9   ;;  %v7284_v28 = vld [vmem:[%s9409_s1 + $0x8] sm:$0xff]   ;;  %v7285_v29 = vld [vmem:[%s9409_s1 + $0x10] sm:$0xff]   ;;  %v558_v30 = vld [vmem:[%s9413_s5 + $0x18] sm:$0xff] }
   0xb   :  { %v557_v31 = vld [vmem:[%s9413_s5 + $0x10] sm:$0xff]  ;;  %v560_v32 = vld [vmem:[%s9413_s5 + $0x28] sm:$0xff]  ;;  %v559_v33 = vld [vmem:[%s9413_s5 + $0x20] sm:$0xff] }
   0xc   :  { %6506 = vmatpush3.bf16.msra.mxu0 %v7277_v7  ;;  %v7286_v34 = vld [vmem:[%s9409_s1 + $0x18] sm:$0xff]   ;;  %v7287_v35 = vld [vmem:[%s9409_s1 + $0x20] sm:$0xff]   ;;  %v561_v37 = vld [vmem:[%s9413_s5 + $0x30] sm:$0xff] }
   0xd   :  { %6507 = vmatprep.subr.bf16.mxu0 %v7278_v10  ;;  %v562_v36 = vld [vmem:[%s9413_s5 + $0x38] sm:$0xff]  ;;  %v564_v38 = vld [vmem:[%s9413_s5 + $0x48] sm:$0xff]  ;;  %v563_v39 = vld [vmem:[%s9413_s5 + $0x40] sm:$0xff] }
   0xe   :  { %327 = vperm.xlu1 %7274, %v281_v11   ;;  %322 = vperm.xlu0 %7273, %v280_v12   ;;  %v7288_v40 = vld [vmem:[%s9409_s1 + $0x28] sm:$0xff]   ;;  %v7289_v41 = vld [vmem:[%s9409_s1 + $0x30] sm:$0xff]   ;;  %v566_v42 = vld [vmem:[%s9413_s5 + $0x58] sm:$0xff] }
   0xf   :  { %v565_v43 = vld [vmem:[%s9413_s5 + $0x50] sm:$0xff]  ;;  %v568_v44 = vld [vmem:[%s9413_s5 + $0x68] sm:$0xff]  ;;  %v567_v45 = vld [vmem:[%s9413_s5 + $0x60] sm:$0xff] }
  0x10   :  { %6508 = vmatpush3.bf16.msra.mxu0 %v7278_v10  ;;  %v7290_v46 = vld [vmem:[%s9409_s1 + $0x38] sm:$0xff]   ;;  %v569_v48 = vld [vmem:[%s9413_s5 + $0x70] sm:$0xff]  ;;  %v5574_v49 = vld [vmem:[%s9411_s3 + $0x88] sm:$0xff] }
  0x11   :  { %6509 = vmatprep.subr.bf16.mxu0 %v7279_v14  ;;  %v570_v47 = vld [vmem:[%s9413_s5 + $0x78] sm:$0xff]  ;;  %v5573_v50 = vld [vmem:[%s9411_s3 + $0x80] sm:$0xff]  ;;  %v5575_v52 = vld [vmem:[%s9411_s3 + $0x90] sm:$0xff] }
  0x12   :  { %337 = vperm.xlu1 %7274, %v283_v13   ;;  %332 = vperm.xlu0 %7273, %v282_v16   ;;  %v5576_v51 = vld [vmem:[%s9411_s3 + $0x98] sm:$0xff]  ;;  %v5578_v53 = vld [vmem:[%s9411_s3 + $0xa8] sm:$0xff]  ;;  %v5577_v54 = vld [vmem:[%s9411_s3 + $0xa0] sm:$0xff] }
  0x13   :  { %v5580_v55 = vld [vmem:[%s9411_s3 + $0xb8] sm:$0xff]  ;;  %v5579_v56 = vld [vmem:[%s9411_s3 + $0xb0] sm:$0xff]  ;;  %v5582_v57 = vld [vmem:[%s9411_s3 + $0xc8] sm:$0xff] }
  0x14   :  { %6510 = vmatpush3.bf16.msra.mxu0 %v7279_v14  ;;  %v5581_v58 = vld [vmem:[%s9411_s3 + $0xc0] sm:$0xff]  ;;  %v5584_v59 = vld [vmem:[%s9411_s3 + $0xd8] sm:$0xff]  ;;  %v5583_v60 = vld [vmem:[%s9411_s3 + $0xd0] sm:$0xff] }
  0x15   :  { %6511 = vmatprep.subr.bf16.mxu0 %v7280_v17  ;;  %v5586_v61 = vld [vmem:[%s9411_s3 + $0xe8] sm:$0xff]  ;;  %v5585_v62 = vld [vmem:[%s9411_s3 + $0xe0] sm:$0xff]  ;;  %v5588_v63 = vld [vmem:[%s9411_s3 + $0xf8] sm:$0xff] }
  0x16   :  { %347 = vperm.xlu1 %7274, %v285_v18   ;;  %342 = vperm.xlu0 %7273, %v284_v19   ;;  %v5587_v0 = vld [vmem:[%s9411_s3 + $0xf0] sm:$0xff]  ;;  %v5614_v1 = vld [vmem:[%s9413_s5 + $0x88] sm:$0xff]  ;;  %v5613_v2 = vld [vmem:[%s9413_s5 + $0x80] sm:$0xff] }
  0x17   :  { %v5616_v3 = vld [vmem:[%s9413_s5 + $0x98] sm:$0xff]  ;;  %v5615_v4 = vld [vmem:[%s9413_s5 + $0x90] sm:$0xff]  ;;  %v5618_v5 = vld [vmem:[%s9413_s5 + $0xa8] sm:$0xff] }
  0x18   :  { %6512 = vmatpush3.bf16.msra.mxu0 %v7280_v17  ;;  %v5617_v6 = vld [vmem:[%s9413_s5 + $0xa0] sm:$0xff]  ;;  %v5620_v7 = vld [vmem:[%s9413_s5 + $0xb8] sm:$0xff]  ;;  %v5619_v8 = vld [vmem:[%s9413_s5 + $0xb0] sm:$0xff] }
  0x19   :  { %6513 = vmatprep.subr.bf16.mxu0 %v7281_v20  ;;  %v5622_v9 = vld [vmem:[%s9413_s5 + $0xc8] sm:$0xff]  ;;  %v5621_v10 = vld [vmem:[%s9413_s5 + $0xc0] sm:$0xff]  ;;  %v5624_v11 = vld [vmem:[%s9413_s5 + $0xd8] sm:$0xff] }
  0x1a   :  { %357 = vperm.xlu1 %7274, %v287_v21   ;;  %352 = vperm.xlu0 %7273, %v286_v22   ;;  %v5623_v12 = vld [vmem:[%s9413_s5 + $0xd0] sm:$0xff]  ;;  %v5626_v13 = vld [vmem:[%s9413_s5 + $0xe8] sm:$0xff]  ;;  %v5625_v14 = vld [vmem:[%s9413_s5 + $0xe0] sm:$0xff] }
  0x1b   :  { %v5628_v15 = vld [vmem:[%s9413_s5 + $0xf8] sm:$0xff]  ;;  %v5627_v16 = vld [vmem:[%s9413_s5 + $0xf0] sm:$0xff]  ;;  %v5654_v17 = vld [vmem:[%s9411_s3 + $0x108] sm:$0xff] }
  0x1c   :  { %6514 = vmatpush3.bf16.msra.mxu0 %v7281_v20  ;;  %v5653_v18 = vld [vmem:[%s9411_s3 + $0x100] sm:$0xff]  ;;  %v5656_v21 = vld [vmem:[%s9411_s3 + $0x118] sm:$0xff]  ;;  %v5655_v22 = vld [vmem:[%s9411_s3 + $0x110] sm:$0xff] }
  0x1d   :  { %6515 = vmatprep.subr.bf16.mxu0 %v7282_v23 }
  0x1e   :  { %367 = vperm.xlu1 %7274, %v289_v24   ;;  %362 = vperm.xlu0 %7273, %v288_v25   ;;  %v5658_v25 = vld [vmem:[%s9411_s3 + $0x128] sm:$0xff] }
  0x20   :  { %6516 = vmatpush3.bf16.msra.mxu0 %v7282_v23 }
  0x22   :  { %578 = vperm.xlu1 %7274, %v556_v26   ;;  %573 = vperm.xlu0 %7273, %v555_v27   ;;  %v5657_v26 = vld [vmem:[%s9411_s3 + $0x120] sm:$0xff] }
  0x23   :  { %6518 = vmatmul.mubr.bf16.vlgmr.msra.gmra.mrb[0].mxu0 %v7284_v28 }
  0x24   :  { %6521 = vmatprep.mubr.bf16.mxu0 %v7285_v29  ;;  %v5660_v29 = vld [vmem:[%s9411_s3 + $0x138] sm:$0xff] }
  0x26   :  { %588 = vperm.xlu1 %7274, %v558_v30   ;;  %583 = vperm.xlu0 %7273, %v557_v31   ;;  %v5659_v30 = vld [vmem:[%s9411_s3 + $0x130] sm:$0xff] }
  0x2a   :  { %598 = vperm.xlu1 %7274, %v560_v32   ;;  %593 = vperm.xlu0 %7273, %v559_v33   ;;  %v5662_v33 = vld [vmem:[%s9411_s3 + $0x148] sm:$0xff] }
  0x2b   :  { %6522 = vmatmul.mubr.bf16.gmra.mrb[4].mxu0 %v7286_v34  ;;  %v5661_v34 = vld [vmem:[%s9411_s3 + $0x140] sm:$0xff] }
  0x2c   :  { %6525 = vmatprep.mubr.bf16.mxu0 %v7287_v35 }
  0x2e   :  { %608 = vperm.xlu1 %7274, %v562_v36   ;;  %603 = vperm.xlu0 %7273, %v561_v37  }
  0x32   :  { %618 = vperm.xlu1 %7274, %v564_v38   ;;  %613 = vperm.xlu0 %7273, %v563_v39  }
  0x33   :  { %6526 = vmatmul.mubr.bf16.gmra.mrb[8].mxu0 %v7288_v40 }
  0x34   :  { %6529 = vmatprep.mubr.bf16.mxu0 %v7289_v41 }
  0x36   :  { %628 = vperm.xlu1 %7274, %v566_v42   ;;  %623 = vperm.xlu0 %7273, %v565_v43  }
  0x3a   :  { %638 = vperm.xlu1 %7274, %v568_v44   ;;  %633 = vperm.xlu0 %7273, %v567_v45  }
  0x3b   :  { %6530 = vmatmul.mubr.bf16.gmra.mrb[12].mxu0 %v7290_v46 }
  0x3e   :  { %648 = vperm.xlu1 %7274, %v570_v47   ;;  %643 = vperm.xlu0 %7273, %v569_v48  }
  0x42   :  { %966 = vperm.xlu1 %7274, %v5574_v49   ;;  %961 = vperm.xlu0 %7273, %v5573_v50  }
  0x46   :  { %976 = vperm.xlu1 %7274, %v5576_v51   ;;  %971 = vperm.xlu0 %7273, %v5575_v52  }
  0x4a   :  { %986 = vperm.xlu1 %7274, %v5578_v53   ;;  %981 = vperm.xlu0 %7273, %v5577_v54  }
  0x4e   :  { %996 = vperm.xlu1 %7274, %v5580_v55   ;;  %991 = vperm.xlu0 %7273, %v5579_v56  }
  0x52   :  { %1006 = vperm.xlu1 %7274, %v5582_v57   ;;  %1001 = vperm.xlu0 %7273, %v5581_v58  }
  0x56   :  { %1016 = vperm.xlu1 %7274, %v5584_v59   ;;  %1011 = vperm.xlu0 %7273, %v5583_v60  }
  0x5a   :  { %1026 = vperm.xlu1 %7274, %v5586_v61   ;;  %1021 = vperm.xlu0 %7273, %v5585_v62  }
  0x5e   :  { %1036 = vperm.xlu1 %7274, %v5588_v63   ;;  %1031 = vperm.xlu0 %7273, %v5587_v0  }
  0x62   :  { %1249 = vperm.xlu1 %7274, %v5614_v1   ;;  %1244 = vperm.xlu0 %7273, %v5613_v2  }
  0x66   :  { %1259 = vperm.xlu1 %7274, %v5616_v3   ;;  %1254 = vperm.xlu0 %7273, %v5615_v4  }
  0x6a   :  { %1269 = vperm.xlu1 %7274, %v5618_v5   ;;  %1264 = vperm.xlu0 %7273, %v5617_v6  }
  0x6e   :  { %1279 = vperm.xlu1 %7274, %v5620_v7   ;;  %1274 = vperm.xlu0 %7273, %v5619_v8  }
  0x72   :  { %1289 = vperm.xlu1 %7274, %v5622_v9   ;;  %1284 = vperm.xlu0 %7273, %v5621_v10  }
  0x76   :  { %1299 = vperm.xlu1 %7274, %v5624_v11   ;;  %1294 = vperm.xlu0 %7273, %v5623_v12  }
  0x7a   :  { %1309 = vperm.xlu1 %7274, %v5626_v13   ;;  %1304 = vperm.xlu0 %7273, %v5625_v14  }
  0x7e   :  { %1319 = vperm.xlu1 %7274, %v5628_v15   ;;  %1314 = vperm.xlu0 %7273, %v5627_v16  }
  0x81   :  { %v7752_v19 = vpop.permute.xlu1 %302  ;;  %v7754_v20 = vpop.permute.xlu0 %292 }
  0x82   :  { %1637 = vperm.xlu1 %7274, %v5654_v17   ;;  %1632 = vperm.xlu0 %7273, %v5653_v18  }
  0x85   :  { %v7762_v23 = vpop.permute.xlu1 %307  ;;  %v7764_v24 = vpop.permute.xlu0 %297 }
  0x86   :  { %1647 = vperm.xlu1 %7274, %v5656_v21   ;;  %1642 = vperm.xlu0 %7273, %v5655_v22  }
  0x89   :  { %v7772_v27 = vpop.permute.xlu1 %317  ;;  %v7774_v28 = vpop.permute.xlu0 %312 }
  0x8a   :  { %1657 = vperm.xlu1 %7274, %v5658_v25   ;;  %1652 = vperm.xlu0 %7273, %v5657_v26  }
  0x8d   :  { %v7782_v31 = vpop.permute.xlu1 %327  ;;  %v7784_v32 = vpop.permute.xlu0 %322 }
  0x8e   :  { %1667 = vperm.xlu1 %7274, %v5660_v29   ;;  %1662 = vperm.xlu0 %7273, %v5659_v30  }
  0x91   :  { %v7792_v35 = vpop.permute.xlu1 %337  ;;  %v7794_v36 = vpop.permute.xlu0 %332 }
  0x92   :  { %1677 = vperm.xlu1 %7274, %v5662_v33   ;;  %1672 = vperm.xlu0 %7273, %v5661_v34  }
  0x93   :  { %11 = vsyncpa [#allocation3], 0  ;;  %v5664_v37 = vld [vmem:[%s9411_s3 + $0x158] sm:$0xff]  ;;  %v5663_v38 = vld [vmem:[%s9411_s3 + $0x150] sm:$0xff] }
  0x94   :  { %v5666_v41 = vld [vmem:[%s9411_s3 + $0x168] sm:$0xff]  ;;  %v5665_v42 = vld [vmem:[%s9411_s3 + $0x160] sm:$0xff]  ;;  %v5668_v46 = vld [vmem:[%s9411_s3 + $0x178] sm:$0xff] }
  0x95   :  { %v7802_v39 = vpop.permute.xlu1 %347  ;;  %v7804_v40 = vpop.permute.xlu0 %342  ;;  %v7291_v45 = vld [vmem:[%s9410_s2] sm:$0xff]   ;;  %v5667_v47 = vld [vmem:[%s9411_s3 + $0x170] sm:$0xff]  ;;  %v5694_v50 = vld [vmem:[%s9413_s5 + $0x108] sm:$0xff] }
  0x96   :  { %1687 = vperm.xlu1 %7274, %v5664_v37   ;;  %1682 = vperm.xlu0 %7273, %v5663_v38   ;;  %v5693_v51 = vld [vmem:[%s9413_s5 + $0x100] sm:$0xff]  ;;  %v5696_v54 = vld [vmem:[%s9413_s5 + $0x118] sm:$0xff]  ;;  %v5695_v55 = vld [vmem:[%s9413_s5 + $0x110] sm:$0xff] }
  0x97   :  { %6549 = vmatprep.mubr.bf16.mxu1 %v7291_v45  ;;  %v5698_v58 = vld [vmem:[%s9413_s5 + $0x128] sm:$0xff]  ;;  %v5697_v59 = vld [vmem:[%s9413_s5 + $0x120] sm:$0xff]  ;;  %v5700_v62 = vld [vmem:[%s9413_s5 + $0x138] sm:$0xff] }
  0x98   :  { %v5699_v63 = vld [vmem:[%s9413_s5 + $0x130] sm:$0xff]  ;;  %v5702_v2 = vld [vmem:[%s9413_s5 + $0x148] sm:$0xff]  ;;  %v5701_v3 = vld [vmem:[%s9413_s5 + $0x140] sm:$0xff] }
  0x99   :  { %v7812_v43 = vpop.permute.xlu1 %357  ;;  %v7814_v44 = vpop.permute.xlu0 %352  ;;  %v5704_v6 = vld [vmem:[%s9413_s5 + $0x158] sm:$0xff]  ;;  %v5703_v7 = vld [vmem:[%s9413_s5 + $0x150] sm:$0xff]  ;;  %v5706_v10 = vld [vmem:[%s9413_s5 + $0x168] sm:$0xff] }
  0x9a   :  { %1697 = vperm.xlu1 %7274, %v5666_v41   ;;  %1692 = vperm.xlu0 %7273, %v5665_v42   ;;  %v5705_v11 = vld [vmem:[%s9413_s5 + $0x160] sm:$0xff]  ;;  %v5708_v14 = vld [vmem:[%s9413_s5 + $0x178] sm:$0xff]  ;;  %v5707_v15 = vld [vmem:[%s9413_s5 + $0x170] sm:$0xff] }
  0x9b   :  { %v5734_v18 = vld [vmem:[%s9411_s3 + $0x188] sm:$0xff]  ;;  %v5733_v21 = vld [vmem:[%s9411_s3 + $0x180] sm:$0xff]  ;;  %v5736_v26 = vld [vmem:[%s9411_s3 + $0x198] sm:$0xff] }
  0x9c   :  { %v5735_v29 = vld [vmem:[%s9411_s3 + $0x190] sm:$0xff]  ;;  %v5738_v34 = vld [vmem:[%s9411_s3 + $0x1a8] sm:$0xff]  ;;  %v5737_v37 = vld [vmem:[%s9411_s3 + $0x1a0] sm:$0xff] }
  0x9d   :  { %v7825_v48 = vpop.permute.xlu1 %367  ;;  %v7827_v49 = vpop.permute.xlu0 %362  ;;  %v5740_v42 = vld [vmem:[%s9411_s3 + $0x1b8] sm:$0xff]  ;;  %v5739_v45 = vld [vmem:[%s9411_s3 + $0x1b0] sm:$0xff] }
  0x9e   :  { %1707 = vperm.xlu1 %7274, %v5668_v46   ;;  %1702 = vperm.xlu0 %7273, %v5667_v47  }
  0xa1   :  { %v7835_v52 = vpop.permute.xlu1 %578  ;;  %v7837_v53 = vpop.permute.xlu0 %573 }
  0xa2   :  { %1920 = vperm.xlu1 %7274, %v5694_v50   ;;  %1915 = vperm.xlu0 %7273, %v5693_v51   ;;  %v5742_v50 = vld [vmem:[%s9411_s3 + $0x1c8] sm:$0xff]  ;;  %v5741_v51 = vld [vmem:[%s9411_s3 + $0x1c0] sm:$0xff] }
  0xa5   :  { %v7845_v56 = vpop.permute.xlu1 %588  ;;  %v7847_v57 = vpop.permute.xlu0 %583 }
  0xa6   :  { %1930 = vperm.xlu1 %7274, %v5696_v54   ;;  %1925 = vperm.xlu0 %7273, %v5695_v55  }
  0xa9   :  { %v7855_v60 = vpop.permute.xlu1 %598  ;;  %v7857_v61 = vpop.permute.xlu0 %593 }
  0xaa   :  { %1940 = vperm.xlu1 %7274, %v5698_v58   ;;  %1935 = vperm.xlu0 %7273, %v5697_v59   ;;  %v5744_v58 = vld [vmem:[%s9411_s3 + $0x1d8] sm:$0xff]  ;;  %v5743_v59 = vld [vmem:[%s9411_s3 + $0x1d0] sm:$0xff] }
  0xad   :  { %v7865_v0 = vpop.permute.xlu1 %608  ;;  %v7867_v1 = vpop.permute.xlu0 %603 }
  0xae   :  { %1950 = vperm.xlu1 %7274, %v5700_v62   ;;  %1945 = vperm.xlu0 %7273, %v5699_v63  }
  0xb1   :  { %v7875_v4 = vpop.permute.xlu1 %618  ;;  %v7877_v5 = vpop.permute.xlu0 %613 }
  0xb2   :  { %1960 = vperm.xlu1 %7274, %v5702_v2   ;;  %1955 = vperm.xlu0 %7273, %v5701_v3   ;;  %v5746_v2 = vld [vmem:[%s9411_s3 + $0x1e8] sm:$0xff]  ;;  %v5745_v3 = vld [vmem:[%s9411_s3 + $0x1e0] sm:$0xff] }
  0xb5   :  { %v7885_v8 = vpop.permute.xlu1 %628  ;;  %v7887_v9 = vpop.permute.xlu0 %623 }
  0xb6   :  { %1970 = vperm.xlu1 %7274, %v5704_v6   ;;  %1965 = vperm.xlu0 %7273, %v5703_v7  }
  0xb9   :  { %v7895_v12 = vpop.permute.xlu1 %638  ;;  %v7897_v13 = vpop.permute.xlu0 %633 }
  0xba   :  { %1980 = vperm.xlu1 %7274, %v5706_v10   ;;  %1975 = vperm.xlu0 %7273, %v5705_v11   ;;  %v5748_v10 = vld [vmem:[%s9411_s3 + $0x1f8] sm:$0xff]  ;;  %v5747_v11 = vld [vmem:[%s9411_s3 + $0x1f0] sm:$0xff] }
  0xbd   :  { %v7905_v16 = vpop.permute.xlu1 %648  ;;  %v7907_v17 = vpop.permute.xlu0 %643 }
  0xbe   :  { %1990 = vperm.xlu1 %7274, %v5708_v14   ;;  %1985 = vperm.xlu0 %7273, %v5707_v15  }
  0xc1   :  { %v7915_v22 = vpop.permute.xlu1 %966  ;;  %v7917_v25 = vpop.permute.xlu0 %961 }
  0xc2   :  { %2308 = vperm.xlu1 %7274, %v5734_v18   ;;  %2303 = vperm.xlu0 %7273, %v5733_v21   ;;  %v5774_v18 = vld [vmem:[%s9413_s5 + $0x188] sm:$0xff]  ;;  %v5773_v21 = vld [vmem:[%s9413_s5 + $0x180] sm:$0xff] }
  0xc5   :  { %v7925_v30 = vpop.permute.xlu1 %976  ;;  %v7927_v33 = vpop.permute.xlu0 %971 }
  0xc6   :  { %2318 = vperm.xlu1 %7274, %v5736_v26   ;;  %2313 = vperm.xlu0 %7273, %v5735_v29  }
  0xc9   :  { %v7935_v38 = vpop.permute.xlu1 %986  ;;  %v7937_v41 = vpop.permute.xlu0 %981 }
  0xca   :  { %2328 = vperm.xlu1 %7274, %v5738_v34   ;;  %2323 = vperm.xlu0 %7273, %v5737_v37   ;;  %v5776_v34 = vld [vmem:[%s9413_s5 + $0x198] sm:$0xff]  ;;  %v5775_v37 = vld [vmem:[%s9413_s5 + $0x190] sm:$0xff] }
  0xcd   :  { %v7945_v46 = vpop.permute.xlu1 %996  ;;  %v7947_v47 = vpop.permute.xlu0 %991 }
  0xce   :  { %2338 = vperm.xlu1 %7274, %v5740_v42   ;;  %2333 = vperm.xlu0 %7273, %v5739_v45  }
  0xd1   :  { %v7955_v54 = vpop.permute.xlu1 %1006  ;;  %v7957_v55 = vpop.permute.xlu0 %1001 }
  0xd2   :  { %2348 = vperm.xlu1 %7274, %v5742_v50   ;;  %2343 = vperm.xlu0 %7273, %v5741_v51   ;;  %v5778_v50 = vld [vmem:[%s9413_s5 + $0x1a8] sm:$0xff]  ;;  %v5777_v51 = vld [vmem:[%s9413_s5 + $0x1a0] sm:$0xff] }
  0xd5   :  { %v7965_v62 = vpop.permute.xlu1 %1016  ;;  %v7967_v63 = vpop.permute.xlu0 %1011 }
  0xd6   :  { %2358 = vperm.xlu1 %7274, %v5744_v58   ;;  %2353 = vperm.xlu0 %7273, %v5743_v59  }
  0xd9   :  { %v7975_v6 = vpop.permute.xlu1 %1026  ;;  %v7977_v7 = vpop.permute.xlu0 %1021 }
  0xda   :  { %9415 = vst [vmem:[#allocation5_spill] sm:$0xff] %v7975_v6  ;;  %2368 = vperm.xlu1 %7274, %v5746_v2   ;;  %2363 = vperm.xlu0 %7273, %v5745_v3   ;;  %v5780_v2 = vld [vmem:[%s9413_s5 + $0x1b8] sm:$0xff]  ;;  %v5779_v3 = vld [vmem:[%s9413_s5 + $0x1b0] sm:$0xff] }
  0xdd   :  { %v7985_v14 = vpop.permute.xlu1 %1036  ;;  %v7987_v15 = vpop.permute.xlu0 %1031 }
  0xde   :  { %2378 = vperm.xlu1 %7274, %v5748_v10   ;;  %2373 = vperm.xlu0 %7273, %v5747_v11  }
  0xe1   :  { %v7995_v26 = vpop.permute.xlu1 %1249  ;;  %v7997_v29 = vpop.permute.xlu0 %1244 }
  0xe2   :  { %9416 = vst [vmem:[#allocation6_spill] sm:$0xff] %v7995_v26  ;;  %9417 = vst [vmem:[#allocation7_spill] sm:$0xff] %v7997_v29  ;;  %2591 = vperm.xlu1 %7274, %v5774_v18   ;;  %2586 = vperm.xlu0 %7273, %v5773_v21   ;;  %v5782_v18 = vld [vmem:[%s9413_s5 + $0x1c8] sm:$0xff]  ;;  %v5781_v21 = vld [vmem:[%s9413_s5 + $0x1c0] sm:$0xff] }
  0xe5   :  { %v8005_v42 = vpop.permute.xlu1 %1259  ;;  %v8007_v45 = vpop.permute.xlu0 %1254 }
  0xe6   :  { %9418 = vst [vmem:[#allocation8_spill] sm:$0xff] %v8005_v42  ;;  %9419 = vst [vmem:[#allocation9_spill] sm:$0xff] %v8007_v45  ;;  %2601 = vperm.xlu1 %7274, %v5776_v34   ;;  %2596 = vperm.xlu0 %7273, %v5775_v37   ;;  %v6104_v45 = vld [vmem:[%s9413_s5 + $0x3d8] sm:$0xff] }
  0xe9   :  { %v8015_v58 = vpop.permute.xlu1 %1269  ;;  %v8017_v59 = vpop.permute.xlu0 %1264 }
  0xea   :  { %9420 = vst [vmem:[#allocation10_spill] sm:$0xff] %v8015_v58  ;;  %9421 = vst [vmem:[#allocation11_spill] sm:$0xff] %v8017_v59  ;;  %2611 = vperm.xlu1 %7274, %v5778_v50   ;;  %2606 = vperm.xlu0 %7273, %v5777_v51   ;;  %v5784_v50 = vld [vmem:[%s9413_s5 + $0x1d8] sm:$0xff]  ;;  %v5783_v51 = vld [vmem:[%s9413_s5 + $0x1d0] sm:$0xff] }
  0xed   :  { %v8025_v10 = vpop.permute.xlu1 %1279  ;;  %v8027_v11 = vpop.permute.xlu0 %1274 }
  0xee   :  { %9422 = vst [vmem:[#allocation12_spill] sm:$0xff] %v8025_v10  ;;  %9423 = vst [vmem:[#allocation13_spill] sm:$0xff] %v8027_v11  ;;  %2621 = vperm.xlu1 %7274, %v5780_v2   ;;  %2616 = vperm.xlu0 %7273, %v5779_v3  }
  0xf1   :  { %v8035_v34 = vpop.permute.xlu1 %1289  ;;  %v8037_v37 = vpop.permute.xlu0 %1284 }
  0xf2   :  { %9424 = vst [vmem:[#allocation14_spill] sm:$0xff] %v8035_v34  ;;  %9425 = vst [vmem:[#allocation15_spill] sm:$0xff] %v8037_v37  ;;  %2631 = vperm.xlu1 %7274, %v5782_v18   ;;  %2626 = vperm.xlu0 %7273, %v5781_v21   ;;  %v5786_v18 = vld [vmem:[%s9413_s5 + $0x1e8] sm:$0xff]  ;;  %v5785_v21 = vld [vmem:[%s9413_s5 + $0x1e0] sm:$0xff] }
  0xf5   :  { %v8045_v2 = vpop.permute.xlu1 %1299  ;;  %v8047_v3 = vpop.permute.xlu0 %1294 }
  0xf6   :  { %9426 = vst [vmem:[#allocation16_spill] sm:$0xff] %v8045_v2  ;;  %9427 = vst [vmem:[#allocation17_spill] sm:$0xff] %v8047_v3  ;;  %2641 = vperm.xlu1 %7274, %v5784_v50   ;;  %2636 = vperm.xlu0 %7273, %v5783_v51   ;;  %v6519_v58 = vpop.f32.mrb[0].mxu0  ;;  %v5788_v51 = vld [vmem:[%s9413_s5 + $0x1f8] sm:$0xff]  ;;  %v5787_v3 = vld [vmem:[%s9413_s5 + $0x1f0] sm:$0xff] }
  0xf7   :  { %v187_v34 = vpop.f32.mrb[1].mxu0 }
  0xf8   :  { %v6520_v37 = vpop.f32.mrb[2].mxu0 }
  0xf9   :  { %v267_v10 = vpack.c.bf16 %v6520_v37, %v6519_v58  ;;  %v8055_v59 = vpop.permute.xlu1 %1309  ;;  %v8057_v11 = vpop.permute.xlu0 %1304 }
  0xfa   :  { %9428 = vst [vmem:[#allocation18_spill] sm:$0xff] %v8055_v59  ;;  %9429 = vst [vmem:[#allocation19_spill] sm:$0xff] %v8057_v11  ;;  %v190_v2 = vpop.f32.mrb[3].mxu0  ;;  %2651 = vperm.xlu1 %7274, %v5786_v18   ;;  %2646 = vperm.xlu0 %7273, %v5785_v21   ;;  %v5813_v21 = vld [vmem:[%s9411_s3 + $0x200] sm:$0xff] }
  0xfb   :  { %v266_v50 = vpack.c.bf16 %v190_v2, %v187_v34  ;;  %v5814_v34 = vld [vmem:[%s9411_s3 + $0x208] sm:$0xff] }
  0xfd   :  { %6533 = vmatprep.subr.bf16.mxu1 %v266_v50  ;;  %v8065_v26 = vpop.permute.xlu1 %1319  ;;  %v8067_v58 = vpop.permute.xlu0 %1314 }
  0xfe   :  { %9430 = vst [vmem:[#allocation20_spill] sm:$0xff] %v8065_v26  ;;  %9431 = vst [vmem:[#allocation21_spill] sm:$0xff] %v8067_v58  ;;  %6534 = vmatpush3.bf16.msra.mxu1 %v266_v50  ;;  %2661 = vperm.xlu1 %7274, %v5788_v51   ;;  %v6523_v37 = vpop.f32.mrb[4].mxu0  ;;  %v5816_v51 = vld [vmem:[%s9411_s3 + $0x218] sm:$0xff]  ;;  %v5815_v58 = vld [vmem:[%s9411_s3 + $0x210] sm:$0xff] }
  0xff   :  { %2656 = vperm.xlu0 %7273, %v5787_v3   ;;  %6535 = vmatprep.subr.bf16.mxu1 %v267_v10  ;;  %v203_v18 = vpop.f32.mrb[5].mxu0 }
 0x100   :  { %v6524_v2 = vpop.f32.mrb[6].mxu0 }
 0x101   :  { %v269_v59 = vpack.c.bf16 %v6524_v2, %v6523_v37  ;;  %v8075_v11 = vpop.permute.xlu1 %1637  ;;  %v8077_v26 = vpop.permute.xlu0 %1632 }
 0x102   :  { %9432 = vst [vmem:[#allocation22_spill] sm:$0xff] %v8075_v11  ;;  %9433 = vst [vmem:[#allocation23_spill] sm:$0xff] %v8077_v26  ;;  %v206_v50 = vpop.f32.mrb[7].mxu0  ;;  %6536 = vmatpush3.bf16.msra.mxu1 %v267_v10  ;;  %2979 = vperm.xlu1 %7274, %v5814_v34   ;;  %v5819_v26 = vld [vmem:[%s9411_s3 + $0x230] sm:$0xff] }
 0x103   :  { %v268_v3 = vpack.c.bf16 %v206_v50, %v203_v18  ;;  %2974 = vperm.xlu0 %7273, %v5813_v21   ;;  %v5818_v18 = vld [vmem:[%s9411_s3 + $0x228] sm:$0xff]  ;;  %v5817_v21 = vld [vmem:[%s9411_s3 + $0x220] sm:$0xff] }
 0x105   :  { %6537 = vmatprep.subr.bf16.mxu1 %v268_v3  ;;  %v8085_v42 = vpop.permute.xlu1 %1647  ;;  %v8087_v37 = vpop.permute.xlu0 %1642 }
 0x106   :  { %9434 = vst [vmem:[#allocation24_spill] sm:$0xff] %v8085_v42  ;;  %9435 = vst [vmem:[#allocation25_spill] sm:$0xff] %v8087_v37  ;;  %6538 = vmatpush3.bf16.msra.mxu1 %v268_v3  ;;  %2989 = vperm.xlu1 %7274, %v5816_v51   ;;  %v6527_v2 = vpop.f32.mrb[8].mxu0  ;;  %v5820_v51 = vld [vmem:[%s9411_s3 + $0x238] sm:$0xff] }
 0x107   :  { %2984 = vperm.xlu0 %7273, %v5815_v58   ;;  %6539 = vmatprep.subr.bf16.mxu1 %v269_v59  ;;  %v219_v10 = vpop.f32.mrb[9].mxu0 }
 0x108   :  { %v6528_v34 = vpop.f32.mrb[10].mxu0 }
 0x109   :  { %v271_v50 = vpack.c.bf16 %v6528_v34, %v6527_v2  ;;  %v8095_v11 = vpop.permute.xlu1 %1657  ;;  %v8097_v42 = vpop.permute.xlu0 %1652 }
 0x10a   :  { %9436 = vst [vmem:[#allocation26_spill] sm:$0xff] %v8095_v11  ;;  %9437 = vst [vmem:[#allocation27_spill] sm:$0xff] %v8097_v42  ;;  %v222_v3 = vpop.f32.mrb[11].mxu0  ;;  %6540 = vmatpush3.bf16.msra.mxu1 %v269_v59  ;;  %2999 = vperm.xlu1 %7274, %v5818_v18   ;;  %v5823_v42 = vld [vmem:[%s9411_s3 + $0x250] sm:$0xff] }
 0x10b   :  { %v270_v58 = vpack.c.bf16 %v222_v3, %v219_v10  ;;  %2994 = vperm.xlu0 %7273, %v5817_v21   ;;  %v5822_v10 = vld [vmem:[%s9411_s3 + $0x248] sm:$0xff]  ;;  %v5821_v21 = vld [vmem:[%s9411_s3 + $0x240] sm:$0xff] }
 0x10d   :  { %6541 = vmatprep.subr.bf16.mxu1 %v270_v58  ;;  %v8105_v37 = vpop.permute.xlu1 %1667  ;;  %v8107_v2 = vpop.permute.xlu0 %1662 }
 0x10e   :  { %9438 = vst [vmem:[#allocation28_spill] sm:$0xff] %v8105_v37  ;;  %9439 = vst [vmem:[#allocation29_spill] sm:$0xff] %v8107_v2  ;;  %6542 = vmatpush3.bf16.msra.mxu1 %v270_v58  ;;  %3009 = vperm.xlu1 %7274, %v5820_v51   ;;  %v6531_v34 = vpop.f32.mrb[12].mxu0  ;;  %v5824_v51 = vld [vmem:[%s9411_s3 + $0x258] sm:$0xff] }
 0x10f   :  { %3004 = vperm.xlu0 %7273, %v5819_v26   ;;  %6543 = vmatprep.subr.bf16.mxu1 %v271_v50  ;;  %v235_v59 = vpop.f32.mrb[13].mxu0 }
 0x110   :  { %v6532_v18 = vpop.f32.mrb[14].mxu0 }
 0x111   :  { %v273_v3 = vpack.c.bf16 %v6532_v18, %v6531_v34  ;;  %v8115_v11 = vpop.permute.xlu1 %1677  ;;  %v8117_v37 = vpop.permute.xlu0 %1672 }
 0x112   :  { %9440 = vst [vmem:[#allocation30_spill] sm:$0xff] %v8115_v11  ;;  %9441 = vst [vmem:[#allocation31_spill] sm:$0xff] %v8117_v37  ;;  %v238_v58 = vpop.f32.mrb[15].mxu0  ;;  %6544 = vmatpush3.bf16.msra.mxu1 %v271_v50  ;;  %3019 = vperm.xlu1 %7274, %v5822_v10   ;;  %v5826_v50 = vld [vmem:[%s9411_s3 + $0x268] sm:$0xff] }
 0x113   :  { %v272_v26 = vpack.c.bf16 %v238_v58, %v235_v59  ;;  %3014 = vperm.xlu0 %7273, %v5821_v21   ;;  %v5825_v59 = vld [vmem:[%s9411_s3 + $0x260] sm:$0xff]  ;;  %v7292_v21 = vld [vmem:[%s9410_s2 + $0x8] sm:$0xff]   ;;  %v5828_v58 = vld [vmem:[%s9411_s3 + $0x278] sm:$0xff] }
 0x115   :  { %6545 = vmatprep.subr.bf16.mxu1 %v272_v26  ;;  %v8125_v2 = vpop.permute.xlu1 %1687  ;;  %v8127_v34 = vpop.permute.xlu0 %1682 }
 0x116   :  { %9442 = vst [vmem:[#allocation32_spill] sm:$0xff] %v8125_v2  ;;  %9443 = vst [vmem:[#allocation33_spill] sm:$0xff] %v8127_v34  ;;  %6546 = vmatpush3.bf16.msra.mxu1 %v272_v26  ;;  %3029 = vperm.xlu1 %7274, %v5824_v51   ;;  %v7419_v26 = vld [vmem:[%s9408_s0] sm:$0xff]   ;;  %v5827_v51 = vld [vmem:[%s9411_s3 + $0x270] sm:$0xff] }
 0x117   :  { %3024 = vperm.xlu0 %7273, %v5823_v42   ;;  %6547 = vmatprep.subr.bf16.mxu1 %v273_v3  ;;  %v7293_v42 = vld [vmem:[%s9410_s2 + $0x10] sm:$0xff]  }
 0x119   :  { %v8135_v10 = vpop.permute.xlu1 %1697  ;;  %v8137_v18 = vpop.permute.xlu0 %1692 }
 0x11a   :  { %9444 = vst [vmem:[#allocation34_spill] sm:$0xff] %v8135_v10  ;;  %9445 = vst [vmem:[#allocation35_spill] sm:$0xff] %v8137_v18  ;;  %6548 = vmatpush3.bf16.msra.mxu1 %v273_v3  ;;  %3039 = vperm.xlu1 %7274, %v5826_v50   ;;  %v5853_v10 = vld [vmem:[%s9413_s5 + $0x200] sm:$0xff] }
 0x11b   :  { %3034 = vperm.xlu0 %7273, %v5825_v59   ;;  %6597 = vmatprep.subr.bf16.mxu1 %v7419_v26  ;;  %v5854_v59 = vld [vmem:[%s9413_s5 + $0x208] sm:$0xff] }
 0x11d   :  { %6550 = vmatmul.mubr.bf16.vlgmr.msra.gmra.mrb[0].mxu1 %v7292_v21  ;;  %v8154_v3 = vpop.permute.xlu1 %1707  ;;  %v8156_v50 = vpop.permute.xlu0 %1702  ;;  %v7420_v21 = vld [vmem:[%s9408_s0 + $0x8] sm:$0xff]  }
 0x11e   :  { %9446 = vst [vmem:[#allocation36_spill] sm:$0xff] %v8154_v3  ;;  %9447 = vst [vmem:[#allocation37_spill] sm:$0xff] %v8156_v50  ;;  %3049 = vperm.xlu1 %7274, %v5828_v58   ;;  %6553 = vmatprep.mubr.bf16.mxu1 %v7293_v42  ;;  %v7294_v42 = vld [vmem:[%s9410_s2 + $0x18] sm:$0xff]   ;;  %v7295_v58 = vld [vmem:[%s9410_s2 + $0x20] sm:$0xff]  }
 0x11f   :  { %3044 = vperm.xlu0 %7273, %v5827_v51   ;;  %6598 = vmatpush3.bf16.msra.mxu1 %v7419_v26  ;;  %v5856_v26 = vld [vmem:[%s9413_s5 + $0x218] sm:$0xff]  ;;  %v5855_v51 = vld [vmem:[%s9413_s5 + $0x210] sm:$0xff] }
 0x120   :  { %6599 = vmatprep.subr.bf16.mxu1 %v7420_v21  ;;  %v8255_v50 = vld [vmem:[%s9408_s0 + $0x30] sm:$0xff]  }
 0x121   :  { %v8167_v3 = vpop.permute.xlu1 %1920  ;;  %v8169_v18 = vpop.permute.xlu0 %1915 }
 0x122   :  { %9448 = vst [vmem:[#allocation38_spill] sm:$0xff] %v8167_v3  ;;  %9449 = vst [vmem:[#allocation39_spill] sm:$0xff] %v8169_v18  ;;  %3262 = vperm.xlu1 %7274, %v5854_v59   ;;  %v7421_v3 = vld [vmem:[%s9408_s0 + $0x10] sm:$0xff]  }
 0x123   :  { %3257 = vperm.xlu0 %7273, %v5853_v10   ;;  %6600 = vmatpush3.bf16.msra.mxu1 %v7420_v21  ;;  %v5858_v10 = vld [vmem:[%s9413_s5 + $0x228] sm:$0xff]  ;;  %v5857_v21 = vld [vmem:[%s9413_s5 + $0x220] sm:$0xff] }
 0x124   :  { %6601 = vmatprep.subr.bf16.mxu1 %v7421_v3 }
 0x125   :  { %6554 = vmatmul.mubr.bf16.gmra.mrb[4].mxu1 %v7294_v42  ;;  %v8186_v59 = vpop.permute.xlu1 %1930  ;;  %v8188_v18 = vpop.permute.xlu0 %1925  ;;  %v7422_v42 = vld [vmem:[%s9408_s0 + $0x18] sm:$0xff]  }
 0x126   :  { %9450 = vst [vmem:[#allocation40_spill] sm:$0xff] %v8186_v59  ;;  %9451 = vst [vmem:[#allocation41_spill] sm:$0xff] %v8188_v18  ;;  %3272 = vperm.xlu1 %7274, %v5856_v26   ;;  %6557 = vmatprep.mubr.bf16.mxu1 %v7295_v58  ;;  %v7296_v58 = vld [vmem:[%s9410_s2 + $0x28] sm:$0xff]   ;;  %v5860_v26 = vld [vmem:[%s9413_s5 + $0x238] sm:$0xff] }
 0x127   :  { %3267 = vperm.xlu0 %7273, %v5855_v51   ;;  %6602 = vmatpush3.bf16.msra.mxu1 %v7421_v3  ;;  %v7297_v3 = vld [vmem:[%s9410_s2 + $0x30] sm:$0xff]  }
 0x128   :  { %6603 = vmatprep.subr.bf16.mxu1 %v7422_v42  ;;  %v5859_v51 = vld [vmem:[%s9413_s5 + $0x230] sm:$0xff] }
 0x129   :  { %v8199_v59 = vpop.permute.xlu1 %1940  ;;  %v8201_v18 = vpop.permute.xlu0 %1935 }
 0x12a   :  { %9452 = vst [vmem:[#allocation42_spill] sm:$0xff] %v8199_v59  ;;  %9453 = vst [vmem:[#allocation43_spill] sm:$0xff] %v8201_v18  ;;  %3282 = vperm.xlu1 %7274, %v5858_v10   ;;  %v8218_v59 = vld [vmem:[%s9408_s0 + $0x20] sm:$0xff]  }
 0x12b   :  { %3277 = vperm.xlu0 %7273, %v5857_v21   ;;  %6604 = vmatpush3.bf16.msra.mxu1 %v7422_v42  ;;  %v5862_v42 = vld [vmem:[%s9413_s5 + $0x248] sm:$0xff]  ;;  %v5861_v18 = vld [vmem:[%s9413_s5 + $0x240] sm:$0xff] }
 0x12c   :  { %6605 = vmatprep.subr.bf16.mxu1 %v8218_v59 }
 0x12d   :  { %6558 = vmatmul.mubr.bf16.gmra.mrb[8].mxu1 %v7296_v58  ;;  %v8221_v10 = vpop.permute.xlu1 %1950  ;;  %v8223_v21 = vpop.permute.xlu0 %1945  ;;  %v8235_v58 = vld [vmem:[%s9408_s0 + $0x28] sm:$0xff]  }
 0x12e   :  { %9454 = vst [vmem:[#allocation44_spill] sm:$0xff] %v8221_v10  ;;  %9455 = vst [vmem:[#allocation45_spill] sm:$0xff] %v8223_v21  ;;  %3292 = vperm.xlu1 %7274, %v5860_v26   ;;  %6561 = vmatprep.mubr.bf16.mxu1 %v7297_v3  ;;  %v7298_v3 = vld [vmem:[%s9410_s2 + $0x38] sm:$0xff]   ;;  %v5863_v21 = vld [vmem:[%s9413_s5 + $0x250] sm:$0xff] }
 0x12f   :  { %3287 = vperm.xlu0 %7273, %v5859_v51   ;;  %6606 = vmatpush3.bf16.msra.mxu1 %v8218_v59  ;;  %v5864_v10 = vld [vmem:[%s9413_s5 + $0x258] sm:$0xff] }
 0x130   :  { %6607 = vmatprep.subr.bf16.mxu1 %v8235_v58 }
 0x131   :  { %v8241_v26 = vpop.permute.xlu1 %1960  ;;  %v8243_v51 = vpop.permute.xlu0 %1955 }
 0x132   :  { %9456 = vst [vmem:[#allocation46_spill] sm:$0xff] %v8241_v26  ;;  %3302 = vperm.xlu1 %7274, %v5862_v42   ;;  %9457 = vst [vmem:[#allocation47_spill] sm:$0xff] %v8243_v51  ;;  %v5865_v26 = vld [vmem:[%s9413_s5 + $0x260] sm:$0xff]  ;;  %v8270_v51 = vld [vmem:[%s9408_s0 + $0x38] sm:$0xff]  }
 0x133   :  { %3297 = vperm.xlu0 %7273, %v5861_v18   ;;  %6608 = vmatpush3.bf16.msra.mxu1 %v8235_v58  ;;  %v5866_v18 = vld [vmem:[%s9413_s5 + $0x268] sm:$0xff] }
 0x134   :  { %6609 = vmatprep.subr.bf16.mxu1 %v8255_v50 }
 0x135   :  { %6562 = vmatmul.mubr.bf16.gmra.mrb[12].mxu1 %v7298_v3  ;;  %v8262_v42 = vpop.permute.xlu1 %1970  ;;  %v5867_v3 = vld [vmem:[%s9413_s5 + $0x270] sm:$0xff] }
 0x136   :  { %3312 = vperm.xlu1 %7274, %v5864_v10   ;;  %9458 = vst [vmem:[#allocation48_spill] sm:$0xff] %v8262_v42  ;;  %v8273_v10 = vpop.permute.xlu0 %1965 }
 0x137   :  { %3307 = vperm.xlu0 %7273, %v5863_v21   ;;  %6610 = vmatpush3.bf16.msra.mxu1 %v8255_v50  ;;  %9459 = vst [vmem:[#allocation49_spill] sm:$0xff] %v8273_v10  ;;  %v5868_v21 = vld [vmem:[%s9413_s5 + $0x278] sm:$0xff] }
 0x138   :  { %6611 = vmatprep.subr.bf16.mxu1 %v8270_v51  ;;  %v5896_v10 = vld [vmem:[%s9411_s3 + $0x298] sm:$0xff] }
 0x139   :  { %v8282_v42 = vpop.permute.xlu1 %1980 }
 0x13a   :  { %3322 = vperm.xlu1 %7274, %v5866_v18   ;;  %9460 = vst [vmem:[#allocation50_spill] sm:$0xff] %v8282_v42  ;;  %v8284_v11 = vpop.permute.xlu0 %1975  ;;  %v5893_v18 = vld [vmem:[%s9411_s3 + $0x280] sm:$0xff]  ;;  %v5898_v42 = vld [vmem:[%s9411_s3 + $0x2a8] sm:$0xff] }
 0x13b   :  { %3317 = vperm.xlu0 %7273, %v5865_v26   ;;  %6612 = vmatpush3.bf16.msra.mxu1 %v8270_v51  ;;  %9461 = vst [vmem:[#allocation51_spill] sm:$0xff] %v8284_v11  ;;  %v5894_v26 = vld [vmem:[%s9411_s3 + $0x288] sm:$0xff]  ;;  %v5900_v11 = vld [vmem:[%s9411_s3 + $0x2b8] sm:$0xff] }
 0x13d   :  { %v8295_v2 = vpop.permute.xlu1 %1990 }
 0x13e   :  { %3332 = vperm.xlu1 %7274, %v5868_v21   ;;  %9462 = vst [vmem:[#allocation52_spill] sm:$0xff] %v8295_v2  ;;  %v5895_v21 = vld [vmem:[%s9411_s3 + $0x290] sm:$0xff] }
 0x13f   :  { %3327 = vperm.xlu0 %7273, %v5867_v3   ;;  %v8300_v3 = vpop.permute.xlu0 %1985 }
 0x140   :  { %9463 = vst [vmem:[#allocation53_spill] sm:$0xff] %v8300_v3 }
 0x142   :  { %3650 = vperm.xlu1 %7274, %v5894_v26   ;;  %v5897_v26 = vld [vmem:[%s9411_s3 + $0x2a0] sm:$0xff] }
 0x143   :  { %3645 = vperm.xlu0 %7273, %v5893_v18   ;;  %v8308_v18 = vpop.permute.xlu1 %2308  ;;  %v8310_v2 = vpop.permute.xlu0 %2303 }
 0x144   :  { %9464 = vst [vmem:[#allocation54_spill] sm:$0xff] %v8308_v18  ;;  %9465 = vst [vmem:[#allocation55_spill] sm:$0xff] %v8310_v2  ;;  %v5904_v18 = vld [vmem:[%s9411_s3 + $0x2d8] sm:$0xff]  ;;  %v5906_v2 = vld [vmem:[%s9411_s3 + $0x2e8] sm:$0xff] }
 0x146   :  { %3660 = vperm.xlu1 %7274, %v5896_v10   ;;  %v5899_v10 = vld [vmem:[%s9411_s3 + $0x2b0] sm:$0xff] }
 0x147   :  { %3655 = vperm.xlu0 %7273, %v5895_v21   ;;  %v5902_v21 = vld [vmem:[%s9411_s3 + $0x2c8] sm:$0xff]  ;;  %v8321_v3 = vpop.permute.xlu1 %2318 }
 0x148   :  { %9466 = vst [vmem:[#allocation56_spill] sm:$0xff] %v8321_v3 }
 0x14a   :  { %3670 = vperm.xlu1 %7274, %v5898_v42   ;;  %v5901_v42 = vld [vmem:[%s9411_s3 + $0x2c0] sm:$0xff] }
 0x14b   :  { %3665 = vperm.xlu0 %7273, %v5897_v26   ;;  %v8326_v26 = vpop.permute.xlu0 %2313 }
 0x14c   :  { %9467 = vst [vmem:[#allocation57_spill] sm:$0xff] %v8326_v26 }
 0x14e   :  { %3680 = vperm.xlu1 %7274, %v5900_v11   ;;  %v5903_v11 = vld [vmem:[%s9411_s3 + $0x2d0] sm:$0xff] }
 0x14f   :  { %3675 = vperm.xlu0 %7273, %v5899_v10   ;;  %v8334_v10 = vpop.permute.xlu1 %2328  ;;  %v8336_v3 = vpop.permute.xlu0 %2323 }
 0x150   :  { %9468 = vst [vmem:[#allocation58_spill] sm:$0xff] %v8334_v10  ;;  %9469 = vst [vmem:[#allocation59_spill] sm:$0xff] %v8336_v3  ;;  %v5934_v10 = vld [vmem:[%s9413_s5 + $0x288] sm:$0xff]  ;;  %v5936_v3 = vld [vmem:[%s9413_s5 + $0x298] sm:$0xff] }
 0x152   :  { %3690 = vperm.xlu1 %7274, %v5902_v21   ;;  %v5905_v21 = vld [vmem:[%s9411_s3 + $0x2e0] sm:$0xff] }
 0x153   :  { %3685 = vperm.xlu0 %7273, %v5901_v42   ;;  %v5908_v42 = vld [vmem:[%s9411_s3 + $0x2f8] sm:$0xff]  ;;  %v8347_v26 = vpop.permute.xlu1 %2338 }
 0x154   :  { %9470 = vst [vmem:[#allocation60_spill] sm:$0xff] %v8347_v26 }
 0x156   :  { %3700 = vperm.xlu1 %7274, %v5904_v18   ;;  %v5907_v18 = vld [vmem:[%s9411_s3 + $0x2f0] sm:$0xff] }
 0x157   :  { %3695 = vperm.xlu0 %7273, %v5903_v11   ;;  %v8352_v11 = vpop.permute.xlu0 %2333 }
 0x158   :  { %9471 = vst [vmem:[#allocation61_spill] sm:$0xff] %v8352_v11 }
 0x15a   :  { %3710 = vperm.xlu1 %7274, %v5906_v2   ;;  %v5933_v2 = vld [vmem:[%s9413_s5 + $0x280] sm:$0xff] }
 0x15b   :  { %3705 = vperm.xlu0 %7273, %v5905_v21   ;;  %v8360_v21 = vpop.permute.xlu1 %2348  ;;  %v8362_v26 = vpop.permute.xlu0 %2343 }
 0x15c   :  { %9472 = vst [vmem:[#allocation62_spill] sm:$0xff] %v8360_v21  ;;  %9473 = vst [vmem:[#allocation63_spill] sm:$0xff] %v8362_v26  ;;  %v5940_v21 = vld [vmem:[%s9413_s5 + $0x2b8] sm:$0xff]  ;;  %v5942_v26 = vld [vmem:[%s9413_s5 + $0x2c8] sm:$0xff] }
 0x15e   :  { %3720 = vperm.xlu1 %7274, %v5908_v42   ;;  %v5935_v42 = vld [vmem:[%s9413_s5 + $0x290] sm:$0xff] }
 0x15f   :  { %3715 = vperm.xlu0 %7273, %v5907_v18   ;;  %v5938_v18 = vld [vmem:[%s9413_s5 + $0x2a8] sm:$0xff]  ;;  %v8373_v11 = vpop.permute.xlu1 %2358 }
 0x160   :  { %9474 = vst [vmem:[#allocation64_spill] sm:$0xff] %v8373_v11 }
 0x162   :  { %3933 = vperm.xlu1 %7274, %v5934_v10   ;;  %v5937_v10 = vld [vmem:[%s9413_s5 + $0x2a0] sm:$0xff] }
 0x163   :  { %3928 = vperm.xlu0 %7273, %v5933_v2   ;;  %v8378_v2 = vpop.permute.xlu0 %2353 }
 0x164   :  { %9475 = vst [vmem:[#allocation65_spill] sm:$0xff] %v8378_v2 }
 0x166   :  { %3943 = vperm.xlu1 %7274, %v5936_v3   ;;  %v5939_v3 = vld [vmem:[%s9413_s5 + $0x2b0] sm:$0xff] }
 0x167   :  { %3938 = vperm.xlu0 %7273, %v5935_v42   ;;  %v8386_v42 = vpop.permute.xlu1 %2368  ;;  %v8388_v11 = vpop.permute.xlu0 %2363 }
 0x168   :  { %9476 = vst [vmem:[#allocation66_spill] sm:$0xff] %v8386_v42  ;;  %9477 = vst [vmem:[#allocation67_spill] sm:$0xff] %v8388_v11  ;;  %v5946_v42 = vld [vmem:[%s9413_s5 + $0x2e8] sm:$0xff]  ;;  %v5948_v11 = vld [vmem:[%s9413_s5 + $0x2f8] sm:$0xff] }
 0x16a   :  { %3953 = vperm.xlu1 %7274, %v5938_v18   ;;  %v5941_v18 = vld [vmem:[%s9413_s5 + $0x2c0] sm:$0xff] }
 0x16b   :  { %3948 = vperm.xlu0 %7273, %v5937_v10   ;;  %v5944_v10 = vld [vmem:[%s9413_s5 + $0x2d8] sm:$0xff]  ;;  %v8399_v2 = vpop.permute.xlu1 %2378 }
 0x16c   :  { %9478 = vst [vmem:[#allocation68_spill] sm:$0xff] %v8399_v2 }
 0x16e   :  { %3963 = vperm.xlu1 %7274, %v5940_v21   ;;  %v5943_v21 = vld [vmem:[%s9413_s5 + $0x2d0] sm:$0xff] }
 0x16f   :  { %3958 = vperm.xlu0 %7273, %v5939_v3   ;;  %v8404_v3 = vpop.permute.xlu0 %2373 }
 0x170   :  { %9479 = vst [vmem:[#allocation69_spill] sm:$0xff] %v8404_v3 }
 0x172   :  { %3973 = vperm.xlu1 %7274, %v5942_v26   ;;  %v5945_v26 = vld [vmem:[%s9413_s5 + $0x2e0] sm:$0xff] }
 0x173   :  { %3968 = vperm.xlu0 %7273, %v5941_v18   ;;  %v8412_v18 = vpop.permute.xlu1 %2591  ;;  %v8414_v2 = vpop.permute.xlu0 %2586 }
 0x174   :  { %9480 = vst [vmem:[#allocation70_spill] sm:$0xff] %v8412_v18  ;;  %9481 = vst [vmem:[#allocation71_spill] sm:$0xff] %v8414_v2  ;;  %v5976_v18 = vld [vmem:[%s9411_s3 + $0x318] sm:$0xff]  ;;  %v5978_v2 = vld [vmem:[%s9411_s3 + $0x328] sm:$0xff] }
 0x176   :  { %3983 = vperm.xlu1 %7274, %v5944_v10   ;;  %v5947_v10 = vld [vmem:[%s9413_s5 + $0x2f0] sm:$0xff] }
 0x177   :  { %3978 = vperm.xlu0 %7273, %v5943_v21   ;;  %v5974_v21 = vld [vmem:[%s9411_s3 + $0x308] sm:$0xff]  ;;  %v8425_v3 = vpop.permute.xlu1 %2601 }
 0x178   :  { %9482 = vst [vmem:[#allocation72_spill] sm:$0xff] %v8425_v3 }
 0x17a   :  { %3993 = vperm.xlu1 %7274, %v5946_v42   ;;  %v5973_v42 = vld [vmem:[%s9411_s3 + $0x300] sm:$0xff] }
 0x17b   :  { %3988 = vperm.xlu0 %7273, %v5945_v26   ;;  %v8430_v26 = vpop.permute.xlu0 %2596 }
 0x17c   :  { %9483 = vst [vmem:[#allocation73_spill] sm:$0xff] %v8430_v26 }
 0x17e   :  { %4003 = vperm.xlu1 %7274, %v5948_v11   ;;  %v5975_v11 = vld [vmem:[%s9411_s3 + $0x310] sm:$0xff] }
 0x17f   :  { %3998 = vperm.xlu0 %7273, %v5947_v10   ;;  %v8438_v10 = vpop.permute.xlu1 %2611  ;;  %v8440_v3 = vpop.permute.xlu0 %2606 }
 0x180   :  { %9484 = vst [vmem:[#allocation74_spill] sm:$0xff] %v8438_v10  ;;  %9485 = vst [vmem:[#allocation75_spill] sm:$0xff] %v8440_v3  ;;  %v5982_v10 = vld [vmem:[%s9411_s3 + $0x348] sm:$0xff]  ;;  %v5984_v3 = vld [vmem:[%s9411_s3 + $0x358] sm:$0xff] }
 0x182   :  { %4321 = vperm.xlu1 %7274, %v5974_v21   ;;  %v5977_v21 = vld [vmem:[%s9411_s3 + $0x320] sm:$0xff] }
 0x183   :  { %4316 = vperm.xlu0 %7273, %v5973_v42   ;;  %v5980_v42 = vld [vmem:[%s9411_s3 + $0x338] sm:$0xff]  ;;  %v8451_v26 = vpop.permute.xlu1 %2621 }
 0x184   :  { %9486 = vst [vmem:[#allocation76_spill] sm:$0xff] %v8451_v26 }
 0x186   :  { %4331 = vperm.xlu1 %7274, %v5976_v18   ;;  %v5979_v18 = vld [vmem:[%s9411_s3 + $0x330] sm:$0xff] }
 0x187   :  { %4326 = vperm.xlu0 %7273, %v5975_v11   ;;  %v8456_v11 = vpop.permute.xlu0 %2616 }
 0x188   :  { %9487 = vst [vmem:[#allocation77_spill] sm:$0xff] %v8456_v11 }
 0x18a   :  { %4341 = vperm.xlu1 %7274, %v5978_v2   ;;  %v5981_v2 = vld [vmem:[%s9411_s3 + $0x340] sm:$0xff] }
 0x18b   :  { %4336 = vperm.xlu0 %7273, %v5977_v21   ;;  %v8464_v21 = vpop.permute.xlu1 %2631  ;;  %v8466_v26 = vpop.permute.xlu0 %2626 }
 0x18c   :  { %9488 = vst [vmem:[#allocation78_spill] sm:$0xff] %v8464_v21  ;;  %9489 = vst [vmem:[#allocation79_spill] sm:$0xff] %v8466_v26 }
 0x18e   :  { %4351 = vperm.xlu1 %7274, %v5980_v42   ;;  %v5983_v42 = vld [vmem:[%s9411_s3 + $0x350] sm:$0xff] }
 0x18f   :  { %4346 = vperm.xlu0 %7273, %v5979_v18   ;;  %v5986_v18 = vld [vmem:[%s9411_s3 + $0x368] sm:$0xff]  ;;  %v8480_v21 = vpop.permute.xlu1 %2641  ;;  %v8485_v26 = vpop.permute.xlu0 %2636 }
 0x190   :  { %9490 = vst [vmem:[#allocation80_spill] sm:$0xff] %v8480_v21  ;;  %9491 = vst [vmem:[#allocation81_spill] sm:$0xff] %v8485_v26 }
 0x192   :  { %4361 = vperm.xlu1 %7274, %v5982_v10   ;;  %v7299_v10 = vld [vmem:[%s9412_s4] sm:$0xff]  }
 0x193   :  { %4356 = vperm.xlu0 %7273, %v5981_v2   ;;  %v5985_v2 = vld [vmem:[%s9411_s3 + $0x360] sm:$0xff]  ;;  %6581 = vmatprep.mubr.bf16.mxu0 %v7299_v10  ;;  %v8493_v11 = vpop.permute.xlu1 %2651  ;;  %v8495_v21 = vpop.permute.xlu0 %2646  ;;  %v6014_v10 = vld [vmem:[%s9413_s5 + $0x308] sm:$0xff] }
 0x194   :  { %9492 = vst [vmem:[#allocation82_spill] sm:$0xff] %v8493_v11  ;;  %9493 = vst [vmem:[#allocation83_spill] sm:$0xff] %v8495_v21  ;;  %v6018_v11 = vld [vmem:[%s9413_s5 + $0x328] sm:$0xff]  ;;  %v6020_v21 = vld [vmem:[%s9413_s5 + $0x338] sm:$0xff] }
 0x196   :  { %4371 = vperm.xlu1 %7274, %v5984_v3   ;;  %v5988_v3 = vld [vmem:[%s9411_s3 + $0x378] sm:$0xff] }
 0x197   :  { %4366 = vperm.xlu0 %7273, %v5983_v42   ;;  %v5987_v42 = vld [vmem:[%s9411_s3 + $0x370] sm:$0xff]  ;;  %v8506_v26 = vpop.permute.xlu1 %2661 }
 0x198   :  { %9494 = vst [vmem:[#allocation84_spill] sm:$0xff] %v8506_v26 }
 0x19a   :  { %4381 = vperm.xlu1 %7274, %v5986_v18   ;;  %v6013_v18 = vld [vmem:[%s9413_s5 + $0x300] sm:$0xff] }
 0x19b   :  { %4376 = vperm.xlu0 %7273, %v5985_v2   ;;  %v6016_v2 = vld [vmem:[%s9413_s5 + $0x318] sm:$0xff] }
 0x19e   :  { %4391 = vperm.xlu1 %7274, %v5988_v3   ;;  %v6015_v3 = vld [vmem:[%s9413_s5 + $0x310] sm:$0xff] }
 0x19f   :  { %4386 = vperm.xlu0 %7273, %v5987_v42   ;;  %v8511_v42 = vpop.permute.xlu0 %2656 }
 0x1a0   :  { %9495 = vst [vmem:[#allocation85_spill] sm:$0xff] %v8511_v42 }
 0x1a2   :  { %4604 = vperm.xlu1 %7274, %v6014_v10   ;;  %v6017_v10 = vld [vmem:[%s9413_s5 + $0x320] sm:$0xff] }
 0x1a3   :  { %4599 = vperm.xlu0 %7273, %v6013_v18   ;;  %v8519_v18 = vpop.permute.xlu1 %2979  ;;  %v8521_v26 = vpop.permute.xlu0 %2974 }
 0x1a4   :  { %9496 = vst [vmem:[#allocation86_spill] sm:$0xff] %v8519_v18  ;;  %9497 = vst [vmem:[#allocation87_spill] sm:$0xff] %v8521_v26  ;;  %v6024_v18 = vld [vmem:[%s9413_s5 + $0x358] sm:$0xff]  ;;  %v6026_v26 = vld [vmem:[%s9413_s5 + $0x368] sm:$0xff] }
 0x1a6   :  { %4614 = vperm.xlu1 %7274, %v6016_v2   ;;  %v6019_v2 = vld [vmem:[%s9413_s5 + $0x330] sm:$0xff] }
 0x1a7   :  { %4609 = vperm.xlu0 %7273, %v6015_v3   ;;  %v6022_v3 = vld [vmem:[%s9413_s5 + $0x348] sm:$0xff]  ;;  %v8532_v42 = vpop.permute.xlu1 %2989 }
 0x1a8   :  { %9498 = vst [vmem:[#allocation88_spill] sm:$0xff] %v8532_v42 }
 0x1aa   :  { %4624 = vperm.xlu1 %7274, %v6018_v11   ;;  %v6021_v11 = vld [vmem:[%s9413_s5 + $0x340] sm:$0xff] }
 0x1ab   :  { %4619 = vperm.xlu0 %7273, %v6017_v10   ;;  %v8537_v10 = vpop.permute.xlu0 %2984 }
 0x1ac   :  { %9499 = vst [vmem:[#allocation89_spill] sm:$0xff] %v8537_v10 }
 0x1ae   :  { %4634 = vperm.xlu1 %7274, %v6020_v21   ;;  %v6023_v21 = vld [vmem:[%s9413_s5 + $0x350] sm:$0xff] }
 0x1af   :  { %4629 = vperm.xlu0 %7273, %v6019_v2   ;;  %v8545_v2 = vpop.permute.xlu1 %2999  ;;  %v8547_v42 = vpop.permute.xlu0 %2994 }
 0x1b0   :  { %9500 = vst [vmem:[#allocation90_spill] sm:$0xff] %v8545_v2  ;;  %9501 = vst [vmem:[#allocation91_spill] sm:$0xff] %v8547_v42  ;;  %v6054_v2 = vld [vmem:[%s9411_s3 + $0x388] sm:$0xff]  ;;  %v6056_v42 = vld [vmem:[%s9411_s3 + $0x398] sm:$0xff] }
 0x1b2   :  { %4644 = vperm.xlu1 %7274, %v6022_v3   ;;  %v6025_v3 = vld [vmem:[%s9413_s5 + $0x360] sm:$0xff] }
 0x1b3   :  { %4639 = vperm.xlu0 %7273, %v6021_v11   ;;  %v6028_v11 = vld [vmem:[%s9413_s5 + $0x378] sm:$0xff]  ;;  %v8558_v10 = vpop.permute.xlu1 %3009 }
 0x1b4   :  { %9502 = vst [vmem:[#allocation92_spill] sm:$0xff] %v8558_v10 }
 0x1b6   :  { %4654 = vperm.xlu1 %7274, %v6024_v18   ;;  %v6027_v18 = vld [vmem:[%s9413_s5 + $0x370] sm:$0xff] }
 0x1b7   :  { %4649 = vperm.xlu0 %7273, %v6023_v21   ;;  %v8563_v21 = vpop.permute.xlu0 %3004 }
 0x1b8   :  { %9503 = vst [vmem:[#allocation93_spill] sm:$0xff] %v8563_v21 }
 0x1ba   :  { %4664 = vperm.xlu1 %7274, %v6026_v26   ;;  %v6053_v26 = vld [vmem:[%s9411_s3 + $0x380] sm:$0xff] }
 0x1bb   :  { %4659 = vperm.xlu0 %7273, %v6025_v3   ;;  %v8571_v3 = vpop.permute.xlu1 %3019  ;;  %v8573_v10 = vpop.permute.xlu0 %3014 }
 0x1bc   :  { %9504 = vst [vmem:[#allocation94_spill] sm:$0xff] %v8571_v3  ;;  %9505 = vst [vmem:[#allocation95_spill] sm:$0xff] %v8573_v10  ;;  %v6060_v3 = vld [vmem:[%s9411_s3 + $0x3b8] sm:$0xff]  ;;  %v6062_v10 = vld [vmem:[%s9411_s3 + $0x3c8] sm:$0xff] }
 0x1be   :  { %4674 = vperm.xlu1 %7274, %v6028_v11   ;;  %v6055_v11 = vld [vmem:[%s9411_s3 + $0x390] sm:$0xff] }
 0x1bf   :  { %4669 = vperm.xlu0 %7273, %v6027_v18   ;;  %v6058_v18 = vld [vmem:[%s9411_s3 + $0x3a8] sm:$0xff]  ;;  %v8584_v21 = vpop.permute.xlu1 %3029 }
 0x1c0   :  { %9506 = vst [vmem:[#allocation96_spill] sm:$0xff] %v8584_v21 }
 0x1c2   :  { %4992 = vperm.xlu1 %7274, %v6054_v2   ;;  %v6057_v2 = vld [vmem:[%s9411_s3 + $0x3a0] sm:$0xff] }
 0x1c3   :  { %4987 = vperm.xlu0 %7273, %v6053_v26   ;;  %v8589_v26 = vpop.permute.xlu0 %3024 }
 0x1c4   :  { %9507 = vst [vmem:[#allocation97_spill] sm:$0xff] %v8589_v26 }
 0x1c6   :  { %5002 = vperm.xlu1 %7274, %v6056_v42   ;;  %v6059_v42 = vld [vmem:[%s9411_s3 + $0x3b0] sm:$0xff] }
 0x1c7   :  { %4997 = vperm.xlu0 %7273, %v6055_v11   ;;  %v8597_v11 = vpop.permute.xlu1 %3039  ;;  %v8599_v21 = vpop.permute.xlu0 %3034 }
 0x1c8   :  { %9508 = vst [vmem:[#allocation98_spill] sm:$0xff] %v8597_v11  ;;  %9509 = vst [vmem:[#allocation99_spill] sm:$0xff] %v8599_v21  ;;  %v6066_v11 = vld [vmem:[%s9411_s3 + $0x3e8] sm:$0xff]  ;;  %v6068_v21 = vld [vmem:[%s9411_s3 + $0x3f8] sm:$0xff] }
 0x1ca   :  { %5012 = vperm.xlu1 %7274, %v6058_v18   ;;  %v6061_v18 = vld [vmem:[%s9411_s3 + $0x3c0] sm:$0xff] }
 0x1cb   :  { %5007 = vperm.xlu0 %7273, %v6057_v2   ;;  %v6064_v2 = vld [vmem:[%s9411_s3 + $0x3d8] sm:$0xff]  ;;  %v8610_v26 = vpop.permute.xlu1 %3049 }
 0x1cc   :  { %9510 = vst [vmem:[#allocation100_spill] sm:$0xff] %v8610_v26 }
 0x1ce   :  { %5022 = vperm.xlu1 %7274, %v6060_v3   ;;  %v6063_v3 = vld [vmem:[%s9411_s3 + $0x3d0] sm:$0xff] }
 0x1cf   :  { %5017 = vperm.xlu0 %7273, %v6059_v42   ;;  %v8615_v42 = vpop.permute.xlu0 %3044 }
 0x1d0   :  { %9511 = vst [vmem:[#allocation101_spill] sm:$0xff] %v8615_v42 }
 0x1d2   :  { %5032 = vperm.xlu1 %7274, %v6062_v10   ;;  %v6065_v10 = vld [vmem:[%s9411_s3 + $0x3e0] sm:$0xff] }
 0x1d3   :  { %5027 = vperm.xlu0 %7273, %v6061_v18   ;;  %v8623_v18 = vpop.permute.xlu1 %3262  ;;  %v8625_v26 = vpop.permute.xlu0 %3257 }
 0x1d4   :  { %9512 = vst [vmem:[#allocation102_spill] sm:$0xff] %v8623_v18  ;;  %9513 = vst [vmem:[#allocation103_spill] sm:$0xff] %v8625_v26  ;;  %v6096_v18 = vld [vmem:[%s9413_s5 + $0x398] sm:$0xff]  ;;  %v6098_v26 = vld [vmem:[%s9413_s5 + $0x3a8] sm:$0xff] }
 0x1d6   :  { %5042 = vperm.xlu1 %7274, %v6064_v2   ;;  %v6067_v2 = vld [vmem:[%s9411_s3 + $0x3f0] sm:$0xff] }
 0x1d7   :  { %5037 = vperm.xlu0 %7273, %v6063_v3   ;;  %v6094_v3 = vld [vmem:[%s9413_s5 + $0x388] sm:$0xff]  ;;  %v8636_v42 = vpop.permute.xlu1 %3272 }
 0x1d8   :  { %9514 = vst [vmem:[#allocation104_spill] sm:$0xff] %v8636_v42 }
 0x1da   :  { %5052 = vperm.xlu1 %7274, %v6066_v11   ;;  %v6093_v11 = vld [vmem:[%s9413_s5 + $0x380] sm:$0xff] }
 0x1db   :  { %5047 = vperm.xlu0 %7273, %v6065_v10   ;;  %v8641_v10 = vpop.permute.xlu0 %3267 }
 0x1dc   :  { %9515 = vst [vmem:[#allocation105_spill] sm:$0xff] %v8641_v10 }
 0x1de   :  { %5062 = vperm.xlu1 %7274, %v6068_v21   ;;  %v6095_v21 = vld [vmem:[%s9413_s5 + $0x390] sm:$0xff] }
 0x1df   :  { %5057 = vperm.xlu0 %7273, %v6067_v2   ;;  %v8649_v2 = vpop.permute.xlu1 %3282  ;;  %v8651_v42 = vpop.permute.xlu0 %3277 }
 0x1e0   :  { %9516 = vst [vmem:[#allocation106_spill] sm:$0xff] %v8649_v2  ;;  %9517 = vst [vmem:[#allocation107_spill] sm:$0xff] %v8651_v42  ;;  %v6102_v2 = vld [vmem:[%s9413_s5 + $0x3c8] sm:$0xff] }
 0x1e2   :  { %5275 = vperm.xlu1 %7274, %v6094_v3   ;;  %v6097_v3 = vld [vmem:[%s9413_s5 + $0x3a0] sm:$0xff] }
 0x1e3   :  { %5270 = vperm.xlu0 %7273, %v6093_v11   ;;  %v6100_v11 = vld [vmem:[%s9413_s5 + $0x3b8] sm:$0xff]  ;;  %v8662_v10 = vpop.permute.xlu1 %3292 }
 0x1e4   :  { %9518 = vst [vmem:[#allocation108_spill] sm:$0xff] %v8662_v10 }
 0x1e6   :  { %5285 = vperm.xlu1 %7274, %v6096_v18   ;;  %v6099_v18 = vld [vmem:[%s9413_s5 + $0x3b0] sm:$0xff] }
 0x1e7   :  { %5280 = vperm.xlu0 %7273, %v6095_v21   ;;  %v8667_v21 = vpop.permute.xlu0 %3287  ;;  %v8676_v37 = vpop.permute.xlu1 %3302 }
 0x1e8   :  { %9519 = vst [vmem:[#allocation109_spill] sm:$0xff] %v8667_v21  ;;  %9520 = vst [vmem:[#allocation110_spill] sm:$0xff] %v8676_v37 }
 0x1ea   :  { %5295 = vperm.xlu1 %7274, %v6098_v26  }
 0x1eb   :  { %5290 = vperm.xlu0 %7273, %v6097_v3   ;;  %v6101_v3 = vld [vmem:[%s9413_s5 + $0x3c0] sm:$0xff] }
 0x1ee   :  { %5305 = vperm.xlu1 %7274, %v6100_v11   ;;  %v8679_v11 = vpop.permute.xlu0 %3297 }
 0x1ef   :  { %5300 = vperm.xlu0 %7273, %v6099_v18   ;;  %9521 = vst [vmem:[#allocation111_spill] sm:$0xff] %v8679_v11 }
 0x1f0   :  { %v6551_v26 = vpop.f32.mrb[0].mxu1 }
 0x1f1   :  { %v461_v42 = vadd.f32 %v6551_v26, %v7752_v19  ;;  %v452_v10 = vpop.f32.mrb[1].mxu1  ;;  %v6103_v19 = vld [vmem:[%s9413_s5 + $0x3d0] sm:$0xff] }
 0x1f2   :  { %v453_v34 = vadd.f32 %v452_v10, %v7754_v20  ;;  %v6552_v29 = vpop.f32.mrb[2].mxu1  ;;  %5315 = vperm.xlu1 %7274, %v6102_v2  }
 0x1f3   :  { %v464_v18 = vadd.f32 %v6552_v29, %v7762_v23  ;;  %5310 = vperm.xlu0 %7273, %v6101_v3   ;;  %v455_v21 = vpop.f32.mrb[3].mxu1  ;;  %v517_v26 = vmax.f32 %v461_v42, 0.0  ;;  %v6106_v23 = vld [vmem:[%s9413_s5 + $0x3e8] sm:$0xff]  ;;  %v8692_v29 = vpop.permute.xlu1 %3312 }
 0x1f4   :  { %v456_v6 = vadd.f32 %v455_v21, %v7764_v24  ;;  %v515_v10 = vmax.f32 %v453_v34, 0.0  ;;  %9522 = vst [vmem:[#allocation112_spill] sm:$0xff] %v8692_v29  ;;  %v6105_v24 = vld [vmem:[%s9413_s5 + $0x3e0] sm:$0xff]  ;;  %v8697_v21 = vpop.permute.xlu0 %3307 }
 0x1f5   :  { %v518_v20 = vmax.f32 %v464_v18, 0.0 }
 0x1f6   :  { %v516_v2 = vmax.f32 %v456_v6, 0.0  ;;  %5325 = vperm.xlu1 %7274, %v6104_v45  }
 0x1f7   :  { %v548_v37 = vpack.c.bf16 %v518_v20, %v517_v26  ;;  %5320 = vperm.xlu0 %7273, %v6103_v19   ;;  %v6108_v26 = vld [vmem:[%s9413_s5 + $0x3f8] sm:$0xff] }
 0x1f8   :  { %v547_v3 = vpack.c.bf16 %v516_v2, %v515_v10  ;;  %v6555_v11 = vpop.f32.mrb[4].mxu1  ;;  %v8709_v10 = vpop.permute.xlu1 %3322 }
 0x1f9   :  { %v477_v34 = vadd.f32 %v6555_v11, %v7784_v32  ;;  %v468_v6 = vpop.f32.mrb[5].mxu1  ;;  %v6107_v32 = vld [vmem:[%s9413_s5 + $0x3f0] sm:$0xff] }
 0x1fa   :  { %v469_v45 = vadd.f32 %v468_v6, %v7774_v28  ;;  %v6556_v42 = vpop.f32.mrb[6].mxu1  ;;  %6565 = vmatprep.subr.bf16.mxu0 %v547_v3  ;;  %5335 = vperm.xlu1 %7274, %v6106_v23   ;;  %v8711_v23 = vpop.permute.xlu0 %3317 }
 0x1fb   :  { %v480_v18 = vadd.f32 %v6556_v42, %v7782_v31  ;;  %5330 = vperm.xlu0 %7273, %v6105_v24   ;;  %v471_v19 = vpop.f32.mrb[7].mxu1  ;;  %6566 = vmatpush3.bf16.msra.mxu0 %v547_v3  ;;  %v521_v28 = vmax.f32 %v477_v34, 0.0 }
 0x1fc   :  { %v472_v20 = vadd.f32 %v471_v19, %v7772_v27  ;;  %6567 = vmatprep.subr.bf16.mxu0 %v548_v37  ;;  %v519_v2 = vmax.f32 %v469_v45, 0.0 }
 0x1fd   :  { %v522_v11 = vmax.f32 %v480_v18, 0.0 }
 0x1fe   :  { %v520_v31 = vmax.f32 %v472_v20, 0.0  ;;  %5345 = vperm.xlu1 %7274, %v6108_v26  }
 0x1ff   :  { %v550_v3 = vpack.c.bf16 %v522_v11, %v521_v28  ;;  %5340 = vperm.xlu0 %7273, %v6107_v32   ;;  %6568 = vmatpush3.bf16.msra.mxu0 %v548_v37 }
 0x200   :  { %v549_v24 = vpack.c.bf16 %v520_v31, %v519_v2  ;;  %v6559_v6 = vpop.f32.mrb[8].mxu1 }
 0x201   :  { %v493_v27 = vadd.f32 %v6559_v6, %v7804_v40  ;;  %v484_v42 = vpop.f32.mrb[9].mxu1 }
 0x202   :  { %v485_v19 = vadd.f32 %v484_v42, %v7794_v36  ;;  %v6560_v29 = vpop.f32.mrb[10].mxu1  ;;  %6569 = vmatprep.subr.bf16.mxu0 %v549_v24 }
 0x203   :  { %v496_v34 = vadd.f32 %v6560_v29, %v7802_v39  ;;  %v487_v18 = vpop.f32.mrb[11].mxu1  ;;  %6570 = vmatpush3.bf16.msra.mxu0 %v549_v24  ;;  %v525_v26 = vmax.f32 %v493_v27, 0.0 }
 0x204   :  { %v488_v45 = vadd.f32 %v487_v18, %v7792_v35  ;;  %6571 = vmatprep.subr.bf16.mxu0 %v550_v3  ;;  %v523_v32 = vmax.f32 %v485_v19, 0.0  ;;  %v7304_v18 = vld [vmem:[%s9412_s4 + $0x28] sm:$0xff]  }
 0x205   :  { %v526_v20 = vmax.f32 %v496_v34, 0.0 }
 0x206   :  { %v524_v37 = vmax.f32 %v488_v45, 0.0  ;;  %v7305_v45 = vld [vmem:[%s9412_s4 + $0x30] sm:$0xff]  }
 0x207   :  { %v552_v28 = vpack.c.bf16 %v526_v20, %v525_v26  ;;  %6572 = vmatpush3.bf16.msra.mxu0 %v550_v3  ;;  %v7306_v26 = vld [vmem:[%s9412_s4 + $0x38] sm:$0xff]  }
 0x208   :  { %v551_v11 = vpack.c.bf16 %v524_v37, %v523_v32  ;;  %v6563_v40 = vpop.f32.mrb[12].mxu1 }
 0x209   :  { %v509_v2 = vadd.f32 %v6563_v40, %v7827_v49  ;;  %v500_v36 = vpop.f32.mrb[13].mxu1  ;;  %v7303_v49 = vld [vmem:[%s9412_s4 + $0x20] sm:$0xff]  }
 0x20a   :  { %v501_v31 = vadd.f32 %v500_v36, %v7814_v44  ;;  %v6564_v6 = vpop.f32.mrb[14].mxu1  ;;  %6573 = vmatprep.subr.bf16.mxu0 %v551_v11  ;;  %v7300_v44 = vld [vmem:[%s9412_s4 + $0x8] sm:$0xff]  }
 0x20b   :  { %v512_v39 = vadd.f32 %v6564_v6, %v7825_v48  ;;  %v503_v29 = vpop.f32.mrb[15].mxu1  ;;  %6574 = vmatpush3.bf16.msra.mxu0 %v551_v11  ;;  %v529_v24 = vmax.f32 %v509_v2, 0.0  ;;  %v7302_v48 = vld [vmem:[%s9412_s4 + $0x18] sm:$0xff]  }
 0x20c   :  { %v504_v35 = vadd.f32 %v503_v29, %v7812_v43  ;;  %6575 = vmatprep.subr.bf16.mxu0 %v552_v28  ;;  %v527_v42 = vmax.f32 %v501_v31, 0.0  ;;  %v7301_v43 = vld [vmem:[%s9412_s4 + $0x10] sm:$0xff]  }
 0x20d   :  { %v530_v27 = vmax.f32 %v512_v39, 0.0 }
 0x20e   :  { %v528_v3 = vmax.f32 %v504_v35, 0.0 }
 0x20f   :  { %v554_v19 = vpack.c.bf16 %v530_v27, %v529_v24  ;;  %6576 = vmatpush3.bf16.msra.mxu0 %v552_v28 }
 0x210   :  { %v553_v34 = vpack.c.bf16 %v528_v3, %v527_v42 }
 0x212   :  { %6577 = vmatprep.subr.bf16.mxu0 %v553_v34 }
 0x213   :  { %6578 = vmatpush3.bf16.msra.mxu0 %v553_v34 }
 0x214   :  { %6579 = vmatprep.subr.bf16.mxu0 %v554_v19 }
 0x217   :  { %6580 = vmatpush3.bf16.msra.mxu0 %v554_v19 }
 0x21a   :  { %6582 = vmatmul.mubr.bf16.vlgmr.msra.gmra.mrb[16].mxu0 %v7300_v44 }
 0x21b   :  { %6585 = vmatprep.mubr.bf16.mxu0 %v7301_v43 }
 0x222   :  { %6586 = vmatmul.mubr.bf16.gmra.mrb[20].mxu0 %v7302_v48 }
 0x223   :  { %6589 = vmatprep.mubr.bf16.mxu0 %v7303_v49 }
 0x22a   :  { %6590 = vmatmul.mubr.bf16.gmra.mrb[24].mxu0 %v7304_v18 }
 0x22b   :  { %6593 = vmatprep.mubr.bf16.mxu0 %v7305_v45 }
 0x232   :  { %6594 = vmatmul.mubr.bf16.gmra.mrb[28].mxu0 %v7306_v26 }
 0x2ed   :  { %v6583_v20 = vpop.f32.mrb[16].mxu0 }
 0x2ee   :  { %v742_v32 = vadd.f32 %v6583_v20, %v7847_v57  ;;  %v733_v37 = vpop.f32.mrb[17].mxu0 }
 0x2ef   :  { %v734_v28 = vadd.f32 %v733_v37, %v7837_v53  ;;  %v6584_v11 = vpop.f32.mrb[18].mxu0 }
 0x2f0   :  { %v745_v40 = vadd.f32 %v6584_v11, %v7845_v56  ;;  %v736_v2 = vpop.f32.mrb[19].mxu0  ;;  %v798_v31 = vmax.f32 %v742_v32, 0.0 }
 0x2f1   :  { %v737_v36 = vadd.f32 %v736_v2, %v7835_v52  ;;  %v796_v39 = vmax.f32 %v734_v28, 0.0 }
 0x2f2   :  { %v799_v6 = vmax.f32 %v745_v40, 0.0 }
 0x2f3   :  { %v797_v29 = vmax.f32 %v737_v36, 0.0 }
 0x2f4   :  { %v813_v35 = vpack.c.bf16 %v799_v6, %v798_v31 }
 0x2f5   :  { %v812_v24 = vpack.c.bf16 %v797_v29, %v796_v39  ;;  %v6587_v27 = vpop.f32.mrb[20].mxu0 }
 0x2f6   :  { %v758_v42 = vadd.f32 %v6587_v27, %v7867_v1  ;;  %v749_v3 = vpop.f32.mrb[21].mxu0 }
 0x2f7   :  { %v750_v57 = vadd.f32 %v749_v3, %v7857_v61  ;;  %v6588_v19 = vpop.f32.mrb[22].mxu0  ;;  %6613 = vmatprep.mubr.bf16.mxu1 %v812_v24 }
 0x2f8   :  { %v761_v53 = vadd.f32 %v6588_v19, %v7865_v0  ;;  %v752_v56 = vpop.f32.mrb[23].mxu0  ;;  %6614 = vmatmul.mubr.bf16.vlgmr.msra.gmra.mrb[16].mxu1 %v813_v35  ;;  %v802_v34 = vmax.f32 %v758_v42, 0.0 }
 0x2f9   :  { %v753_v52 = vadd.f32 %v752_v56, %v7855_v60  ;;  %v800_v43 = vmax.f32 %v750_v57, 0.0 }
 0x2fa   :  { %v803_v44 = vmax.f32 %v761_v53, 0.0 }
 0x2fb   :  { %v801_v48 = vmax.f32 %v753_v52, 0.0 }
 0x2fc   :  { %v815_v49 = vpack.c.bf16 %v803_v44, %v802_v34 }
 0x2fd   :  { %v814_v18 = vpack.c.bf16 %v801_v48, %v800_v43  ;;  %v6591_v45 = vpop.f32.mrb[24].mxu0 }
 0x2fe   :  { %v774_v1 = vadd.f32 %v6591_v45, %v7887_v9  ;;  %v765_v26 = vpop.f32.mrb[25].mxu0 }
 0x2ff   :  { %v766_v61 = vadd.f32 %v765_v26, %v7877_v5  ;;  %v6592_v20 = vpop.f32.mrb[26].mxu0  ;;  %6617 = vmatprep.mubr.bf16.mxu1 %v814_v18 }
 0x300   :  { %v777_v0 = vadd.f32 %v6592_v20, %v7885_v8  ;;  %v768_v32 = vpop.f32.mrb[27].mxu0  ;;  %6618 = vmatmul.mubr.bf16.gmra.mrb[20].mxu1 %v815_v49  ;;  %v806_v37 = vmax.f32 %v774_v1, 0.0 }
 0x301   :  { %v769_v60 = vadd.f32 %v768_v32, %v7875_v4  ;;  %v804_v11 = vmax.f32 %v766_v61, 0.0 }
 0x302   :  { %v807_v28 = vmax.f32 %v777_v0, 0.0 }
 0x303   :  { %v805_v40 = vmax.f32 %v769_v60, 0.0 }
 0x304   :  { %v817_v2 = vpack.c.bf16 %v807_v28, %v806_v37 }
 0x305   :  { %v816_v36 = vpack.c.bf16 %v805_v40, %v804_v11  ;;  %v6595_v31 = vpop.f32.mrb[28].mxu0  ;;  %v7308_v40 = vld [vmem:[%s9410_s2 + $0x48] sm:$0xff]  }
 0x306   :  { %v790_v9 = vadd.f32 %v6595_v31, %v7907_v17  ;;  %v781_v6 = vpop.f32.mrb[29].mxu0  ;;  %v8777_v31 = vld [vmem:[%s9408_s0 + $0x8] sm:$0xff]  }
 0x307   :  { %v782_v5 = vadd.f32 %v781_v6, %v7897_v13  ;;  %v6596_v39 = vpop.f32.mrb[30].mxu0  ;;  %6621 = vmatprep.mubr.bf16.mxu1 %v816_v36  ;;  %v7307_v13 = vld [vmem:[%s9410_s2 + $0x40] sm:$0xff]  }
 0x308   :  { %v793_v8 = vadd.f32 %v6596_v39, %v7905_v16  ;;  %v784_v29 = vpop.f32.mrb[31].mxu0  ;;  %6622 = vmatmul.mubr.bf16.gmra.mrb[24].mxu1 %v817_v2  ;;  %v810_v35 = vmax.f32 %v790_v9, 0.0  ;;  %6645 = vmatprep.mubr.bf16.mxu0 %v7307_v13  ;;  %v7309_v2 = vld [vmem:[%s9410_s2 + $0x50] sm:$0xff]   ;;  %v8770_v36 = vld [vmem:[%s9408_s0] sm:$0xff]   ;;  %v7310_v9 = vld [vmem:[%s9410_s2 + $0x58] sm:$0xff]  }
 0x309   :  { %v785_v4 = vadd.f32 %v784_v29, %v7895_v12  ;;  %v808_v27 = vmax.f32 %v782_v5, 0.0  ;;  %v7311_v6 = vld [vmem:[%s9410_s2 + $0x60] sm:$0xff]   ;;  %v8790_v5 = vld [vmem:[%s9408_s0 + $0x10] sm:$0xff]   ;;  %v8797_v39 = vld [vmem:[%s9408_s0 + $0x18] sm:$0xff]  }
 0x30a   :  { %v811_v24 = vmax.f32 %v793_v8, 0.0  ;;  %v7312_v8 = vld [vmem:[%s9410_s2 + $0x68] sm:$0xff]   ;;  %v7313_v29 = vld [vmem:[%s9410_s2 + $0x70] sm:$0xff]  }
 0x30b   :  { %v809_v42 = vmax.f32 %v785_v4, 0.0  ;;  %v7314_v4 = vld [vmem:[%s9410_s2 + $0x78] sm:$0xff]  }
 0x30c   :  { %v819_v3 = vpack.c.bf16 %v811_v24, %v810_v35 }
 0x30d   :  { %v818_v57 = vpack.c.bf16 %v809_v42, %v808_v27 }
 0x30f   :  { %6625 = vmatprep.mubr.bf16.mxu1 %v818_v57 }
 0x310   :  { %6626 = vmatmul.mubr.bf16.gmra.mrb[28].mxu1 %v819_v3 }
 0x3cb   :  { %v6615_v17 = vpop.f32.mrb[16].mxu1 }
 0x3cc   :  { %v854_v19 = vpop.f32.mrb[17].mxu1 }
 0x3cd   :  { %v6616_v16 = vpop.f32.mrb[18].mxu1 }
 0x3ce   :  { %v935_v53 = vpack.c.bf16 %v6616_v16, %v6615_v17  ;;  %v857_v56 = vpop.f32.mrb[19].mxu1 }
 0x3cf   :  { %v934_v52 = vpack.c.bf16 %v857_v56, %v854_v19 }
 0x3d1   :  { %6629 = vmatprep.subr.bf16.mxu0 %v934_v52 }
 0x3d2   :  { %6630 = vmatpush3.bf16.msra.mxu0 %v934_v52 }
 0x3d3   :  { %v6619_v12 = vpop.f32.mrb[20].mxu1  ;;  %6631 = vmatprep.subr.bf16.mxu0 %v935_v53 }
 0x3d4   :  { %v870_v34 = vpop.f32.mrb[21].mxu1 }
 0x3d5   :  { %v6620_v44 = vpop.f32.mrb[22].mxu1 }
 0x3d6   :  { %v937_v43 = vpack.c.bf16 %v6620_v44, %v6619_v12  ;;  %v873_v48 = vpop.f32.mrb[23].mxu1  ;;  %6632 = vmatpush3.bf16.msra.mxu0 %v935_v53 }
 0x3d7   :  { %v936_v49 = vpack.c.bf16 %v873_v48, %v870_v34 }
 0x3d9   :  { %6633 = vmatprep.subr.bf16.mxu0 %v936_v49 }
 0x3da   :  { %6634 = vmatpush3.bf16.msra.mxu0 %v936_v49 }
 0x3db   :  { %v6623_v18 = vpop.f32.mrb[24].mxu1  ;;  %6635 = vmatprep.subr.bf16.mxu0 %v937_v43 }
 0x3dc   :  { %v886_v45 = vpop.f32.mrb[25].mxu1 }
 0x3dd   :  { %v6624_v1 = vpop.f32.mrb[26].mxu1 }
 0x3de   :  { %v939_v26 = vpack.c.bf16 %v6624_v1, %v6623_v18  ;;  %v889_v61 = vpop.f32.mrb[27].mxu1  ;;  %6636 = vmatpush3.bf16.msra.mxu0 %v937_v43 }
 0x3df   :  { %v938_v20 = vpack.c.bf16 %v889_v61, %v886_v45 }
 0x3e1   :  { %6637 = vmatprep.subr.bf16.mxu0 %v938_v20 }
 0x3e2   :  { %6638 = vmatpush3.bf16.msra.mxu0 %v938_v20 }
 0x3e3   :  { %v6627_v0 = vpop.f32.mrb[28].mxu1  ;;  %6639 = vmatprep.subr.bf16.mxu0 %v939_v26 }
 0x3e4   :  { %v902_v32 = vpop.f32.mrb[29].mxu1 }
 0x3e5   :  { %v6628_v60 = vpop.f32.mrb[30].mxu1 }
 0x3e6   :  { %v941_v37 = vpack.c.bf16 %v6628_v60, %v6627_v0  ;;  %v905_v28 = vpop.f32.mrb[31].mxu1  ;;  %6640 = vmatpush3.bf16.msra.mxu0 %v939_v26 }
 0x3e7   :  { %v940_v11 = vpack.c.bf16 %v905_v28, %v902_v32 }
 0x3e9   :  { %6641 = vmatprep.subr.bf16.mxu0 %v940_v11 }
 0x3ea   :  { %6642 = vmatpush3.bf16.msra.mxu0 %v940_v11 }
 0x3eb   :  { %6643 = vmatprep.subr.bf16.mxu0 %v941_v37 }
 0x3ee   :  { %6644 = vmatpush3.bf16.msra.mxu0 %v941_v37 }
 0x3ef   :  { %6693 = vmatprep.subr.bf16.mxu0 %v8770_v36 }
 0x3f1   :  { %6646 = vmatmul.mubr.bf16.vlgmr.msra.gmra.mrb[32].mxu0 %v7308_v40 }
 0x3f2   :  { %6649 = vmatprep.mubr.bf16.mxu0 %v7309_v2  ;;  %6694 = vmatpush3.bf16.msra.mxu0 %v8770_v36 }
 0x3f3   :  { %6695 = vmatprep.subr.bf16.mxu0 %v8777_v31 }
 0x3f6   :  { %6696 = vmatpush3.bf16.msra.mxu0 %v8777_v31 }
 0x3f7   :  { %6697 = vmatprep.subr.bf16.mxu0 %v8790_v5 }
 0x3f9   :  { %6650 = vmatmul.mubr.bf16.gmra.mrb[36].mxu0 %v7310_v9 }
 0x3fa   :  { %6653 = vmatprep.mubr.bf16.mxu0 %v7311_v6  ;;  %6698 = vmatpush3.bf16.msra.mxu0 %v8790_v5 }
 0x3fb   :  { %6699 = vmatprep.subr.bf16.mxu0 %v8797_v39 }
 0x3fe   :  { %6700 = vmatpush3.bf16.msra.mxu0 %v8797_v39 }
 0x3ff   :  { %6701 = vmatprep.subr.bf16.mxu0 %v8218_v59 }
 0x401   :  { %6654 = vmatmul.mubr.bf16.gmra.mrb[40].mxu0 %v7312_v8 }
 0x402   :  { %6657 = vmatprep.mubr.bf16.mxu0 %v7313_v29  ;;  %6702 = vmatpush3.bf16.msra.mxu0 %v8218_v59  ;;  %v7315_v59 = vld [vmem:[%s9412_s4 + $0x40] sm:$0xff]  }
 0x403   :  { %6703 = vmatprep.subr.bf16.mxu0 %v8235_v58  ;;  %6677 = vmatprep.mubr.bf16.mxu1 %v7315_v59 }
 0x406   :  { %6704 = vmatpush3.bf16.msra.mxu0 %v8235_v58 }
 0x407   :  { %6705 = vmatprep.subr.bf16.mxu0 %v8255_v50 }
 0x409   :  { %6658 = vmatmul.mubr.bf16.gmra.mrb[44].mxu0 %v7314_v4 }
 0x40a   :  { %6706 = vmatpush3.bf16.msra.mxu0 %v8255_v50 }
 0x40b   :  { %6707 = vmatprep.subr.bf16.mxu0 %v8270_v51 }
 0x40e   :  { %6708 = vmatpush3.bf16.msra.mxu0 %v8270_v51 }
 0x4c4   :  { %v6647_v35 = vpop.f32.mrb[32].mxu0 }
 0x4c5   :  { %v1130_v24 = vadd.f32 %v6647_v35, %v7927_v33  ;;  %v1121_v27 = vpop.f32.mrb[33].mxu0 }
 0x4c6   :  { %v1122_v58 = vadd.f32 %v1121_v27, %v7917_v25  ;;  %v6648_v42 = vpop.f32.mrb[34].mxu0 }
 0x4c7   :  { %v1133_v3 = vadd.f32 %v6648_v42, %v7925_v30  ;;  %v1124_v57 = vpop.f32.mrb[35].mxu0  ;;  %v1186_v13 = vmax.f32 %v1130_v24, 0.0  ;;  %v7320_v42 = vld [vmem:[%s9412_s4 + $0x68] sm:$0xff]  }
 0x4c8   :  { %v1125_v50 = vadd.f32 %v1124_v57, %v7915_v22  ;;  %v1184_v51 = vmax.f32 %v1122_v58, 0.0  ;;  %v7319_v58 = vld [vmem:[%s9412_s4 + $0x60] sm:$0xff]   ;;  %v7322_v57 = vld [vmem:[%s9412_s4 + $0x78] sm:$0xff]  }
 0x4c9   :  { %v1187_v17 = vmax.f32 %v1133_v3, 0.0  ;;  %v7321_v3 = vld [vmem:[%s9412_s4 + $0x70] sm:$0xff]  }
 0x4ca   :  { %v1185_v19 = vmax.f32 %v1125_v50, 0.0 }
 0x4cb   :  { %v1218_v16 = vpack.c.bf16 %v1187_v17, %v1186_v13  ;;  %v9524_v13 = vld [vmem:[#allocation9_spill] sm:$0xff] }
 0x4cc   :  { %v1217_v53 = vpack.c.bf16 %v1185_v19, %v1184_v51  ;;  %v6651_v56 = vpop.f32.mrb[36].mxu0  ;;  %v9525_v19 = vld [vmem:[#allocation7_spill] sm:$0xff] }
 0x4cd   :  { %v1146_v52 = vadd.f32 %v6651_v56, %v7947_v47  ;;  %v1137_v12 = vpop.f32.mrb[37].mxu0  ;;  %v9526_v56 = vld [vmem:[#allocation8_spill] sm:$0xff] }
 0x4ce   :  { %v1138_v33 = vadd.f32 %v1137_v12, %v7937_v41  ;;  %v6652_v34 = vpop.f32.mrb[38].mxu0  ;;  %6661 = vmatprep.subr.bf16.mxu1 %v1217_v53 }
 0x4cf   :  { %v1149_v25 = vadd.f32 %v6652_v34, %v7945_v46  ;;  %v1140_v30 = vpop.f32.mrb[39].mxu0  ;;  %6662 = vmatpush3.bf16.msra.mxu1 %v1217_v53  ;;  %v1190_v44 = vmax.f32 %v1146_v52, 0.0 }
 0x4d0   :  { %v1141_v22 = vadd.f32 %v1140_v30, %v7935_v38  ;;  %6663 = vmatprep.subr.bf16.mxu1 %v1218_v16  ;;  %v1188_v48 = vmax.f32 %v1138_v33, 0.0  ;;  %v9527_v33 = vld [vmem:[#allocation6_spill] sm:$0xff] }
 0x4d1   :  { %v1191_v43 = vmax.f32 %v1149_v25, 0.0 }
 0x4d2   :  { %v1189_v49 = vmax.f32 %v1141_v22, 0.0 }
 0x4d3   :  { %v1220_v18 = vpack.c.bf16 %v1191_v43, %v1190_v44  ;;  %6664 = vmatpush3.bf16.msra.mxu1 %v1218_v16 }
 0x4d4   :  { %v1219_v45 = vpack.c.bf16 %v1189_v49, %v1188_v48  ;;  %v6655_v47 = vpop.f32.mrb[40].mxu0 }
 0x4d5   :  { %v1162_v1 = vadd.f32 %v6655_v47, %v7967_v63  ;;  %v1153_v41 = vpop.f32.mrb[41].mxu0 }
 0x4d6   :  { %v1154_v26 = vadd.f32 %v1153_v41, %v7957_v55  ;;  %v6656_v61 = vpop.f32.mrb[42].mxu0  ;;  %6665 = vmatprep.subr.bf16.mxu1 %v1219_v45 }
 0x4d7   :  { %v1165_v46 = vadd.f32 %v6656_v61, %v7965_v62  ;;  %v1156_v20 = vpop.f32.mrb[43].mxu0  ;;  %6666 = vmatpush3.bf16.msra.mxu1 %v1219_v45  ;;  %v1194_v0 = vmax.f32 %v1162_v1, 0.0  ;;  %v9529_v1 = vld [vmem:[#allocation11_spill] sm:$0xff]  ;;  %v9530_v61 = vld [vmem:[#allocation12_spill] sm:$0xff] }
 0x4d8   :  { %v1157_v38 = vadd.f32 %v1156_v20, %v7955_v54  ;;  %6667 = vmatprep.subr.bf16.mxu1 %v1220_v18  ;;  %v1192_v60 = vmax.f32 %v1154_v26, 0.0  ;;  %v9523_v54 = vld [vmem:[#allocation5_spill] sm:$0xff] }
 0x4d9   :  { %v1195_v32 = vmax.f32 %v1165_v46, 0.0 }
 0x4da   :  { %v1193_v37 = vmax.f32 %v1157_v38, 0.0  ;;  %v9531_v38 = vld [vmem:[#allocation10_spill] sm:$0xff] }
 0x4db   :  { %v1222_v28 = vpack.c.bf16 %v1195_v32, %v1194_v0  ;;  %6668 = vmatpush3.bf16.msra.mxu1 %v1220_v18  ;;  %v9528_v18 = vld [vmem:[#allocation13_spill] sm:$0xff] }
 0x4dc   :  { %v1221_v11 = vpack.c.bf16 %v1193_v37, %v1192_v60  ;;  %v6659_v63 = vpop.f32.mrb[44].mxu0 }
 0x4dd   :  { %v1178_v40 = vadd.f32 %v6659_v63, %v7987_v15  ;;  %v1169_v55 = vpop.f32.mrb[45].mxu0  ;;  %v7318_v15 = vld [vmem:[%s9412_s4 + $0x58] sm:$0xff]  }
 0x4de   :  { %v1170_v2 = vadd.f32 %v1169_v55, %v7977_v7  ;;  %v6660_v9 = vpop.f32.mrb[46].mxu0  ;;  %6669 = vmatprep.subr.bf16.mxu1 %v1221_v11  ;;  %v7316_v7 = vld [vmem:[%s9412_s4 + $0x48] sm:$0xff]   ;;  %v9532_v55 = vld [vmem:[#allocation17_spill] sm:$0xff] }
 0x4df   :  { %v1181_v62 = vadd.f32 %v6660_v9, %v7985_v14  ;;  %v1172_v6 = vpop.f32.mrb[47].mxu0  ;;  %6670 = vmatpush3.bf16.msra.mxu1 %v1221_v11  ;;  %v1198_v29 = vmax.f32 %v1178_v40, 0.0  ;;  %v7317_v14 = vld [vmem:[%s9412_s4 + $0x50] sm:$0xff]  }
 0x4e0   :  { %v1173_v8 = vadd.f32 %v1172_v6, %v9523_v54  ;;  %6671 = vmatprep.subr.bf16.mxu1 %v1222_v28  ;;  %v1196_v59 = vmax.f32 %v1170_v2, 0.0 }
 0x4e1   :  { %v1199_v4 = vmax.f32 %v1181_v62, 0.0  ;;  %v9533_v62 = vld [vmem:[#allocation15_spill] sm:$0xff] }
 0x4e2   :  { %v1197_v35 = vmax.f32 %v1173_v8, 0.0  ;;  %v9534_v8 = vld [vmem:[#allocation16_spill] sm:$0xff] }
 0x4e3   :  { %v1224_v24 = vpack.c.bf16 %v1199_v4, %v1198_v29  ;;  %6672 = vmatpush3.bf16.msra.mxu1 %v1222_v28 }
 0x4e4   :  { %v1223_v27 = vpack.c.bf16 %v1197_v35, %v1196_v59  ;;  %v9535_v59 = vld [vmem:[#allocation14_spill] sm:$0xff] }
 0x4e6   :  { %6673 = vmatprep.subr.bf16.mxu1 %v1223_v27 }
 0x4e7   :  { %6674 = vmatpush3.bf16.msra.mxu1 %v1223_v27 }
 0x4e8   :  { %6675 = vmatprep.subr.bf16.mxu1 %v1224_v24 }
 0x4eb   :  { %6676 = vmatpush3.bf16.msra.mxu1 %v1224_v24 }
 0x4ee   :  { %6678 = vmatmul.mubr.bf16.vlgmr.msra.gmra.mrb[32].mxu1 %v7316_v7 }
 0x4ef   :  { %6681 = vmatprep.mubr.bf16.mxu1 %v7317_v14 }
 0x4f6   :  { %6682 = vmatmul.mubr.bf16.gmra.mrb[36].mxu1 %v7318_v15 }
 0x4f7   :  { %6685 = vmatprep.mubr.bf16.mxu1 %v7319_v58 }
 0x4fe   :  { %6686 = vmatmul.mubr.bf16.gmra.mrb[40].mxu1 %v7320_v42 }
 0x4ff   :  { %6689 = vmatprep.mubr.bf16.mxu1 %v7321_v3  ;;  %v9536_v3 = vld [vmem:[#allocation21_spill] sm:$0xff] }
 0x506   :  { %6690 = vmatmul.mubr.bf16.gmra.mrb[44].mxu1 %v7322_v57 }
 0x5c1   :  { %v6679_v50 = vpop.f32.mrb[32].mxu1 }
 0x5c2   :  { %v1413_v17 = vadd.f32 %v6679_v50, %v9524_v13  ;;  %v1404_v51 = vpop.f32.mrb[33].mxu1  ;;  %v9537_v13 = vld [vmem:[#allocation19_spill] sm:$0xff] }
 0x5c3   :  { %v1405_v16 = vadd.f32 %v1404_v51, %v9525_v19  ;;  %v6680_v53 = vpop.f32.mrb[34].mxu1  ;;  %v9538_v19 = vld [vmem:[#allocation20_spill] sm:$0xff] }
 0x5c4   :  { %v1416_v52 = vadd.f32 %v6680_v53, %v9526_v56  ;;  %v1407_v12 = vpop.f32.mrb[35].mxu1  ;;  %v1469_v25 = vmax.f32 %v1413_v17, 0.0  ;;  %v9539_v56 = vld [vmem:[#allocation18_spill] sm:$0xff] }
 0x5c5   :  { %v1408_v34 = vadd.f32 %v1407_v12, %v9527_v33  ;;  %v1467_v22 = vmax.f32 %v1405_v16, 0.0 }
 0x5c6   :  { %v1470_v30 = vmax.f32 %v1416_v52, 0.0 }
 0x5c7   :  { %v1468_v44 = vmax.f32 %v1408_v34, 0.0 }
 0x5c8   :  { %v1484_v43 = vpack.c.bf16 %v1470_v30, %v1469_v25 }
 0x5c9   :  { %v1483_v48 = vpack.c.bf16 %v1468_v44, %v1467_v22  ;;  %v6683_v49 = vpop.f32.mrb[36].mxu1  ;;  %v7323_v44 = vld [vmem:[%s9410_s2 + $0x80] sm:$0xff]  }
 0x5ca   :  { %v1429_v45 = vadd.f32 %v6683_v49, %v9528_v18  ;;  %v1420_v47 = vpop.f32.mrb[37].mxu1  ;;  %6741 = vmatprep.mubr.bf16.mxu1 %v7323_v44 }
 0x5cb   :  { %v1421_v41 = vadd.f32 %v1420_v47, %v9529_v1  ;;  %v6684_v26 = vpop.f32.mrb[38].mxu1  ;;  %6709 = vmatprep.mubr.bf16.mxu0 %v1483_v48 }
 0x5cc   :  { %v1432_v46 = vadd.f32 %v6684_v26, %v9530_v61  ;;  %v1423_v20 = vpop.f32.mrb[39].mxu1  ;;  %6710 = vmatmul.mubr.bf16.vlgmr.msra.gmra.mrb[48].mxu0 %v1484_v43  ;;  %v1473_v32 = vmax.f32 %v1429_v45, 0.0 }
 0x5cd   :  { %v1424_v0 = vadd.f32 %v1423_v20, %v9531_v38  ;;  %v1471_v37 = vmax.f32 %v1421_v41, 0.0 }
 0x5ce   :  { %v1474_v60 = vmax.f32 %v1432_v46, 0.0 }
 0x5cf   :  { %v1472_v28 = vmax.f32 %v1424_v0, 0.0 }
 0x5d0   :  { %v1486_v11 = vpack.c.bf16 %v1474_v60, %v1473_v32 }
 0x5d1   :  { %v1485_v63 = vpack.c.bf16 %v1472_v28, %v1471_v37  ;;  %v6687_v40 = vpop.f32.mrb[40].mxu1 }
 0x5d2   :  { %v1445_v2 = vadd.f32 %v6687_v40, %v9532_v55  ;;  %v1436_v9 = vpop.f32.mrb[41].mxu1 }
 0x5d3   :  { %v1437_v6 = vadd.f32 %v1436_v9, %v9533_v62  ;;  %v6688_v54 = vpop.f32.mrb[42].mxu1  ;;  %6713 = vmatprep.mubr.bf16.mxu0 %v1485_v63  ;;  %v7324_v62 = vld [vmem:[%s9410_s2 + $0x88] sm:$0xff]  }
 0x5d4   :  { %v1448_v29 = vadd.f32 %v6688_v54, %v9534_v8  ;;  %v1439_v4 = vpop.f32.mrb[43].mxu1  ;;  %6714 = vmatmul.mubr.bf16.gmra.mrb[52].mxu0 %v1486_v11  ;;  %v1477_v24 = vmax.f32 %v1445_v2, 0.0  ;;  %v7326_v54 = vld [vmem:[%s9410_s2 + $0x98] sm:$0xff]   ;;  %v7327_v8 = vld [vmem:[%s9410_s2 + $0xa0] sm:$0xff]  }
 0x5d5   :  { %v1440_v35 = vadd.f32 %v1439_v4, %v9535_v59  ;;  %v1475_v7 = vmax.f32 %v1437_v6, 0.0  ;;  %v7325_v6 = vld [vmem:[%s9410_s2 + $0x90] sm:$0xff]   ;;  %v8906_v59 = vld [vmem:[%s9408_s0 + $0x20] sm:$0xff]  }
 0x5d6   :  { %v1478_v27 = vmax.f32 %v1448_v29, 0.0  ;;  %v7328_v29 = vld [vmem:[%s9410_s2 + $0xa8] sm:$0xff]   ;;  %v7329_v4 = vld [vmem:[%s9410_s2 + $0xb0] sm:$0xff]  }
 0x5d7   :  { %v1476_v14 = vmax.f32 %v1440_v35, 0.0  ;;  %v8913_v35 = vld [vmem:[%s9408_s0 + $0x28] sm:$0xff]  }
 0x5d8   :  { %v1488_v15 = vpack.c.bf16 %v1478_v27, %v1477_v24  ;;  %v7330_v24 = vld [vmem:[%s9410_s2 + $0xb8] sm:$0xff]   ;;  %v8923_v27 = vld [vmem:[%s9408_s0 + $0x30] sm:$0xff]  }
 0x5d9   :  { %v1487_v58 = vpack.c.bf16 %v1476_v14, %v1475_v7  ;;  %v6691_v42 = vpop.f32.mrb[44].mxu1  ;;  %v8930_v7 = vld [vmem:[%s9408_s0 + $0x38] sm:$0xff]   ;;  %v7331_v14 = vld [vmem:[%s9412_s4 + $0x80] sm:$0xff]  }
 0x5da   :  { %v1461_v57 = vadd.f32 %v6691_v42, %v9536_v3  ;;  %v1452_v50 = vpop.f32.mrb[45].mxu1 }
 0x5db   :  { %v1453_v17 = vadd.f32 %v1452_v50, %v9537_v13  ;;  %v6692_v51 = vpop.f32.mrb[46].mxu1  ;;  %6717 = vmatprep.mubr.bf16.mxu0 %v1487_v58  ;;  %v9540_v58 = vld [vmem:[#allocation25_spill] sm:$0xff] }
 0x5dc   :  { %v1464_v16 = vadd.f32 %v6692_v51, %v9538_v19  ;;  %v1455_v53 = vpop.f32.mrb[47].mxu1  ;;  %6718 = vmatmul.mubr.bf16.gmra.mrb[56].mxu0 %v1488_v15  ;;  %v1481_v12 = vmax.f32 %v1461_v57, 0.0  ;;  %v9541_v57 = vld [vmem:[#allocation23_spill] sm:$0xff] }
 0x5dd   :  { %v1456_v52 = vadd.f32 %v1455_v53, %v9539_v56  ;;  %v1479_v34 = vmax.f32 %v1453_v17, 0.0  ;;  %v9542_v17 = vld [vmem:[#allocation24_spill] sm:$0xff] }
 0x5de   :  { %v1482_v33 = vmax.f32 %v1464_v16, 0.0  ;;  %v9543_v16 = vld [vmem:[#allocation22_spill] sm:$0xff] }
 0x5df   :  { %v1480_v25 = vmax.f32 %v1456_v52, 0.0 }
 0x5e0   :  { %v1490_v30 = vpack.c.bf16 %v1482_v33, %v1481_v12 }
 0x5e1   :  { %v1489_v22 = vpack.c.bf16 %v1480_v25, %v1479_v34 }
 0x5e3   :  { %6721 = vmatprep.mubr.bf16.mxu0 %v1489_v22  ;;  %v9544_v22 = vld [vmem:[#allocation29_spill] sm:$0xff] }
 0x5e4   :  { %6722 = vmatmul.mubr.bf16.gmra.mrb[60].mxu0 %v1490_v30 }
 0x5e5   :  { %6773 = vmatprep.mubr.bf16.mxu0 %v7331_v14 }
 0x69f   :  { %v6711_v43 = vpop.f32.mrb[48].mxu0 }
 0x6a0   :  { %v1525_v48 = vpop.f32.mrb[49].mxu0 }
 0x6a1   :  { %v6712_v49 = vpop.f32.mrb[50].mxu0 }
 0x6a2   :  { %v1606_v18 = vpack.c.bf16 %v6712_v49, %v6711_v43  ;;  %v1528_v45 = vpop.f32.mrb[51].mxu0 }
 0x6a3   :  { %v1605_v47 = vpack.c.bf16 %v1528_v45, %v1525_v48  ;;  %v9545_v48 = vld [vmem:[#allocation27_spill] sm:$0xff]  ;;  %v9546_v45 = vld [vmem:[#allocation28_spill] sm:$0xff] }
 0x6a5   :  { %6725 = vmatprep.subr.bf16.mxu1 %v1605_v47 }
 0x6a6   :  { %6726 = vmatpush3.bf16.msra.mxu1 %v1605_v47 }
 0x6a7   :  { %v6715_v1 = vpop.f32.mrb[52].mxu0  ;;  %6727 = vmatprep.subr.bf16.mxu1 %v1606_v18 }
 0x6a8   :  { %v1541_v41 = vpop.f32.mrb[53].mxu0 }
 0x6a9   :  { %v6716_v26 = vpop.f32.mrb[54].mxu0 }
 0x6aa   :  { %v1608_v61 = vpack.c.bf16 %v6716_v26, %v6715_v1  ;;  %v1544_v46 = vpop.f32.mrb[55].mxu0  ;;  %6728 = vmatpush3.bf16.msra.mxu1 %v1606_v18 }
 0x6ab   :  { %v1607_v20 = vpack.c.bf16 %v1544_v46, %v1541_v41  ;;  %v9547_v41 = vld [vmem:[#allocation26_spill] sm:$0xff] }
 0x6ad   :  { %6729 = vmatprep.subr.bf16.mxu1 %v1607_v20 }
 0x6ae   :  { %6730 = vmatpush3.bf16.msra.mxu1 %v1607_v20 }
 0x6af   :  { %v6719_v38 = vpop.f32.mrb[56].mxu0  ;;  %6731 = vmatprep.subr.bf16.mxu1 %v1608_v61 }
 0x6b0   :  { %v1557_v0 = vpop.f32.mrb[57].mxu0 }
 0x6b1   :  { %v6720_v32 = vpop.f32.mrb[58].mxu0 }
 0x6b2   :  { %v1610_v60 = vpack.c.bf16 %v6720_v32, %v6719_v38  ;;  %v1560_v37 = vpop.f32.mrb[59].mxu0  ;;  %6732 = vmatpush3.bf16.msra.mxu1 %v1608_v61 }
 0x6b3   :  { %v1609_v28 = vpack.c.bf16 %v1560_v37, %v1557_v0  ;;  %v9548_v37 = vld [vmem:[#allocation33_spill] sm:$0xff] }
 0x6b5   :  { %6733 = vmatprep.subr.bf16.mxu1 %v1609_v28 }
 0x6b6   :  { %6734 = vmatpush3.bf16.msra.mxu1 %v1609_v28 }
 0x6b7   :  { %v6723_v11 = vpop.f32.mrb[60].mxu0  ;;  %6735 = vmatprep.subr.bf16.mxu1 %v1610_v60 }
 0x6b8   :  { %v1573_v63 = vpop.f32.mrb[61].mxu0 }
 0x6b9   :  { %v6724_v40 = vpop.f32.mrb[62].mxu0 }
 0x6ba   :  { %v1612_v55 = vpack.c.bf16 %v6724_v40, %v6723_v11  ;;  %v1576_v2 = vpop.f32.mrb[63].mxu0  ;;  %6736 = vmatpush3.bf16.msra.mxu1 %v1610_v60 }
 0x6bb   :  { %v1611_v9 = vpack.c.bf16 %v1576_v2, %v1573_v63  ;;  %v9549_v63 = vld [vmem:[#allocation31_spill] sm:$0xff]  ;;  %v9550_v2 = vld [vmem:[#allocation32_spill] sm:$0xff] }
 0x6bd   :  { %6737 = vmatprep.subr.bf16.mxu1 %v1611_v9 }
 0x6be   :  { %6738 = vmatpush3.bf16.msra.mxu1 %v1611_v9 }
 0x6bf   :  { %6739 = vmatprep.subr.bf16.mxu1 %v1612_v55 }
 0x6c2   :  { %6740 = vmatpush3.bf16.msra.mxu1 %v1612_v55 }
 0x6c3   :  { %6789 = vmatprep.subr.bf16.mxu1 %v8770_v36 }
 0x6c5   :  { %6742 = vmatmul.mubr.bf16.vlgmr.msra.gmra.mrb[48].mxu1 %v7324_v62 }
 0x6c6   :  { %6745 = vmatprep.mubr.bf16.mxu1 %v7325_v6  ;;  %6790 = vmatpush3.bf16.msra.mxu1 %v8770_v36  ;;  %v9551_v6 = vld [vmem:[#allocation30_spill] sm:$0xff] }
 0x6c7   :  { %6791 = vmatprep.subr.bf16.mxu1 %v8777_v31 }
 0x6ca   :  { %6792 = vmatpush3.bf16.msra.mxu1 %v8777_v31 }
 0x6cb   :  { %6793 = vmatprep.subr.bf16.mxu1 %v8790_v5 }
 0x6cd   :  { %6746 = vmatmul.mubr.bf16.gmra.mrb[52].mxu1 %v7326_v54 }
 0x6ce   :  { %6749 = vmatprep.mubr.bf16.mxu1 %v7327_v8  ;;  %6794 = vmatpush3.bf16.msra.mxu1 %v8790_v5 }
 0x6cf   :  { %6795 = vmatprep.subr.bf16.mxu1 %v8797_v39 }
 0x6d2   :  { %6796 = vmatpush3.bf16.msra.mxu1 %v8797_v39 }
 0x6d3   :  { %6797 = vmatprep.subr.bf16.mxu1 %v8906_v59 }
 0x6d5   :  { %6750 = vmatmul.mubr.bf16.gmra.mrb[56].mxu1 %v7328_v29 }
 0x6d6   :  { %6753 = vmatprep.mubr.bf16.mxu1 %v7329_v4  ;;  %6798 = vmatpush3.bf16.msra.mxu1 %v8906_v59 }
 0x6d7   :  { %6799 = vmatprep.subr.bf16.mxu1 %v8913_v35 }
 0x6da   :  { %6800 = vmatpush3.bf16.msra.mxu1 %v8913_v35 }
 0x6db   :  { %6801 = vmatprep.subr.bf16.mxu1 %v8923_v27 }
 0x6dd   :  { %6754 = vmatmul.mubr.bf16.gmra.mrb[60].mxu1 %v7330_v24 }
 0x6de   :  { %6802 = vmatpush3.bf16.msra.mxu1 %v8923_v27 }
 0x6df   :  { %6803 = vmatprep.subr.bf16.mxu1 %v8930_v7 }
 0x6e2   :  { %6804 = vmatpush3.bf16.msra.mxu1 %v8930_v7 }
 0x798   :  { %v6743_v15 = vpop.f32.mrb[48].mxu1 }
 0x799   :  { %v1801_v42 = vadd.f32 %v6743_v15, %v9540_v58  ;;  %v1792_v3 = vpop.f32.mrb[49].mxu1 }
 0x79a   :  { %v1793_v50 = vadd.f32 %v1792_v3, %v9541_v57  ;;  %v6744_v13 = vpop.f32.mrb[50].mxu1 }
 0x79b   :  { %v1804_v51 = vadd.f32 %v6744_v13, %v9542_v17  ;;  %v1795_v19 = vpop.f32.mrb[51].mxu1  ;;  %v1857_v56 = vmax.f32 %v1801_v42, 0.0  ;;  %v9552_v42 = vld [vmem:[#allocation37_spill] sm:$0xff] }
 0x79c   :  { %v1796_v53 = vadd.f32 %v1795_v19, %v9543_v16  ;;  %v1855_v12 = vmax.f32 %v1793_v50, 0.0  ;;  %v9553_v50 = vld [vmem:[#allocation35_spill] sm:$0xff] }
 0x79d   :  { %v1858_v52 = vmax.f32 %v1804_v51, 0.0  ;;  %v9554_v51 = vld [vmem:[#allocation36_spill] sm:$0xff] }
 0x79e   :  { %v1856_v33 = vmax.f32 %v1796_v53, 0.0  ;;  %v9555_v53 = vld [vmem:[#allocation34_spill] sm:$0xff] }
 0x79f   :  { %v1889_v34 = vpack.c.bf16 %v1858_v52, %v1857_v56 }
 0x7a0   :  { %v1888_v25 = vpack.c.bf16 %v1856_v33, %v1855_v12  ;;  %v6747_v30 = vpop.f32.mrb[52].mxu1 }
 0x7a1   :  { %v1817_v44 = vadd.f32 %v6747_v30, %v9544_v22  ;;  %v1808_v43 = vpop.f32.mrb[53].mxu1  ;;  %v7332_v22 = vld [vmem:[%s9412_s4 + $0x88] sm:$0xff]  }
 0x7a2   :  { %v1809_v49 = vadd.f32 %v1808_v43, %v9545_v48  ;;  %v6748_v18 = vpop.f32.mrb[54].mxu1  ;;  %6757 = vmatprep.subr.bf16.mxu0 %v1888_v25  ;;  %v7334_v43 = vld [vmem:[%s9412_s4 + $0x98] sm:$0xff]   ;;  %v7335_v48 = vld [vmem:[%s9412_s4 + $0xa0] sm:$0xff]  }
 0x7a3   :  { %v1820_v47 = vadd.f32 %v6748_v18, %v9546_v45  ;;  %v1811_v1 = vpop.f32.mrb[55].mxu1  ;;  %6758 = vmatpush3.bf16.msra.mxu0 %v1888_v25  ;;  %v1861_v61 = vmax.f32 %v1817_v44, 0.0  ;;  %v7333_v44 = vld [vmem:[%s9412_s4 + $0x90] sm:$0xff]   ;;  %v7338_v45 = vld [vmem:[%s9412_s4 + $0xb8] sm:$0xff]  }
 0x7a4   :  { %v1812_v26 = vadd.f32 %v1811_v1, %v9547_v41  ;;  %6759 = vmatprep.subr.bf16.mxu0 %v1889_v34  ;;  %v1859_v20 = vmax.f32 %v1809_v49, 0.0  ;;  %v7336_v49 = vld [vmem:[%s9412_s4 + $0xa8] sm:$0xff]   ;;  %v7337_v18 = vld [vmem:[%s9412_s4 + $0xb0] sm:$0xff]   ;;  %v9556_v1 = vld [vmem:[#allocation41_spill] sm:$0xff] }
 0x7a5   :  { %v1862_v46 = vmax.f32 %v1820_v47, 0.0 }
 0x7a6   :  { %v1860_v38 = vmax.f32 %v1812_v26, 0.0 }
 0x7a7   :  { %v1891_v0 = vpack.c.bf16 %v1862_v46, %v1861_v61  ;;  %6760 = vmatpush3.bf16.msra.mxu0 %v1889_v34  ;;  %v9557_v61 = vld [vmem:[#allocation39_spill] sm:$0xff] }
 0x7a8   :  { %v1890_v32 = vpack.c.bf16 %v1860_v38, %v1859_v20  ;;  %v6751_v60 = vpop.f32.mrb[56].mxu1  ;;  %v9558_v38 = vld [vmem:[#allocation40_spill] sm:$0xff] }
 0x7a9   :  { %v1833_v28 = vadd.f32 %v6751_v60, %v9548_v37  ;;  %v1824_v11 = vpop.f32.mrb[57].mxu1  ;;  %v9559_v60 = vld [vmem:[#allocation38_spill] sm:$0xff] }
 0x7aa   :  { %v1825_v40 = vadd.f32 %v1824_v11, %v9549_v63  ;;  %v6752_v55 = vpop.f32.mrb[58].mxu1  ;;  %6761 = vmatprep.subr.bf16.mxu0 %v1890_v32 }
 0x7ab   :  { %v1836_v9 = vadd.f32 %v6752_v55, %v9550_v2  ;;  %v1827_v62 = vpop.f32.mrb[59].mxu1  ;;  %6762 = vmatpush3.bf16.msra.mxu0 %v1890_v32  ;;  %v1865_v8 = vmax.f32 %v1833_v28, 0.0 }
 0x7ac   :  { %v1828_v54 = vadd.f32 %v1827_v62, %v9551_v6  ;;  %6763 = vmatprep.subr.bf16.mxu0 %v1891_v0  ;;  %v1863_v4 = vmax.f32 %v1825_v40, 0.0  ;;  %v9560_v62 = vld [vmem:[#allocation45_spill] sm:$0xff] }
 0x7ad   :  { %v1866_v29 = vmax.f32 %v1836_v9, 0.0 }
 0x7ae   :  { %v1864_v24 = vmax.f32 %v1828_v54, 0.0 }
 0x7af   :  { %v1893_v14 = vpack.c.bf16 %v1866_v29, %v1865_v8  ;;  %6764 = vmatpush3.bf16.msra.mxu0 %v1891_v0  ;;  %v9561_v8 = vld [vmem:[#allocation43_spill] sm:$0xff] }
 0x7b0   :  { %v1892_v15 = vpack.c.bf16 %v1864_v24, %v1863_v4  ;;  %v6755_v58 = vpop.f32.mrb[60].mxu1  ;;  %v9562_v24 = vld [vmem:[#allocation44_spill] sm:$0xff] }
 0x7b1   :  { %v1849_v3 = vadd.f32 %v6755_v58, %v9552_v42  ;;  %v1840_v57 = vpop.f32.mrb[61].mxu1  ;;  %v9563_v58 = vld [vmem:[#allocation42_spill] sm:$0xff] }
 0x7b2   :  { %v1841_v13 = vadd.f32 %v1840_v57, %v9553_v50  ;;  %v6756_v17 = vpop.f32.mrb[62].mxu1  ;;  %6765 = vmatprep.subr.bf16.mxu0 %v1892_v15 }
 0x7b3   :  { %v1852_v19 = vadd.f32 %v6756_v17, %v9554_v51  ;;  %v1843_v16 = vpop.f32.mrb[63].mxu1  ;;  %6766 = vmatpush3.bf16.msra.mxu0 %v1892_v15  ;;  %v1869_v52 = vmax.f32 %v1849_v3, 0.0 }
 0x7b4   :  { %v1844_v56 = vadd.f32 %v1843_v16, %v9555_v53  ;;  %6767 = vmatprep.subr.bf16.mxu0 %v1893_v14  ;;  %v1867_v33 = vmax.f32 %v1841_v13, 0.0  ;;  %v9564_v16 = vld [vmem:[#allocation49_spill] sm:$0xff] }
 0x7b5   :  { %v1870_v12 = vmax.f32 %v1852_v19, 0.0 }
 0x7b6   :  { %v1868_v34 = vmax.f32 %v1844_v56, 0.0 }
 0x7b7   :  { %v1895_v25 = vpack.c.bf16 %v1870_v12, %v1869_v52  ;;  %6768 = vmatpush3.bf16.msra.mxu0 %v1893_v14  ;;  %v9565_v52 = vld [vmem:[#allocation47_spill] sm:$0xff] }
 0x7b8   :  { %v1894_v30 = vpack.c.bf16 %v1868_v34, %v1867_v33  ;;  %v9566_v34 = vld [vmem:[#allocation48_spill] sm:$0xff] }
 0x7ba   :  { %6769 = vmatprep.subr.bf16.mxu0 %v1894_v30 }
 0x7bb   :  { %6770 = vmatpush3.bf16.msra.mxu0 %v1894_v30 }
 0x7bc   :  { %6771 = vmatprep.subr.bf16.mxu0 %v1895_v25 }
 0x7bf   :  { %6772 = vmatpush3.bf16.msra.mxu0 %v1895_v25 }
 0x7c2   :  { %6774 = vmatmul.mubr.bf16.vlgmr.msra.gmra.mrb[64].mxu0 %v7332_v22  ;;  %v9567_v22 = vld [vmem:[#allocation46_spill] sm:$0xff] }
 0x7c3   :  { %6777 = vmatprep.mubr.bf16.mxu0 %v7333_v44 }
 0x7ca   :  { %6778 = vmatmul.mubr.bf16.gmra.mrb[68].mxu0 %v7334_v43 }
 0x7cb   :  { %6781 = vmatprep.mubr.bf16.mxu0 %v7335_v48 }
 0x7d2   :  { %6782 = vmatmul.mubr.bf16.gmra.mrb[72].mxu0 %v7336_v49 }
 0x7d3   :  { %6785 = vmatprep.mubr.bf16.mxu0 %v7337_v18 }
 0x7da   :  { %6786 = vmatmul.mubr.bf16.gmra.mrb[76].mxu0 %v7338_v45 }
 0x895   :  { %v6775_v47 = vpop.f32.mrb[64].mxu0 }
 0x896   :  { %v2084_v41 = vadd.f32 %v6775_v47, %v9556_v1  ;;  %v2075_v26 = vpop.f32.mrb[65].mxu0 }
 0x897   :  { %v2076_v46 = vadd.f32 %v2075_v26, %v9557_v61  ;;  %v6776_v20 = vpop.f32.mrb[66].mxu0 }
 0x898   :  { %v2087_v0 = vadd.f32 %v6776_v20, %v9558_v38  ;;  %v2078_v32 = vpop.f32.mrb[67].mxu0  ;;  %v2140_v28 = vmax.f32 %v2084_v41, 0.0  ;;  %v9568_v41 = vld [vmem:[#allocation53_spill] sm:$0xff] }
 0x899   :  { %v2079_v37 = vadd.f32 %v2078_v32, %v9559_v60  ;;  %v2138_v63 = vmax.f32 %v2076_v46, 0.0  ;;  %v9569_v46 = vld [vmem:[#allocation51_spill] sm:$0xff] }
 0x89a   :  { %v2141_v11 = vmax.f32 %v2087_v0, 0.0  ;;  %v9570_v0 = vld [vmem:[#allocation52_spill] sm:$0xff] }
 0x89b   :  { %v2139_v40 = vmax.f32 %v2079_v37, 0.0  ;;  %v9571_v37 = vld [vmem:[#allocation50_spill] sm:$0xff] }
 0x89c   :  { %v2155_v55 = vpack.c.bf16 %v2141_v11, %v2140_v28 }
 0x89d   :  { %v2154_v2 = vpack.c.bf16 %v2139_v40, %v2138_v63  ;;  %v6779_v9 = vpop.f32.mrb[68].mxu0 }
 0x89e   :  { %v2100_v6 = vadd.f32 %v6779_v9, %v9560_v62  ;;  %v2091_v54 = vpop.f32.mrb[69].mxu0  ;;  %v7339_v62 = vld [vmem:[%s9410_s2 + $0xc0] sm:$0xff]  }
 0x89f   :  { %v2092_v29 = vadd.f32 %v2091_v54, %v9561_v8  ;;  %v6780_v4 = vpop.f32.mrb[70].mxu0  ;;  %6805 = vmatprep.mubr.bf16.mxu1 %v2154_v2  ;;  %6837 = vmatprep.mubr.bf16.mxu0 %v7339_v62 }
 0x8a0   :  { %v2103_v14 = vadd.f32 %v6780_v4, %v9562_v24  ;;  %v2094_v15 = vpop.f32.mrb[71].mxu0  ;;  %6806 = vmatmul.mubr.bf16.vlgmr.msra.gmra.mrb[64].mxu1 %v2155_v55  ;;  %v2144_v3 = vmax.f32 %v2100_v6, 0.0 }
 0x8a1   :  { %v2095_v42 = vadd.f32 %v2094_v15, %v9563_v58  ;;  %v2142_v50 = vmax.f32 %v2092_v29, 0.0 }
 0x8a2   :  { %v2145_v57 = vmax.f32 %v2103_v14, 0.0 }
 0x8a3   :  { %v2143_v13 = vmax.f32 %v2095_v42, 0.0 }
 0x8a4   :  { %v2157_v17 = vpack.c.bf16 %v2145_v57, %v2144_v3 }
 0x8a5   :  { %v2156_v51 = vpack.c.bf16 %v2143_v13, %v2142_v50  ;;  %v6783_v19 = vpop.f32.mrb[72].mxu0 }
 0x8a6   :  { %v2116_v53 = vadd.f32 %v6783_v19, %v9564_v16  ;;  %v2107_v56 = vpop.f32.mrb[73].mxu0 }
 0x8a7   :  { %v2108_v12 = vadd.f32 %v2107_v56, %v9565_v52  ;;  %v6784_v33 = vpop.f32.mrb[74].mxu0  ;;  %6809 = vmatprep.mubr.bf16.mxu1 %v2156_v51 }
 0x8a8   :  { %v2119_v25 = vadd.f32 %v6784_v33, %v9566_v34  ;;  %v2110_v30 = vpop.f32.mrb[75].mxu0  ;;  %6810 = vmatmul.mubr.bf16.gmra.mrb[68].mxu1 %v2157_v17  ;;  %v2148_v43 = vmax.f32 %v2116_v53, 0.0 }
 0x8a9   :  { %v2111_v44 = vadd.f32 %v2110_v30, %v9567_v22  ;;  %v2146_v49 = vmax.f32 %v2108_v12, 0.0  ;;  %v7341_v30 = vld [vmem:[%s9410_s2 + $0xd0] sm:$0xff]   ;;  %v7342_v22 = vld [vmem:[%s9410_s2 + $0xd8] sm:$0xff]  }
 0x8aa   :  { %v2149_v48 = vmax.f32 %v2119_v25, 0.0  ;;  %v7340_v25 = vld [vmem:[%s9410_s2 + $0xc8] sm:$0xff]  }
 0x8ab   :  { %v2147_v18 = vmax.f32 %v2111_v44, 0.0  ;;  %v7343_v44 = vld [vmem:[%s9410_s2 + $0xe0] sm:$0xff]  }
 0x8ac   :  { %v2159_v45 = vpack.c.bf16 %v2149_v48, %v2148_v43  ;;  %v7345_v43 = vld [vmem:[%s9410_s2 + $0xf0] sm:$0xff]   ;;  %v9572_v48 = vld [vmem:[#allocation57_spill] sm:$0xff] }
 0x8ad   :  { %v2158_v47 = vpack.c.bf16 %v2147_v18, %v2146_v49  ;;  %v6787_v1 = vpop.f32.mrb[76].mxu0 }
 0x8ae   :  { %v2132_v26 = vadd.f32 %v6787_v1, %v9568_v41  ;;  %v2123_v61 = vpop.f32.mrb[77].mxu0  ;;  %v9574_v41 = vld [vmem:[#allocation56_spill] sm:$0xff] }
 0x8af   :  { %v2124_v20 = vadd.f32 %v2123_v61, %v9569_v46  ;;  %v6788_v38 = vpop.f32.mrb[78].mxu0  ;;  %6813 = vmatprep.mubr.bf16.mxu1 %v2158_v47  ;;  %v9575_v46 = vld [vmem:[#allocation54_spill] sm:$0xff] }
 0x8b0   :  { %v2135_v32 = vadd.f32 %v6788_v38, %v9570_v0  ;;  %v2126_v60 = vpop.f32.mrb[79].mxu0  ;;  %6814 = vmatmul.mubr.bf16.gmra.mrb[72].mxu1 %v2159_v45  ;;  %v2152_v11 = vmax.f32 %v2132_v26, 0.0  ;;  %v9573_v45 = vld [vmem:[#allocation55_spill] sm:$0xff] }
 0x8b1   :  { %v2127_v28 = vadd.f32 %v2126_v60, %v9571_v37  ;;  %v2150_v40 = vmax.f32 %v2124_v20, 0.0 }
 0x8b2   :  { %v2153_v63 = vmax.f32 %v2135_v32, 0.0 }
 0x8b3   :  { %v2151_v55 = vmax.f32 %v2127_v28, 0.0 }
 0x8b4   :  { %v2161_v2 = vpack.c.bf16 %v2153_v63, %v2152_v11  ;;  %v9576_v63 = vld [vmem:[#allocation61_spill] sm:$0xff] }
 0x8b5   :  { %v2160_v9 = vpack.c.bf16 %v2151_v55, %v2150_v40 }
 0x8b7   :  { %6817 = vmatprep.mubr.bf16.mxu1 %v2160_v9 }
 0x8b8   :  { %6818 = vmatmul.mubr.bf16.gmra.mrb[76].mxu1 %v2161_v2  ;;  %v9577_v2 = vld [vmem:[#allocation59_spill] sm:$0xff] }
 0x973   :  { %v6807_v6 = vpop.f32.mrb[64].mxu1 }
 0x974   :  { %v2196_v54 = vpop.f32.mrb[65].mxu1 }
 0x975   :  { %v6808_v8 = vpop.f32.mrb[66].mxu1 }
 0x976   :  { %v2277_v29 = vpack.c.bf16 %v6808_v8, %v6807_v6  ;;  %v2199_v4 = vpop.f32.mrb[67].mxu1  ;;  %v9578_v6 = vld [vmem:[#allocation60_spill] sm:$0xff] }
 0x977   :  { %v2276_v24 = vpack.c.bf16 %v2199_v4, %v2196_v54 }
 0x979   :  { %6821 = vmatprep.subr.bf16.mxu0 %v2276_v24 }
 0x97a   :  { %6822 = vmatpush3.bf16.msra.mxu0 %v2276_v24 }
 0x97b   :  { %v6811_v14 = vpop.f32.mrb[68].mxu1  ;;  %6823 = vmatprep.subr.bf16.mxu0 %v2277_v29 }
 0x97c   :  { %v2212_v15 = vpop.f32.mrb[69].mxu1 }
 0x97d   :  { %v6812_v58 = vpop.f32.mrb[70].mxu1 }
 0x97e   :  { %v2279_v42 = vpack.c.bf16 %v6812_v58, %v6811_v14  ;;  %v2215_v3 = vpop.f32.mrb[71].mxu1  ;;  %6824 = vmatpush3.bf16.msra.mxu0 %v2277_v29  ;;  %v9579_v29 = vld [vmem:[#allocation58_spill] sm:$0xff] }
 0x97f   :  { %v2278_v57 = vpack.c.bf16 %v2215_v3, %v2212_v15 }
 0x981   :  { %6825 = vmatprep.subr.bf16.mxu0 %v2278_v57 }
 0x982   :  { %6826 = vmatpush3.bf16.msra.mxu0 %v2278_v57 }
 0x983   :  { %v6815_v50 = vpop.f32.mrb[72].mxu1  ;;  %6827 = vmatprep.subr.bf16.mxu0 %v2279_v42 }
 0x984   :  { %v2228_v13 = vpop.f32.mrb[73].mxu1 }
 0x985   :  { %v6816_v17 = vpop.f32.mrb[74].mxu1 }
 0x986   :  { %v2281_v51 = vpack.c.bf16 %v6816_v17, %v6815_v50  ;;  %v2231_v19 = vpop.f32.mrb[75].mxu1  ;;  %6828 = vmatpush3.bf16.msra.mxu0 %v2279_v42  ;;  %v9580_v50 = vld [vmem:[#allocation65_spill] sm:$0xff] }
 0x987   :  { %v2280_v16 = vpack.c.bf16 %v2231_v19, %v2228_v13 }
 0x989   :  { %6829 = vmatprep.subr.bf16.mxu0 %v2280_v16 }
 0x98a   :  { %6830 = vmatpush3.bf16.msra.mxu0 %v2280_v16 }
 0x98b   :  { %v6819_v53 = vpop.f32.mrb[76].mxu1  ;;  %6831 = vmatprep.subr.bf16.mxu0 %v2281_v51 }
 0x98c   :  { %v2244_v56 = vpop.f32.mrb[77].mxu1 }
 0x98d   :  { %v6820_v52 = vpop.f32.mrb[78].mxu1 }
 0x98e   :  { %v2283_v12 = vpack.c.bf16 %v6820_v52, %v6819_v53  ;;  %v2247_v33 = vpop.f32.mrb[79].mxu1  ;;  %6832 = vmatpush3.bf16.msra.mxu0 %v2281_v51  ;;  %v9581_v51 = vld [vmem:[#allocation63_spill] sm:$0xff]  ;;  %v9582_v53 = vld [vmem:[#allocation64_spill] sm:$0xff] }
 0x98f   :  { %v2282_v34 = vpack.c.bf16 %v2247_v33, %v2244_v56 }
 0x991   :  { %6833 = vmatprep.subr.bf16.mxu0 %v2282_v34 }
 0x992   :  { %6834 = vmatpush3.bf16.msra.mxu0 %v2282_v34 }
 0x993   :  { %6835 = vmatprep.subr.bf16.mxu0 %v2283_v12 }
 0x996   :  { %6836 = vmatpush3.bf16.msra.mxu0 %v2283_v12  ;;  %v9583_v12 = vld [vmem:[#allocation62_spill] sm:$0xff] }
 0x997   :  { %6885 = vmatprep.subr.bf16.mxu0 %v8770_v36 }
 0x999   :  { %6838 = vmatmul.mubr.bf16.vlgmr.msra.gmra.mrb[80].mxu0 %v7340_v25 }
 0x99a   :  { %6841 = vmatprep.mubr.bf16.mxu0 %v7341_v30  ;;  %6886 = vmatpush3.bf16.msra.mxu0 %v8770_v36  ;;  %v7344_v36 = vld [vmem:[%s9410_s2 + $0xe8] sm:$0xff]  }
 0x99b   :  { %6887 = vmatprep.subr.bf16.mxu0 %v8777_v31 }
 0x99e   :  { %6888 = vmatpush3.bf16.msra.mxu0 %v8777_v31  ;;  %v7346_v31 = vld [vmem:[%s9410_s2 + $0xf8] sm:$0xff]  }
 0x99f   :  { %6889 = vmatprep.subr.bf16.mxu0 %v8790_v5 }
 0x9a1   :  { %6842 = vmatmul.mubr.bf16.gmra.mrb[84].mxu0 %v7342_v22 }
 0x9a2   :  { %6845 = vmatprep.mubr.bf16.mxu0 %v7343_v44  ;;  %6890 = vmatpush3.bf16.msra.mxu0 %v8790_v5  ;;  %v7347_v5 = vld [vmem:[%s9412_s4 + $0xc0] sm:$0xff]  }
 0x9a3   :  { %6891 = vmatprep.subr.bf16.mxu0 %v8797_v39  ;;  %6869 = vmatprep.mubr.bf16.mxu1 %v7347_v5 }
 0x9a6   :  { %6892 = vmatpush3.bf16.msra.mxu0 %v8797_v39 }
 0x9a7   :  { %6893 = vmatprep.subr.bf16.mxu0 %v8906_v59 }
 0x9a9   :  { %6846 = vmatmul.mubr.bf16.gmra.mrb[88].mxu0 %v7344_v36 }
 0x9aa   :  { %6849 = vmatprep.mubr.bf16.mxu0 %v7345_v43  ;;  %6894 = vmatpush3.bf16.msra.mxu0 %v8906_v59 }
 0x9ab   :  { %6895 = vmatprep.subr.bf16.mxu0 %v8913_v35 }
 0x9ae   :  { %6896 = vmatpush3.bf16.msra.mxu0 %v8913_v35 }
 0x9af   :  { %6897 = vmatprep.subr.bf16.mxu0 %v8923_v27 }
 0x9b1   :  { %6850 = vmatmul.mubr.bf16.gmra.mrb[92].mxu0 %v7346_v31  ;;  %v9584_v31 = vld [vmem:[#allocation69_spill] sm:$0xff] }
 0x9b2   :  { %6898 = vmatpush3.bf16.msra.mxu0 %v8923_v27 }
 0x9b3   :  { %6899 = vmatprep.subr.bf16.mxu0 %v8930_v7 }
 0x9b6   :  { %6900 = vmatpush3.bf16.msra.mxu0 %v8930_v7 }
 0xa6c   :  { %v6839_v39 = vpop.f32.mrb[80].mxu0 }
 0xa6d   :  { %v2472_v49 = vadd.f32 %v6839_v39, %v9572_v48  ;;  %v2463_v18 = vpop.f32.mrb[81].mxu0  ;;  %v9585_v48 = vld [vmem:[#allocation67_spill] sm:$0xff] }
 0xa6e   :  { %v2464_v47 = vadd.f32 %v2463_v18, %v9573_v45  ;;  %v6840_v1 = vpop.f32.mrb[82].mxu0  ;;  %v9586_v45 = vld [vmem:[#allocation68_spill] sm:$0xff] }
 0xa6f   :  { %v2475_v26 = vadd.f32 %v6840_v1, %v9574_v41  ;;  %v2466_v61 = vpop.f32.mrb[83].mxu0  ;;  %v2528_v38 = vmax.f32 %v2472_v49, 0.0  ;;  %v9587_v41 = vld [vmem:[#allocation66_spill] sm:$0xff] }
 0xa70   :  { %v2467_v20 = vadd.f32 %v2466_v61, %v9575_v46  ;;  %v2526_v32 = vmax.f32 %v2464_v47, 0.0 }
 0xa71   :  { %v2529_v0 = vmax.f32 %v2475_v26, 0.0 }
 0xa72   :  { %v2527_v60 = vmax.f32 %v2467_v20, 0.0 }
 0xa73   :  { %v2560_v37 = vpack.c.bf16 %v2529_v0, %v2528_v38 }
 0xa74   :  { %v2559_v28 = vpack.c.bf16 %v2527_v60, %v2526_v32  ;;  %v6843_v11 = vpop.f32.mrb[84].mxu0  ;;  %v7348_v60 = vld [vmem:[%s9412_s4 + $0xc8] sm:$0xff]  }
 0xa75   :  { %v2488_v40 = vadd.f32 %v6843_v11, %v9576_v63  ;;  %v2479_v55 = vpop.f32.mrb[85].mxu0  ;;  %v7351_v11 = vld [vmem:[%s9412_s4 + $0xe0] sm:$0xff]   ;;  %v7352_v63 = vld [vmem:[%s9412_s4 + $0xe8] sm:$0xff]  }
 0xa76   :  { %v2480_v9 = vadd.f32 %v2479_v55, %v9577_v2  ;;  %v6844_v62 = vpop.f32.mrb[86].mxu0  ;;  %6853 = vmatprep.subr.bf16.mxu1 %v2559_v28  ;;  %v7354_v55 = vld [vmem:[%s9412_s4 + $0xf8] sm:$0xff]  }
 0xa77   :  { %v2491_v54 = vadd.f32 %v6844_v62, %v9578_v6  ;;  %v2482_v8 = vpop.f32.mrb[87].mxu0  ;;  %6854 = vmatpush3.bf16.msra.mxu1 %v2559_v28  ;;  %v2532_v24 = vmax.f32 %v2488_v40, 0.0  ;;  %v7350_v28 = vld [vmem:[%s9412_s4 + $0xd8] sm:$0xff]   ;;  %v7353_v40 = vld [vmem:[%s9412_s4 + $0xf0] sm:$0xff]  }
 0xa78   :  { %v2483_v4 = vadd.f32 %v2482_v8, %v9579_v29  ;;  %6855 = vmatprep.subr.bf16.mxu1 %v2560_v37  ;;  %v2530_v15 = vmax.f32 %v2480_v9, 0.0  ;;  %v9588_v9 = vld [vmem:[#allocation73_spill] sm:$0xff] }
 0xa79   :  { %v2533_v14 = vmax.f32 %v2491_v54, 0.0  ;;  %v9589_v54 = vld [vmem:[#allocation71_spill] sm:$0xff] }
 0xa7a   :  { %v2531_v58 = vmax.f32 %v2483_v4, 0.0  ;;  %v9590_v4 = vld [vmem:[#allocation72_spill] sm:$0xff] }
 0xa7b   :  { %v2562_v42 = vpack.c.bf16 %v2533_v14, %v2532_v24  ;;  %6856 = vmatpush3.bf16.msra.mxu1 %v2560_v37  ;;  %v7349_v37 = vld [vmem:[%s9412_s4 + $0xd0] sm:$0xff]  }
 0xa7c   :  { %v2561_v3 = vpack.c.bf16 %v2531_v58, %v2530_v15  ;;  %v6847_v57 = vpop.f32.mrb[88].mxu0  ;;  %v9591_v15 = vld [vmem:[#allocation70_spill] sm:$0xff] }
 0xa7d   :  { %v2504_v13 = vadd.f32 %v6847_v57, %v9580_v50  ;;  %v2495_v17 = vpop.f32.mrb[89].mxu0 }
 0xa7e   :  { %v2496_v19 = vadd.f32 %v2495_v17, %v9581_v51  ;;  %v6848_v16 = vpop.f32.mrb[90].mxu0  ;;  %6857 = vmatprep.subr.bf16.mxu1 %v2561_v3 }
 0xa7f   :  { %v2507_v56 = vadd.f32 %v6848_v16, %v9582_v53  ;;  %v2498_v52 = vpop.f32.mrb[91].mxu0  ;;  %6858 = vmatpush3.bf16.msra.mxu1 %v2561_v3  ;;  %v2536_v34 = vmax.f32 %v2504_v13, 0.0 }
 0xa80   :  { %v2499_v33 = vadd.f32 %v2498_v52, %v9583_v12  ;;  %6859 = vmatprep.subr.bf16.mxu1 %v2562_v42  ;;  %v2534_v30 = vmax.f32 %v2496_v19, 0.0  ;;  %v9592_v19 = vld [vmem:[#allocation77_spill] sm:$0xff] }
 0xa81   :  { %v2537_v25 = vmax.f32 %v2507_v56, 0.0  ;;  %v9593_v56 = vld [vmem:[#allocation75_spill] sm:$0xff] }
 0xa82   :  { %v2535_v22 = vmax.f32 %v2499_v33, 0.0  ;;  %v9594_v33 = vld [vmem:[#allocation76_spill] sm:$0xff] }
 0xa83   :  { %v2564_v44 = vpack.c.bf16 %v2537_v25, %v2536_v34  ;;  %6860 = vmatpush3.bf16.msra.mxu1 %v2562_v42 }
 0xa84   :  { %v2563_v36 = vpack.c.bf16 %v2535_v22, %v2534_v30  ;;  %v6851_v43 = vpop.f32.mrb[92].mxu0  ;;  %v9595_v30 = vld [vmem:[#allocation74_spill] sm:$0xff] }
 0xa85   :  { %v2520_v5 = vadd.f32 %v6851_v43, %v9584_v31  ;;  %v2511_v39 = vpop.f32.mrb[93].mxu0 }
 0xa86   :  { %v2512_v49 = vadd.f32 %v2511_v39, %v9585_v48  ;;  %v6852_v18 = vpop.f32.mrb[94].mxu0  ;;  %6861 = vmatprep.subr.bf16.mxu1 %v2563_v36 }
 0xa87   :  { %v2523_v47 = vadd.f32 %v6852_v18, %v9586_v45  ;;  %v2514_v1 = vpop.f32.mrb[95].mxu0  ;;  %6862 = vmatpush3.bf16.msra.mxu1 %v2563_v36  ;;  %v2540_v61 = vmax.f32 %v2520_v5, 0.0 }
 0xa88   :  { %v2515_v26 = vadd.f32 %v2514_v1, %v9587_v41  ;;  %6863 = vmatprep.subr.bf16.mxu1 %v2564_v44  ;;  %v2538_v20 = vmax.f32 %v2512_v49, 0.0  ;;  %v9596_v49 = vld [vmem:[#allocation81_spill] sm:$0xff] }
 0xa89   :  { %v2541_v46 = vmax.f32 %v2523_v47, 0.0  ;;  %v9597_v47 = vld [vmem:[#allocation79_spill] sm:$0xff] }
 0xa8a   :  { %v2539_v38 = vmax.f32 %v2515_v26, 0.0  ;;  %v9598_v26 = vld [vmem:[#allocation80_spill] sm:$0xff] }
 0xa8b   :  { %v2566_v0 = vpack.c.bf16 %v2541_v46, %v2540_v61  ;;  %6864 = vmatpush3.bf16.msra.mxu1 %v2564_v44 }
 0xa8c   :  { %v2565_v32 = vpack.c.bf16 %v2539_v38, %v2538_v20  ;;  %v9599_v20 = vld [vmem:[#allocation78_spill] sm:$0xff] }
 0xa8e   :  { %6865 = vmatprep.subr.bf16.mxu1 %v2565_v32 }
 0xa8f   :  { %6866 = vmatpush3.bf16.msra.mxu1 %v2565_v32 }
 0xa90   :  { %6867 = vmatprep.subr.bf16.mxu1 %v2566_v0 }
 0xa93   :  { %6868 = vmatpush3.bf16.msra.mxu1 %v2566_v0 }
 0xa96   :  { %6870 = vmatmul.mubr.bf16.vlgmr.msra.gmra.mrb[80].mxu1 %v7348_v60 }
 0xa97   :  { %6873 = vmatprep.mubr.bf16.mxu1 %v7349_v37 }
 0xa9e   :  { %6874 = vmatmul.mubr.bf16.gmra.mrb[84].mxu1 %v7350_v28 }
 0xa9f   :  { %6877 = vmatprep.mubr.bf16.mxu1 %v7351_v11 }
 0xaa6   :  { %6878 = vmatmul.mubr.bf16.gmra.mrb[88].mxu1 %v7352_v63 }
 0xaa7   :  { %6881 = vmatprep.mubr.bf16.mxu1 %v7353_v40  ;;  %v9600_v40 = vld [vmem:[#allocation85_spill] sm:$0xff] }
 0xaae   :  { %6882 = vmatmul.mubr.bf16.gmra.mrb[92].mxu1 %v7354_v55 }
 0xb69   :  { %v6871_v2 = vpop.f32.mrb[80].mxu1 }
 0xb6a   :  { %v2755_v62 = vadd.f32 %v6871_v2, %v9588_v9  ;;  %v2746_v6 = vpop.f32.mrb[81].mxu1  ;;  %v9601_v9 = vld [vmem:[#allocation83_spill] sm:$0xff] }
 0xb6b   :  { %v2747_v8 = vadd.f32 %v2746_v6, %v9589_v54  ;;  %v6872_v29 = vpop.f32.mrb[82].mxu1  ;;  %v9602_v54 = vld [vmem:[#allocation84_spill] sm:$0xff] }
 0xb6c   :  { %v2758_v24 = vadd.f32 %v6872_v29, %v9590_v4  ;;  %v2749_v14 = vpop.f32.mrb[83].mxu1  ;;  %v2811_v42 = vmax.f32 %v2755_v62, 0.0  ;;  %v9603_v4 = vld [vmem:[#allocation82_spill] sm:$0xff] }
 0xb6d   :  { %v2750_v58 = vadd.f32 %v2749_v14, %v9591_v15  ;;  %v2809_v57 = vmax.f32 %v2747_v8, 0.0 }
 0xb6e   :  { %v2812_v3 = vmax.f32 %v2758_v24, 0.0 }
 0xb6f   :  { %v2810_v50 = vmax.f32 %v2750_v58, 0.0 }
 0xb70   :  { %v2826_v13 = vpack.c.bf16 %v2812_v3, %v2811_v42 }
 0xb71   :  { %v2825_v17 = vpack.c.bf16 %v2810_v50, %v2809_v57  ;;  %v6875_v51 = vpop.f32.mrb[84].mxu1  ;;  %v7355_v50 = vld [vmem:[%s9410_s2 + $0x100] sm:$0xff]  }
 0xb72   :  { %v2771_v16 = vadd.f32 %v6875_v51, %v9592_v19  ;;  %v2762_v53 = vpop.f32.mrb[85].mxu1  ;;  %6933 = vmatprep.mubr.bf16.mxu1 %v7355_v50 }
 0xb73   :  { %v2763_v52 = vadd.f32 %v2762_v53, %v9593_v56  ;;  %v6876_v12 = vpop.f32.mrb[86].mxu1  ;;  %6901 = vmatprep.mubr.bf16.mxu0 %v2825_v17 }
 0xb74   :  { %v2774_v34 = vadd.f32 %v6876_v12, %v9594_v33  ;;  %v2765_v25 = vpop.f32.mrb[87].mxu1  ;;  %6902 = vmatmul.mubr.bf16.vlgmr.msra.gmra.mrb[96].mxu0 %v2826_v13  ;;  %v2815_v44 = vmax.f32 %v2771_v16, 0.0 }
 0xb75   :  { %v2766_v22 = vadd.f32 %v2765_v25, %v9595_v30  ;;  %v2813_v43 = vmax.f32 %v2763_v52, 0.0 }
 0xb76   :  { %v2816_v36 = vmax.f32 %v2774_v34, 0.0 }
 0xb77   :  { %v2814_v31 = vmax.f32 %v2766_v22, 0.0 }
 0xb78   :  { %v2828_v5 = vpack.c.bf16 %v2816_v36, %v2815_v44 }
 0xb79   :  { %v2827_v39 = vpack.c.bf16 %v2814_v31, %v2813_v43  ;;  %v6879_v48 = vpop.f32.mrb[88].mxu1 }
 0xb7a   :  { %v2787_v18 = vadd.f32 %v6879_v48, %v9596_v49  ;;  %v2778_v45 = vpop.f32.mrb[89].mxu1 }
 0xb7b   :  { %v2779_v1 = vadd.f32 %v2778_v45, %v9597_v47  ;;  %v6880_v41 = vpop.f32.mrb[90].mxu1  ;;  %6905 = vmatprep.mubr.bf16.mxu0 %v2827_v39  ;;  %v7356_v47 = vld [vmem:[%s9410_s2 + $0x108] sm:$0xff]  }
 0xb7c   :  { %v2790_v61 = vadd.f32 %v6880_v41, %v9598_v26  ;;  %v2781_v46 = vpop.f32.mrb[91].mxu1  ;;  %6906 = vmatmul.mubr.bf16.gmra.mrb[100].mxu0 %v2828_v5  ;;  %v2819_v0 = vmax.f32 %v2787_v18, 0.0  ;;  %v9098_v41 = vld [vmem:[%s9408_s0] sm:$0xff]   ;;  %v9105_v26 = vld [vmem:[%s9408_s0 + $0x8] sm:$0xff]  }
 0xb7d   :  { %v2782_v38 = vadd.f32 %v2781_v46, %v9599_v20  ;;  %v2817_v60 = vmax.f32 %v2779_v1, 0.0  ;;  %v7357_v1 = vld [vmem:[%s9410_s2 + $0x110] sm:$0xff]   ;;  %v7359_v46 = vld [vmem:[%s9410_s2 + $0x120] sm:$0xff]  }
 0xb7e   :  { %v2820_v32 = vmax.f32 %v2790_v61, 0.0  ;;  %v7358_v61 = vld [vmem:[%s9410_s2 + $0x118] sm:$0xff]   ;;  %v9118_v20 = vld [vmem:[%s9408_s0 + $0x10] sm:$0xff]  }
 0xb7f   :  { %v2818_v37 = vmax.f32 %v2782_v38, 0.0  ;;  %v9125_v38 = vld [vmem:[%s9408_s0 + $0x18] sm:$0xff]  }
 0xb80   :  { %v2830_v28 = vpack.c.bf16 %v2820_v32, %v2819_v0  ;;  %v7360_v0 = vld [vmem:[%s9410_s2 + $0x128] sm:$0xff]   ;;  %v7361_v32 = vld [vmem:[%s9410_s2 + $0x130] sm:$0xff]  }
 0xb81   :  { %v2829_v11 = vpack.c.bf16 %v2818_v37, %v2817_v60  ;;  %v6883_v63 = vpop.f32.mrb[92].mxu1  ;;  %v7362_v60 = vld [vmem:[%s9410_s2 + $0x138] sm:$0xff]  }
 0xb82   :  { %v2803_v55 = vadd.f32 %v6883_v63, %v9600_v40  ;;  %v2794_v2 = vpop.f32.mrb[93].mxu1  ;;  %v9605_v40 = vld [vmem:[#allocation87_spill] sm:$0xff] }
 0xb83   :  { %v2795_v62 = vadd.f32 %v2794_v2, %v9601_v9  ;;  %v6884_v6 = vpop.f32.mrb[94].mxu1  ;;  %6909 = vmatprep.mubr.bf16.mxu0 %v2829_v11  ;;  %v9606_v2 = vld [vmem:[#allocation88_spill] sm:$0xff] }
 0xb84   :  { %v2806_v8 = vadd.f32 %v6884_v6, %v9602_v54  ;;  %v2797_v29 = vpop.f32.mrb[95].mxu1  ;;  %6910 = vmatmul.mubr.bf16.gmra.mrb[104].mxu0 %v2830_v28  ;;  %v2823_v14 = vmax.f32 %v2803_v55, 0.0  ;;  %v9604_v28 = vld [vmem:[#allocation89_spill] sm:$0xff] }
 0xb85   :  { %v2798_v24 = vadd.f32 %v2797_v29, %v9603_v4  ;;  %v2821_v58 = vmax.f32 %v2795_v62, 0.0 }
 0xb86   :  { %v2824_v15 = vmax.f32 %v2806_v8, 0.0 }
 0xb87   :  { %v2822_v42 = vmax.f32 %v2798_v24, 0.0 }
 0xb88   :  { %v2832_v3 = vpack.c.bf16 %v2824_v15, %v2823_v14  ;;  %v9608_v15 = vld [vmem:[#allocation93_spill] sm:$0xff] }
 0xb89   :  { %v2831_v57 = vpack.c.bf16 %v2822_v42, %v2821_v58 }
 0xb8b   :  { %6913 = vmatprep.mubr.bf16.mxu0 %v2831_v57 }
 0xb8c   :  { %6914 = vmatmul.mubr.bf16.gmra.mrb[108].mxu0 %v2832_v3  ;;  %v9609_v3 = vld [vmem:[#allocation91_spill] sm:$0xff] }
 0xc47   :  { %v6903_v13 = vpop.f32.mrb[96].mxu0 }
 0xc48   :  { %v2867_v17 = vpop.f32.mrb[97].mxu0 }
 0xc49   :  { %v6904_v51 = vpop.f32.mrb[98].mxu0 }
 0xc4a   :  { %v2948_v19 = vpack.c.bf16 %v6904_v51, %v6903_v13  ;;  %v2870_v16 = vpop.f32.mrb[99].mxu0  ;;  %v9610_v13 = vld [vmem:[#allocation92_spill] sm:$0xff] }
 0xc4b   :  { %v2947_v53 = vpack.c.bf16 %v2870_v16, %v2867_v17 }
 0xc4d   :  { %6917 = vmatprep.subr.bf16.mxu1 %v2947_v53 }
 0xc4e   :  { %6918 = vmatpush3.bf16.msra.mxu1 %v2947_v53 }
 0xc4f   :  { %v6907_v56 = vpop.f32.mrb[100].mxu0  ;;  %6919 = vmatprep.subr.bf16.mxu1 %v2948_v19 }
 0xc50   :  { %v2883_v52 = vpop.f32.mrb[101].mxu0 }
 0xc51   :  { %v6908_v12 = vpop.f32.mrb[102].mxu0 }
 0xc52   :  { %v2950_v33 = vpack.c.bf16 %v6908_v12, %v6907_v56  ;;  %v2886_v34 = vpop.f32.mrb[103].mxu0  ;;  %6920 = vmatpush3.bf16.msra.mxu1 %v2948_v19  ;;  %v9611_v19 = vld [vmem:[#allocation90_spill] sm:$0xff] }
 0xc53   :  { %v2949_v25 = vpack.c.bf16 %v2886_v34, %v2883_v52 }
 0xc55   :  { %6921 = vmatprep.subr.bf16.mxu1 %v2949_v25 }
 0xc56   :  { %6922 = vmatpush3.bf16.msra.mxu1 %v2949_v25 }
 0xc57   :  { %v6911_v30 = vpop.f32.mrb[104].mxu0  ;;  %6923 = vmatprep.subr.bf16.mxu1 %v2950_v33 }
 0xc58   :  { %v2899_v22 = vpop.f32.mrb[105].mxu0 }
 0xc59   :  { %v6912_v44 = vpop.f32.mrb[106].mxu0 }
 0xc5a   :  { %v2952_v36 = vpack.c.bf16 %v6912_v44, %v6911_v30  ;;  %v2902_v43 = vpop.f32.mrb[107].mxu0  ;;  %6924 = vmatpush3.bf16.msra.mxu1 %v2950_v33  ;;  %v9612_v30 = vld [vmem:[#allocation97_spill] sm:$0xff] }
 0xc5b   :  { %v2951_v31 = vpack.c.bf16 %v2902_v43, %v2899_v22 }
 0xc5d   :  { %6925 = vmatprep.subr.bf16.mxu1 %v2951_v31 }
 0xc5e   :  { %6926 = vmatpush3.bf16.msra.mxu1 %v2951_v31 }
 0xc5f   :  { %v6915_v5 = vpop.f32.mrb[108].mxu0  ;;  %6927 = vmatprep.subr.bf16.mxu1 %v2952_v36 }
 0xc60   :  { %v2915_v39 = vpop.f32.mrb[109].mxu0 }
 0xc61   :  { %v6916_v48 = vpop.f32.mrb[110].mxu0 }
 0xc62   :  { %v2954_v49 = vpack.c.bf16 %v6916_v48, %v6915_v5  ;;  %v2918_v18 = vpop.f32.mrb[111].mxu0  ;;  %6928 = vmatpush3.bf16.msra.mxu1 %v2952_v36  ;;  %v9613_v36 = vld [vmem:[#allocation95_spill] sm:$0xff]  ;;  %v9614_v5 = vld [vmem:[#allocation96_spill] sm:$0xff] }
 0xc63   :  { %v2953_v45 = vpack.c.bf16 %v2918_v18, %v2915_v39 }
 0xc65   :  { %6929 = vmatprep.subr.bf16.mxu1 %v2953_v45 }
 0xc66   :  { %6930 = vmatpush3.bf16.msra.mxu1 %v2953_v45 }
 0xc67   :  { %6931 = vmatprep.subr.bf16.mxu1 %v2954_v49 }
 0xc6a   :  { %6932 = vmatpush3.bf16.msra.mxu1 %v2954_v49  ;;  %v9615_v49 = vld [vmem:[#allocation94_spill] sm:$0xff] }
 0xc6b   :  { %6981 = vmatprep.subr.bf16.mxu1 %v9098_v41 }
 0xc6d   :  { %6934 = vmatmul.mubr.bf16.vlgmr.msra.gmra.mrb[96].mxu1 %v7356_v47 }
 0xc6e   :  { %6937 = vmatprep.mubr.bf16.mxu1 %v7357_v1  ;;  %6982 = vmatpush3.bf16.msra.mxu1 %v9098_v41 }
 0xc6f   :  { %6983 = vmatprep.subr.bf16.mxu1 %v9105_v26 }
 0xc72   :  { %6984 = vmatpush3.bf16.msra.mxu1 %v9105_v26 }
 0xc73   :  { %6985 = vmatprep.subr.bf16.mxu1 %v9118_v20 }
 0xc75   :  { %6938 = vmatmul.mubr.bf16.gmra.mrb[100].mxu1 %v7358_v61 }
 0xc76   :  { %6941 = vmatprep.mubr.bf16.mxu1 %v7359_v46  ;;  %6986 = vmatpush3.bf16.msra.mxu1 %v9118_v20 }
 0xc77   :  { %6987 = vmatprep.subr.bf16.mxu1 %v9125_v38 }
 0xc7a   :  { %6988 = vmatpush3.bf16.msra.mxu1 %v9125_v38 }
 0xc7b   :  { %6989 = vmatprep.subr.bf16.mxu1 %v8906_v59 }
 0xc7d   :  { %6942 = vmatmul.mubr.bf16.gmra.mrb[104].mxu1 %v7360_v0 }
 0xc7e   :  { %6945 = vmatprep.mubr.bf16.mxu1 %v7361_v32  ;;  %6990 = vmatpush3.bf16.msra.mxu1 %v8906_v59  ;;  %v7363_v59 = vld [vmem:[%s9412_s4 + $0x100] sm:$0xff]  }
 0xc7f   :  { %6991 = vmatprep.subr.bf16.mxu1 %v8913_v35  ;;  %6965 = vmatprep.mubr.bf16.mxu0 %v7363_v59 }
 0xc82   :  { %6992 = vmatpush3.bf16.msra.mxu1 %v8913_v35 }
 0xc83   :  { %6993 = vmatprep.subr.bf16.mxu1 %v8923_v27 }
 0xc85   :  { %6946 = vmatmul.mubr.bf16.gmra.mrb[108].mxu1 %v7362_v60  ;;  %v9616_v60 = vld [vmem:[#allocation101_spill] sm:$0xff] }
 0xc86   :  { %6994 = vmatpush3.bf16.msra.mxu1 %v8923_v27  ;;  %v9607_v27 = vld [vmem:[#allocation86_spill] sm:$0xff] }
 0xc87   :  { %6995 = vmatprep.subr.bf16.mxu1 %v8930_v7 }
 0xc8a   :  { %6996 = vmatpush3.bf16.msra.mxu1 %v8930_v7 }
 0xd40   :  { %v6935_v37 = vpop.f32.mrb[96].mxu1 }
 0xd41   :  { %v3143_v11 = vadd.f32 %v6935_v37, %v9604_v28  ;;  %v3134_v63 = vpop.f32.mrb[97].mxu1  ;;  %v9617_v28 = vld [vmem:[#allocation99_spill] sm:$0xff] }
 0xd42   :  { %v3135_v35 = vadd.f32 %v3134_v63, %v9605_v40  ;;  %v6936_v55 = vpop.f32.mrb[98].mxu1  ;;  %v9618_v40 = vld [vmem:[#allocation100_spill] sm:$0xff] }
 0xd43   :  { %v3146_v9 = vadd.f32 %v6936_v55, %v9606_v2  ;;  %v3137_v62 = vpop.f32.mrb[99].mxu1  ;;  %v3199_v54 = vmax.f32 %v3143_v11, 0.0  ;;  %v9619_v2 = vld [vmem:[#allocation98_spill] sm:$0xff] }
 0xd44   :  { %v3138_v6 = vadd.f32 %v3137_v62, %v9607_v27  ;;  %v3197_v7 = vmax.f32 %v3135_v35, 0.0 }
 0xd45   :  { %v3200_v8 = vmax.f32 %v3146_v9, 0.0 }
 0xd46   :  { %v3198_v29 = vmax.f32 %v3138_v6, 0.0 }
 0xd47   :  { %v3231_v4 = vpack.c.bf16 %v3200_v8, %v3199_v54 }
 0xd48   :  { %v3230_v24 = vpack.c.bf16 %v3198_v29, %v3197_v7  ;;  %v6939_v14 = vpop.f32.mrb[100].mxu1  ;;  %v7364_v29 = vld [vmem:[%s9412_s4 + $0x108] sm:$0xff]  }
 0xd49   :  { %v3159_v58 = vadd.f32 %v6939_v14, %v9608_v15  ;;  %v3150_v42 = vpop.f32.mrb[101].mxu1  ;;  %v7367_v14 = vld [vmem:[%s9412_s4 + $0x120] sm:$0xff]   ;;  %v7368_v15 = vld [vmem:[%s9412_s4 + $0x128] sm:$0xff]  }
 0xd4a   :  { %v3151_v57 = vadd.f32 %v3150_v42, %v9609_v3  ;;  %v6940_v50 = vpop.f32.mrb[102].mxu1  ;;  %6949 = vmatprep.subr.bf16.mxu0 %v3230_v24  ;;  %v7370_v42 = vld [vmem:[%s9412_s4 + $0x138] sm:$0xff]  }
 0xd4b   :  { %v3162_v17 = vadd.f32 %v6940_v50, %v9610_v13  ;;  %v3153_v51 = vpop.f32.mrb[103].mxu1  ;;  %6950 = vmatpush3.bf16.msra.mxu0 %v3230_v24  ;;  %v3203_v53 = vmax.f32 %v3159_v58, 0.0  ;;  %v7366_v24 = vld [vmem:[%s9412_s4 + $0x118] sm:$0xff]   ;;  %v7369_v58 = vld [vmem:[%s9412_s4 + $0x130] sm:$0xff]  }
 0xd4c   :  { %v3154_v16 = vadd.f32 %v3153_v51, %v9611_v19  ;;  %6951 = vmatprep.subr.bf16.mxu0 %v3231_v4  ;;  %v3201_v52 = vmax.f32 %v3151_v57, 0.0  ;;  %v9620_v57 = vld [vmem:[#allocation105_spill] sm:$0xff] }
 0xd4d   :  { %v3204_v56 = vmax.f32 %v3162_v17, 0.0  ;;  %v9621_v17 = vld [vmem:[#allocation103_spill] sm:$0xff] }
 0xd4e   :  { %v3202_v12 = vmax.f32 %v3154_v16, 0.0  ;;  %v9622_v16 = vld [vmem:[#allocation104_spill] sm:$0xff] }
 0xd4f   :  { %v3233_v33 = vpack.c.bf16 %v3204_v56, %v3203_v53  ;;  %6952 = vmatpush3.bf16.msra.mxu0 %v3231_v4  ;;  %v7365_v4 = vld [vmem:[%s9412_s4 + $0x110] sm:$0xff]  }
 0xd50   :  { %v3232_v34 = vpack.c.bf16 %v3202_v12, %v3201_v52  ;;  %v6943_v25 = vpop.f32.mrb[104].mxu1  ;;  %v9623_v52 = vld [vmem:[#allocation102_spill] sm:$0xff] }
 0xd51   :  { %v3175_v22 = vadd.f32 %v6943_v25, %v9612_v30  ;;  %v3166_v44 = vpop.f32.mrb[105].mxu1 }
 0xd52   :  { %v3167_v43 = vadd.f32 %v3166_v44, %v9613_v36  ;;  %v6944_v31 = vpop.f32.mrb[106].mxu1  ;;  %6953 = vmatprep.subr.bf16.mxu0 %v3232_v34 }
 0xd53   :  { %v3178_v39 = vadd.f32 %v6944_v31, %v9614_v5  ;;  %v3169_v48 = vpop.f32.mrb[107].mxu1  ;;  %6954 = vmatpush3.bf16.msra.mxu0 %v3232_v34  ;;  %v3207_v45 = vmax.f32 %v3175_v22, 0.0 }
 0xd54   :  { %v3170_v18 = vadd.f32 %v3169_v48, %v9615_v49  ;;  %6955 = vmatprep.subr.bf16.mxu0 %v3233_v33  ;;  %v3205_v1 = vmax.f32 %v3167_v43, 0.0  ;;  %v9624_v43 = vld [vmem:[#allocation109_spill] sm:$0xff] }
 0xd55   :  { %v3208_v47 = vmax.f32 %v3178_v39, 0.0  ;;  %v9625_v39 = vld [vmem:[#allocation107_spill] sm:$0xff] }
 0xd56   :  { %v3206_v61 = vmax.f32 %v3170_v18, 0.0  ;;  %v9626_v18 = vld [vmem:[#allocation108_spill] sm:$0xff] }
 0xd57   :  { %v3235_v46 = vpack.c.bf16 %v3208_v47, %v3207_v45  ;;  %6956 = vmatpush3.bf16.msra.mxu0 %v3233_v33 }
 0xd58   :  { %v3234_v0 = vpack.c.bf16 %v3206_v61, %v3205_v1  ;;  %v6947_v32 = vpop.f32.mrb[108].mxu1  ;;  %v9627_v1 = vld [vmem:[#allocation106_spill] sm:$0xff] }
 0xd59   :  { %v3191_v59 = vadd.f32 %v6947_v32, %v9616_v60  ;;  %v3182_v37 = vpop.f32.mrb[109].mxu1 }
 0xd5a   :  { %v3183_v11 = vadd.f32 %v3182_v37, %v9617_v28  ;;  %v6948_v63 = vpop.f32.mrb[110].mxu1  ;;  %6957 = vmatprep.subr.bf16.mxu0 %v3234_v0 }
 0xd5b   :  { %v3194_v35 = vadd.f32 %v6948_v63, %v9618_v40  ;;  %v3185_v55 = vpop.f32.mrb[111].mxu1  ;;  %6958 = vmatpush3.bf16.msra.mxu0 %v3234_v0  ;;  %v3211_v62 = vmax.f32 %v3191_v59, 0.0  ;;  %v9628_v40 = vld [vmem:[#allocation111_spill] sm:$0xff] }
 0xd5c   :  { %v3186_v9 = vadd.f32 %v3185_v55, %v9619_v2  ;;  %6959 = vmatprep.subr.bf16.mxu0 %v3235_v46  ;;  %v3209_v6 = vmax.f32 %v3183_v11, 0.0  ;;  %v9629_v2 = vld [vmem:[#allocation112_spill] sm:$0xff] }
 0xd5d   :  { %v3212_v27 = vmax.f32 %v3194_v35, 0.0 }
 0xd5e   :  { %v3210_v54 = vmax.f32 %v3186_v9, 0.0 }
 0xd5f   :  { %v3237_v8 = vpack.c.bf16 %v3212_v27, %v3211_v62  ;;  %6960 = vmatpush3.bf16.msra.mxu0 %v3235_v46  ;;  %v9630_v27 = vld [vmem:[#allocation110_spill] sm:$0xff] }
 0xd60   :  { %v3236_v7 = vpack.c.bf16 %v3210_v54, %v3209_v6 }
 0xd62   :  { %6961 = vmatprep.subr.bf16.mxu0 %v3236_v7 }
 0xd63   :  { %6962 = vmatpush3.bf16.msra.mxu0 %v3236_v7 }
 0xd64   :  { %6963 = vmatprep.subr.bf16.mxu0 %v3237_v8 }
 0xd67   :  { %6964 = vmatpush3.bf16.msra.mxu0 %v3237_v8 }
 0xd6a   :  { %6966 = vmatmul.mubr.bf16.vlgmr.msra.gmra.mrb[112].mxu0 %v7364_v29 }
 0xd6b   :  { %6969 = vmatprep.mubr.bf16.mxu0 %v7365_v4 }
 0xd72   :  { %6970 = vmatmul.mubr.bf16.gmra.mrb[116].mxu0 %v7366_v24  ;;  %v3328_v24 = vpop.permute.xlu0 %3327 }
 0xd73   :  { %6973 = vmatprep.mubr.bf16.mxu0 %v7367_v14 }
 0xd7a   :  { %6974 = vmatmul.mubr.bf16.gmra.mrb[120].mxu0 %v7368_v15 }
 0xd7b   :  { %6977 = vmatprep.mubr.bf16.mxu0 %v7369_v58 }
 0xd82   :  { %6978 = vmatmul.mubr.bf16.gmra.mrb[124].mxu0 %v7370_v42  ;;  %v3333_v42 = vpop.permute.xlu1 %3332 }
 0xe3d   :  { %v6967_v3 = vpop.f32.mrb[112].mxu0 }
 0xe3e   :  { %v3426_v50 = vadd.f32 %v6967_v3, %v9620_v57  ;;  %v3417_v13 = vpop.f32.mrb[113].mxu0 }
 0xe3f   :  { %v3418_v51 = vadd.f32 %v3417_v13, %v9621_v17  ;;  %v6968_v19 = vpop.f32.mrb[114].mxu0 }
 0xe40   :  { %v3429_v53 = vadd.f32 %v6968_v19, %v9622_v16  ;;  %v3420_v56 = vpop.f32.mrb[115].mxu0  ;;  %v3482_v33 = vmax.f32 %v3426_v50, 0.0 }
 0xe41   :  { %v3421_v12 = vadd.f32 %v3420_v56, %v9623_v52  ;;  %v3480_v25 = vmax.f32 %v3418_v51, 0.0 }
 0xe42   :  { %v3483_v34 = vmax.f32 %v3429_v53, 0.0 }
 0xe43   :  { %v3481_v30 = vmax.f32 %v3421_v12, 0.0  ;;  %v7371_v12 = vld [vmem:[%s9410_s2 + $0x140] sm:$0xff]  }
 0xe44   :  { %v3497_v22 = vpack.c.bf16 %v3483_v34, %v3482_v33  ;;  %7029 = vmatprep.mubr.bf16.mxu0 %v7371_v12 }
 0xe45   :  { %v3496_v44 = vpack.c.bf16 %v3481_v30, %v3480_v25  ;;  %v6971_v36 = vpop.f32.mrb[116].mxu0 }
 0xe46   :  { %v3442_v31 = vadd.f32 %v6971_v36, %v9624_v43  ;;  %v3433_v5 = vpop.f32.mrb[117].mxu0 }
 0xe47   :  { %v3434_v48 = vadd.f32 %v3433_v5, %v9625_v39  ;;  %v6972_v49 = vpop.f32.mrb[118].mxu0  ;;  %6997 = vmatprep.mubr.bf16.mxu1 %v3496_v44 }
 0xe48   :  { %v3445_v45 = vadd.f32 %v6972_v49, %v9626_v18  ;;  %v3436_v47 = vpop.f32.mrb[119].mxu0  ;;  %6998 = vmatmul.mubr.bf16.vlgmr.msra.gmra.mrb[112].mxu1 %v3497_v22  ;;  %v3486_v46 = vmax.f32 %v3442_v31, 0.0 }
 0xe49   :  { %v3437_v61 = vadd.f32 %v3436_v47, %v9627_v1  ;;  %v3484_v32 = vmax.f32 %v3434_v48, 0.0 }
 0xe4a   :  { %v3487_v0 = vmax.f32 %v3445_v45, 0.0 }
 0xe4b   :  { %v3485_v60 = vmax.f32 %v3437_v61, 0.0 }
 0xe4c   :  { %v3499_v59 = vpack.c.bf16 %v3487_v0, %v3486_v46 }
 0xe4d   :  { %v3498_v37 = vpack.c.bf16 %v3485_v60, %v3484_v32  ;;  %v6975_v28 = vpop.f32.mrb[120].mxu0 }
 0xe4e   :  { %v3458_v11 = vadd.f32 %v6975_v28, %v8697_v21  ;;  %v3449_v63 = vpop.f32.mrb[121].mxu0  ;;  %v7374_v28 = vld [vmem:[%s9410_s2 + $0x158] sm:$0xff]  }
 0xe4f   :  { %v3450_v35 = vadd.f32 %v3449_v63, %v9628_v40  ;;  %v6976_v55 = vpop.f32.mrb[122].mxu0  ;;  %7001 = vmatprep.mubr.bf16.mxu1 %v3498_v37  ;;  %v7373_v37 = vld [vmem:[%s9410_s2 + $0x150] sm:$0xff]   ;;  %v7376_v63 = vld [vmem:[%s9410_s2 + $0x168] sm:$0xff]  }
 0xe50   :  { %v3461_v9 = vadd.f32 %v6976_v55, %v9629_v2  ;;  %v3452_v62 = vpop.f32.mrb[123].mxu0  ;;  %7002 = vmatmul.mubr.bf16.gmra.mrb[116].mxu1 %v3499_v59  ;;  %v3490_v54 = vmax.f32 %v3458_v11, 0.0  ;;  %v7372_v59 = vld [vmem:[%s9410_s2 + $0x148] sm:$0xff]   ;;  %v7375_v11 = vld [vmem:[%s9410_s2 + $0x160] sm:$0xff]   ;;  %v7377_v40 = vld [vmem:[%s9410_s2 + $0x170] sm:$0xff]  }
 0xe51   :  { %v3453_v6 = vadd.f32 %v3452_v62, %v9630_v27  ;;  %v3488_v7 = vmax.f32 %v3450_v35, 0.0  ;;  %v9232_v35 = vld [vmem:[%s9408_s0 + $0x20] sm:$0xff]   ;;  %v9239_v55 = vld [vmem:[%s9408_s0 + $0x28] sm:$0xff]   ;;  %v7378_v2 = vld [vmem:[%s9410_s2 + $0x178] sm:$0xff]  }
 0xe52   :  { %v3491_v8 = vmax.f32 %v3461_v9, 0.0  ;;  %v9249_v9 = vld [vmem:[%s9408_s0 + $0x30] sm:$0xff]   ;;  %v9256_v62 = vld [vmem:[%s9408_s0 + $0x38] sm:$0xff]   ;;  %v7379_v27 = vld [vmem:[%s9412_s4 + $0x140] sm:$0xff]  }
 0xe53   :  { %v3489_v29 = vmax.f32 %v3453_v6, 0.0  ;;  %v3646_v6 = vpop.permute.xlu0 %3645 }
 0xe54   :  { %v3501_v4 = vpack.c.bf16 %v3491_v8, %v3490_v54  ;;  %v3651_v54 = vpop.permute.xlu1 %3650 }
 0xe55   :  { %v3500_v14 = vpack.c.bf16 %v3489_v29, %v3488_v7  ;;  %v6979_v15 = vpop.f32.mrb[124].mxu0 }
 0xe56   :  { %v3474_v21 = vadd.f32 %v6979_v15, %v3328_v24  ;;  %v3465_v58 = vpop.f32.mrb[125].mxu0 }
 0xe57   :  { %v3466_v3 = vadd.f32 %v3465_v58, %v8711_v23  ;;  %v6980_v57 = vpop.f32.mrb[126].mxu0  ;;  %7005 = vmatprep.mubr.bf16.mxu1 %v3500_v14  ;;  %v3656_v8 = vpop.permute.xlu0 %3655 }
 0xe58   :  { %v3477_v50 = vadd.f32 %v6980_v57, %v3333_v42  ;;  %v3468_v13 = vpop.f32.mrb[127].mxu0  ;;  %7006 = vmatmul.mubr.bf16.gmra.mrb[120].mxu1 %v3501_v4  ;;  %v3494_v51 = vmax.f32 %v3474_v21, 0.0  ;;  %v3661_v7 = vpop.permute.xlu1 %3660 }
 0xe59   :  { %v3469_v17 = vadd.f32 %v3468_v13, %v8709_v10  ;;  %v3492_v16 = vmax.f32 %v3466_v3, 0.0 }
 0xe5a   :  { %v3495_v19 = vmax.f32 %v3477_v50, 0.0 }
 0xe5b   :  { %v3493_v53 = vmax.f32 %v3469_v17, 0.0  ;;  %v3666_v29 = vpop.permute.xlu0 %3665 }
 0xe5c   :  { %v3503_v56 = vpack.c.bf16 %v3495_v19, %v3494_v51  ;;  %v3671_v4 = vpop.permute.xlu1 %3670 }
 0xe5d   :  { %v3502_v52 = vpack.c.bf16 %v3493_v53, %v3492_v16 }
 0xe5f   :  { %7009 = vmatprep.mubr.bf16.mxu1 %v3502_v52  ;;  %v3676_v24 = vpop.permute.xlu0 %3675 }
 0xe60   :  { %7010 = vmatmul.mubr.bf16.gmra.mrb[124].mxu1 %v3503_v56  ;;  %v3681_v58 = vpop.permute.xlu1 %3680 }
 0xe61   :  { %7061 = vmatprep.mubr.bf16.mxu1 %v7379_v27 }
 0xe63   :  { %v3686_v19 = vpop.permute.xlu0 %3685 }
 0xe64   :  { %v3691_v52 = vpop.permute.xlu1 %3690 }
 0xf1b   :  { %v6999_v23 = vpop.f32.mrb[112].mxu1 }
 0xf1c   :  { %v3538_v33 = vpop.f32.mrb[113].mxu1 }
 0xf1d   :  { %v7000_v34 = vpop.f32.mrb[114].mxu1 }
 0xf1e   :  { %v3619_v25 = vpack.c.bf16 %v7000_v34, %v6999_v23  ;;  %v3541_v30 = vpop.f32.mrb[115].mxu1 }
 0xf1f   :  { %v3618_v22 = vpack.c.bf16 %v3541_v30, %v3538_v33 }
 0xf21   :  { %7013 = vmatprep.subr.bf16.mxu0 %v3618_v22 }
 0xf22   :  { %7014 = vmatpush3.bf16.msra.mxu0 %v3618_v22 }
 0xf23   :  { %v7003_v10 = vpop.f32.mrb[116].mxu1  ;;  %7015 = vmatprep.subr.bf16.mxu0 %v3619_v25 }
 0xf24   :  { %v3554_v44 = vpop.f32.mrb[117].mxu1 }
 0xf25   :  { %v7004_v36 = vpop.f32.mrb[118].mxu1 }
 0xf26   :  { %v3621_v43 = vpack.c.bf16 %v7004_v36, %v7003_v10  ;;  %v3557_v31 = vpop.f32.mrb[119].mxu1  ;;  %7016 = vmatpush3.bf16.msra.mxu0 %v3619_v25 }
 0xf27   :  { %v3620_v5 = vpack.c.bf16 %v3557_v31, %v3554_v44  ;;  %v3696_v44 = vpop.permute.xlu0 %3695 }
 0xf29   :  { %7017 = vmatprep.subr.bf16.mxu0 %v3620_v5 }
 0xf2a   :  { %7018 = vmatpush3.bf16.msra.mxu0 %v3620_v5  ;;  %v3701_v5 = vpop.permute.xlu1 %3700 }
 0xf2b   :  { %v7007_v39 = vpop.f32.mrb[120].mxu1  ;;  %7019 = vmatprep.subr.bf16.mxu0 %v3621_v43 }
 0xf2c   :  { %v3570_v48 = vpop.f32.mrb[121].mxu1 }
 0xf2d   :  { %v7008_v49 = vpop.f32.mrb[122].mxu1 }
 0xf2e   :  { %v3623_v18 = vpack.c.bf16 %v7008_v49, %v7007_v39  ;;  %v3573_v45 = vpop.f32.mrb[123].mxu1  ;;  %7020 = vmatpush3.bf16.msra.mxu0 %v3621_v43 }
 0xf2f   :  { %v3622_v47 = vpack.c.bf16 %v3573_v45, %v3570_v48 }
 0xf31   :  { %7021 = vmatprep.subr.bf16.mxu0 %v3622_v47 }
 0xf32   :  { %7022 = vmatpush3.bf16.msra.mxu0 %v3622_v47 }
 0xf33   :  { %v7011_v1 = vpop.f32.mrb[124].mxu1  ;;  %7023 = vmatprep.subr.bf16.mxu0 %v3623_v18 }
 0xf34   :  { %v3586_v61 = vpop.f32.mrb[125].mxu1 }
 0xf35   :  { %v7012_v46 = vpop.f32.mrb[126].mxu1 }
 0xf36   :  { %v3625_v0 = vpack.c.bf16 %v7012_v46, %v7011_v1  ;;  %v3589_v32 = vpop.f32.mrb[127].mxu1  ;;  %7024 = vmatpush3.bf16.msra.mxu0 %v3623_v18 }
 0xf37   :  { %v3624_v60 = vpack.c.bf16 %v3589_v32, %v3586_v61  ;;  %v3706_v61 = vpop.permute.xlu0 %3705 }
 0xf39   :  { %7025 = vmatprep.subr.bf16.mxu0 %v3624_v60 }
 0xf3a   :  { %7026 = vmatpush3.bf16.msra.mxu0 %v3624_v60 }
 0xf3b   :  { %7027 = vmatprep.subr.bf16.mxu0 %v3625_v0  ;;  %v3716_v27 = vpop.permute.xlu0 %3715 }
 0xf3e   :  { %7028 = vmatpush3.bf16.msra.mxu0 %v3625_v0 }
 0xf3f   :  { %7077 = vmatprep.subr.bf16.mxu0 %v9098_v41 }
 0xf41   :  { %7030 = vmatmul.mubr.bf16.vlgmr.msra.gmra.mrb[128].mxu0 %v7372_v59  ;;  %v3711_v59 = vpop.permute.xlu1 %3710 }
 0xf42   :  { %7033 = vmatprep.mubr.bf16.mxu0 %v7373_v37  ;;  %7078 = vmatpush3.bf16.msra.mxu0 %v9098_v41 }
 0xf43   :  { %7079 = vmatprep.subr.bf16.mxu0 %v9105_v26 }
 0xf46   :  { %7080 = vmatpush3.bf16.msra.mxu0 %v9105_v26 }
 0xf47   :  { %7081 = vmatprep.subr.bf16.mxu0 %v9118_v20 }
 0xf49   :  { %7034 = vmatmul.mubr.bf16.gmra.mrb[132].mxu0 %v7374_v28 }
 0xf4a   :  { %7037 = vmatprep.mubr.bf16.mxu0 %v7375_v11  ;;  %7082 = vmatpush3.bf16.msra.mxu0 %v9118_v20 }
 0xf4b   :  { %7083 = vmatprep.subr.bf16.mxu0 %v9125_v38 }
 0xf4e   :  { %7084 = vmatpush3.bf16.msra.mxu0 %v9125_v38 }
 0xf4f   :  { %7085 = vmatprep.subr.bf16.mxu0 %v9232_v35 }
 0xf51   :  { %7038 = vmatmul.mubr.bf16.gmra.mrb[136].mxu0 %v7376_v63 }
 0xf52   :  { %7041 = vmatprep.mubr.bf16.mxu0 %v7377_v40  ;;  %7086 = vmatpush3.bf16.msra.mxu0 %v9232_v35 }
 0xf53   :  { %7087 = vmatprep.subr.bf16.mxu0 %v9239_v55 }
 0xf56   :  { %7088 = vmatpush3.bf16.msra.mxu0 %v9239_v55 }
 0xf57   :  { %7089 = vmatprep.subr.bf16.mxu0 %v9249_v9 }
 0xf59   :  { %7042 = vmatmul.mubr.bf16.gmra.mrb[140].mxu0 %v7378_v2 }
 0xf5a   :  { %7090 = vmatpush3.bf16.msra.mxu0 %v9249_v9 }
 0xf5b   :  { %7091 = vmatprep.subr.bf16.mxu0 %v9256_v62 }
 0xf5e   :  { %7092 = vmatpush3.bf16.msra.mxu0 %v9256_v62 }
0x1014   :  { %v7031_v14 = vpop.f32.mrb[128].mxu0 }
0x1015   :  { %v3814_v15 = vadd.f32 %v7031_v14, %v3656_v8  ;;  %v3805_v21 = vpop.f32.mrb[129].mxu0 }
0x1016   :  { %v3806_v42 = vadd.f32 %v3805_v21, %v3646_v6  ;;  %v7032_v3 = vpop.f32.mrb[130].mxu0 }
0x1017   :  { %v3817_v57 = vadd.f32 %v7032_v3, %v3661_v7  ;;  %v3808_v50 = vpop.f32.mrb[131].mxu0  ;;  %v3870_v17 = vmax.f32 %v3814_v15, 0.0 }
0x1018   :  { %v3809_v13 = vadd.f32 %v3808_v50, %v3651_v54  ;;  %v3868_v16 = vmax.f32 %v3806_v42, 0.0 }
0x1019   :  { %v3871_v51 = vmax.f32 %v3817_v57, 0.0 }
0x101a   :  { %v3869_v53 = vmax.f32 %v3809_v13, 0.0 }
0x101b   :  { %v3902_v56 = vpack.c.bf16 %v3871_v51, %v3870_v17  ;;  %v7380_v17 = vld [vmem:[%s9412_s4 + $0x148] sm:$0xff]   ;;  %v7381_v51 = vld [vmem:[%s9412_s4 + $0x150] sm:$0xff]  }
0x101c   :  { %v3901_v12 = vpack.c.bf16 %v3869_v53, %v3868_v16  ;;  %v7035_v23 = vpop.f32.mrb[132].mxu0  ;;  %v7383_v16 = vld [vmem:[%s9412_s4 + $0x160] sm:$0xff]   ;;  %v7384_v53 = vld [vmem:[%s9412_s4 + $0x168] sm:$0xff]  }
0x101d   :  { %v3830_v33 = vadd.f32 %v7035_v23, %v3676_v24  ;;  %v3821_v34 = vpop.f32.mrb[133].mxu0 }
0x101e   :  { %v3822_v25 = vadd.f32 %v3821_v34, %v3666_v29  ;;  %v7036_v30 = vpop.f32.mrb[134].mxu0  ;;  %7045 = vmatprep.subr.bf16.mxu1 %v3901_v12  ;;  %v3721_v29 = vpop.permute.xlu1 %3720 }
0x101f   :  { %v3833_v22 = vadd.f32 %v7036_v30, %v3681_v58  ;;  %v3824_v10 = vpop.f32.mrb[135].mxu0  ;;  %7046 = vmatpush3.bf16.msra.mxu1 %v3901_v12  ;;  %v3874_v43 = vmax.f32 %v3830_v33, 0.0  ;;  %v3929_v12 = vpop.permute.xlu0 %3928 }
0x1020   :  { %v3825_v36 = vadd.f32 %v3824_v10, %v3671_v4  ;;  %7047 = vmatprep.subr.bf16.mxu1 %v3902_v56  ;;  %v3872_v39 = vmax.f32 %v3822_v25, 0.0 }
0x1021   :  { %v3875_v31 = vmax.f32 %v3833_v22, 0.0 }
0x1022   :  { %v3873_v48 = vmax.f32 %v3825_v36, 0.0  ;;  %v3934_v23 = vpop.permute.xlu1 %3933 }
0x1023   :  { %v3904_v49 = vpack.c.bf16 %v3875_v31, %v3874_v43  ;;  %7048 = vmatpush3.bf16.msra.mxu1 %v3902_v56  ;;  %v7385_v56 = vld [vmem:[%s9412_s4 + $0x170] sm:$0xff]   ;;  %v3939_v33 = vpop.permute.xlu0 %3938 }
0x1024   :  { %v3903_v18 = vpack.c.bf16 %v3873_v48, %v3872_v39  ;;  %v7039_v45 = vpop.f32.mrb[136].mxu0 }
0x1025   :  { %v3846_v47 = vadd.f32 %v7039_v45, %v3696_v44  ;;  %v3837_v1 = vpop.f32.mrb[137].mxu0 }
0x1026   :  { %v3838_v46 = vadd.f32 %v3837_v1, %v3686_v19  ;;  %v7040_v0 = vpop.f32.mrb[138].mxu0  ;;  %7049 = vmatprep.subr.bf16.mxu1 %v3903_v18  ;;  %v7382_v19 = vld [vmem:[%s9412_s4 + $0x158] sm:$0xff]   ;;  %v3944_v34 = vpop.permute.xlu1 %3943 }
0x1027   :  { %v3849_v32 = vadd.f32 %v7040_v0, %v3701_v5  ;;  %v3840_v60 = vpop.f32.mrb[139].mxu0  ;;  %7050 = vmatpush3.bf16.msra.mxu1 %v3903_v18  ;;  %v3878_v28 = vmax.f32 %v3846_v47, 0.0  ;;  %v3949_v25 = vpop.permute.xlu0 %3948 }
0x1028   :  { %v3841_v37 = vadd.f32 %v3840_v60, %v3691_v52  ;;  %7051 = vmatprep.subr.bf16.mxu1 %v3904_v49  ;;  %v3876_v63 = vmax.f32 %v3838_v46, 0.0  ;;  %v7386_v52 = vld [vmem:[%s9412_s4 + $0x178] sm:$0xff]  }
0x1029   :  { %v3879_v11 = vmax.f32 %v3849_v32, 0.0 }
0x102a   :  { %v3877_v40 = vmax.f32 %v3841_v37, 0.0  ;;  %v3954_v30 = vpop.permute.xlu1 %3953 }
0x102b   :  { %v3906_v2 = vpack.c.bf16 %v3879_v11, %v3878_v28  ;;  %7052 = vmatpush3.bf16.msra.mxu1 %v3904_v49  ;;  %v3959_v22 = vpop.permute.xlu0 %3958 }
0x102c   :  { %v3905_v6 = vpack.c.bf16 %v3877_v40, %v3876_v63  ;;  %v7043_v54 = vpop.f32.mrb[140].mxu0 }
0x102d   :  { %v3862_v8 = vadd.f32 %v7043_v54, %v3716_v27  ;;  %v3853_v7 = vpop.f32.mrb[141].mxu0 }
0x102e   :  { %v3854_v4 = vadd.f32 %v3853_v7, %v3706_v61  ;;  %v7044_v24 = vpop.f32.mrb[142].mxu0  ;;  %7053 = vmatprep.subr.bf16.mxu1 %v3905_v6  ;;  %v3964_v43 = vpop.permute.xlu1 %3963 }
0x102f   :  { %v3865_v14 = vadd.f32 %v7044_v24, %v3721_v29  ;;  %v3856_v15 = vpop.f32.mrb[143].mxu0  ;;  %7054 = vmatpush3.bf16.msra.mxu1 %v3905_v6  ;;  %v3882_v58 = vmax.f32 %v3862_v8, 0.0  ;;  %v3969_v47 = vpop.permute.xlu0 %3968 }
0x1030   :  { %v3857_v21 = vadd.f32 %v3856_v15, %v3711_v59  ;;  %7055 = vmatprep.subr.bf16.mxu1 %v3906_v2  ;;  %v3880_v3 = vmax.f32 %v3854_v4, 0.0 }
0x1031   :  { %v3883_v42 = vmax.f32 %v3865_v14, 0.0 }
0x1032   :  { %v3881_v57 = vmax.f32 %v3857_v21, 0.0  ;;  %v3974_v0 = vpop.permute.xlu1 %3973 }
0x1033   :  { %v3908_v50 = vpack.c.bf16 %v3883_v42, %v3882_v58  ;;  %7056 = vmatpush3.bf16.msra.mxu1 %v3906_v2  ;;  %v3979_v2 = vpop.permute.xlu0 %3978 }
0x1034   :  { %v3907_v13 = vpack.c.bf16 %v3881_v57, %v3880_v3 }
0x1036   :  { %7057 = vmatprep.subr.bf16.mxu1 %v3907_v13  ;;  %v3984_v8 = vpop.permute.xlu1 %3983 }
0x1037   :  { %7058 = vmatpush3.bf16.msra.mxu1 %v3907_v13  ;;  %v3989_v58 = vpop.permute.xlu0 %3988 }
0x1038   :  { %7059 = vmatprep.subr.bf16.mxu1 %v3908_v50 }
0x103a   :  { %v3994_v13 = vpop.permute.xlu1 %3993 }
0x103b   :  { %7060 = vmatpush3.bf16.msra.mxu1 %v3908_v50 }
0x103e   :  { %7062 = vmatmul.mubr.bf16.vlgmr.msra.gmra.mrb[128].mxu1 %v7380_v17 }
0x103f   :  { %7065 = vmatprep.mubr.bf16.mxu1 %v7381_v51 }
0x1046   :  { %7066 = vmatmul.mubr.bf16.gmra.mrb[132].mxu1 %v7382_v19 }
0x1047   :  { %7069 = vmatprep.mubr.bf16.mxu1 %v7383_v16 }
0x104e   :  { %7070 = vmatmul.mubr.bf16.gmra.mrb[136].mxu1 %v7384_v53 }
0x104f   :  { %7073 = vmatprep.mubr.bf16.mxu1 %v7385_v56 }
0x1056   :  { %7074 = vmatmul.mubr.bf16.gmra.mrb[140].mxu1 %v7386_v52  ;;  %v3999_v52 = vpop.permute.xlu0 %3998 }
0x1111   :  { %v7063_v10 = vpop.f32.mrb[128].mxu1 }
0x1112   :  { %v4097_v44 = vadd.f32 %v7063_v10, %v3939_v33  ;;  %v4088_v36 = vpop.f32.mrb[129].mxu1 }
0x1113   :  { %v4089_v31 = vadd.f32 %v4088_v36, %v3929_v12  ;;  %v7064_v5 = vpop.f32.mrb[130].mxu1 }
0x1114   :  { %v4100_v39 = vadd.f32 %v7064_v5, %v3944_v34  ;;  %v4091_v48 = vpop.f32.mrb[131].mxu1  ;;  %v4153_v18 = vmax.f32 %v4097_v44, 0.0 }
0x1115   :  { %v4092_v49 = vadd.f32 %v4091_v48, %v3934_v23  ;;  %v4151_v1 = vmax.f32 %v4089_v31, 0.0 }
0x1116   :  { %v4154_v45 = vmax.f32 %v4100_v39, 0.0 }
0x1117   :  { %v4152_v61 = vmax.f32 %v4092_v49, 0.0 }
0x1118   :  { %v4168_v46 = vpack.c.bf16 %v4154_v45, %v4153_v18  ;;  %v7387_v18 = vld [vmem:[%s9410_s2 + $0x180] sm:$0xff]  }
0x1119   :  { %v4167_v32 = vpack.c.bf16 %v4152_v61, %v4151_v1  ;;  %v7067_v60 = vpop.f32.mrb[132].mxu1  ;;  %7125 = vmatprep.mubr.bf16.mxu1 %v7387_v18 }
0x111a   :  { %v4113_v59 = vadd.f32 %v7067_v60, %v3959_v22  ;;  %v4104_v37 = vpop.f32.mrb[133].mxu1 }
0x111b   :  { %v4105_v28 = vadd.f32 %v4104_v37, %v3949_v25  ;;  %v7068_v11 = vpop.f32.mrb[134].mxu1  ;;  %7093 = vmatprep.mubr.bf16.mxu0 %v4167_v32  ;;  %v4004_v25 = vpop.permute.xlu1 %4003 }
0x111c   :  { %v4116_v63 = vadd.f32 %v7068_v11, %v3964_v43  ;;  %v4107_v40 = vpop.f32.mrb[135].mxu1  ;;  %7094 = vmatmul.mubr.bf16.vlgmr.msra.gmra.mrb[144].mxu0 %v4168_v46  ;;  %v4157_v6 = vmax.f32 %v4113_v59, 0.0 }
0x111d   :  { %v4108_v27 = vadd.f32 %v4107_v40, %v3954_v30  ;;  %v4155_v7 = vmax.f32 %v4105_v28, 0.0 }
0x111e   :  { %v4158_v54 = vmax.f32 %v4116_v63, 0.0 }
0x111f   :  { %v4156_v29 = vmax.f32 %v4108_v27, 0.0 }
0x1120   :  { %v4170_v4 = vpack.c.bf16 %v4158_v54, %v4157_v6 }
0x1121   :  { %v4169_v24 = vpack.c.bf16 %v4156_v29, %v4155_v7  ;;  %v7071_v14 = vpop.f32.mrb[136].mxu1 }
0x1122   :  { %v4129_v15 = vadd.f32 %v7071_v14, %v3979_v2  ;;  %v4120_v21 = vpop.f32.mrb[137].mxu1 }
0x1123   :  { %v4121_v42 = vadd.f32 %v4120_v21, %v3969_v47  ;;  %v7072_v3 = vpop.f32.mrb[138].mxu1  ;;  %7097 = vmatprep.mubr.bf16.mxu0 %v4169_v24  ;;  %v7389_v21 = vld [vmem:[%s9410_s2 + $0x190] sm:$0xff]  }
0x1124   :  { %v4132_v57 = vadd.f32 %v7072_v3, %v3984_v8  ;;  %v4123_v50 = vpop.f32.mrb[139].mxu1  ;;  %7098 = vmatmul.mubr.bf16.gmra.mrb[148].mxu0 %v4170_v4  ;;  %v4161_v51 = vmax.f32 %v4129_v15, 0.0  ;;  %v7388_v15 = vld [vmem:[%s9410_s2 + $0x188] sm:$0xff]   ;;  %v7393_v3 = vld [vmem:[%s9410_s2 + $0x1b0] sm:$0xff]  }
0x1125   :  { %v4124_v17 = vadd.f32 %v4123_v50, %v3974_v0  ;;  %v4159_v16 = vmax.f32 %v4121_v42, 0.0  ;;  %v7391_v42 = vld [vmem:[%s9410_s2 + $0x1a0] sm:$0xff]  }
0x1126   :  { %v4162_v19 = vmax.f32 %v4132_v57, 0.0 }
0x1127   :  { %v4160_v53 = vmax.f32 %v4124_v17, 0.0 }
0x1128   :  { %v4172_v56 = vpack.c.bf16 %v4162_v19, %v4161_v51 }
0x1129   :  { %v4171_v12 = vpack.c.bf16 %v4160_v53, %v4159_v16  ;;  %v7075_v23 = vpop.f32.mrb[140].mxu1 }
0x112a   :  { %v4145_v33 = vadd.f32 %v7075_v23, %v3999_v52  ;;  %v4136_v34 = vpop.f32.mrb[141].mxu1 }
0x112b   :  { %v4137_v30 = vadd.f32 %v4136_v34, %v3989_v58  ;;  %v7076_v22 = vpop.f32.mrb[142].mxu1  ;;  %7101 = vmatprep.mubr.bf16.mxu0 %v4171_v12  ;;  %v7390_v58 = vld [vmem:[%s9410_s2 + $0x198] sm:$0xff]  }
0x112c   :  { %v4148_v10 = vadd.f32 %v7076_v22, %v4004_v25  ;;  %v4139_v44 = vpop.f32.mrb[143].mxu1  ;;  %7102 = vmatmul.mubr.bf16.gmra.mrb[152].mxu0 %v4172_v56  ;;  %v4165_v43 = vmax.f32 %v4145_v33, 0.0 }
0x112d   :  { %v4140_v36 = vadd.f32 %v4139_v44, %v3994_v13  ;;  %v4163_v5 = vmax.f32 %v4137_v30, 0.0 }
0x112e   :  { %v4166_v31 = vmax.f32 %v4148_v10, 0.0 }
0x112f   :  { %v4164_v39 = vmax.f32 %v4140_v36, 0.0 }
0x1130   :  { %v4174_v48 = vpack.c.bf16 %v4166_v31, %v4165_v43 }
0x1131   :  { %v4173_v49 = vpack.c.bf16 %v4164_v39, %v4163_v5 }
0x1133   :  { %7105 = vmatprep.mubr.bf16.mxu0 %v4173_v49 }
0x1134   :  { %7106 = vmatmul.mubr.bf16.gmra.mrb[156].mxu0 %v4174_v48 }
0x11ef   :  { %v7095_v45 = vpop.f32.mrb[144].mxu0 }
0x11f0   :  { %v4209_v47 = vpop.f32.mrb[145].mxu0 }
0x11f1   :  { %v7096_v1 = vpop.f32.mrb[146].mxu0 }
0x11f2   :  { %v4290_v61 = vpack.c.bf16 %v7096_v1, %v7095_v45  ;;  %v4212_v46 = vpop.f32.mrb[147].mxu0 }
0x11f3   :  { %v4289_v0 = vpack.c.bf16 %v4212_v46, %v4209_v47 }
0x11f5   :  { %7109 = vmatprep.subr.bf16.mxu1 %v4289_v0 }
0x11f6   :  { %7110 = vmatpush3.bf16.msra.mxu1 %v4289_v0 }
0x11f7   :  { %v7099_v32 = vpop.f32.mrb[148].mxu0  ;;  %7111 = vmatprep.subr.bf16.mxu1 %v4290_v61 }
0x11f8   :  { %v4225_v60 = vpop.f32.mrb[149].mxu0 }
0x11f9   :  { %v7100_v59 = vpop.f32.mrb[150].mxu0 }
0x11fa   :  { %v4292_v37 = vpack.c.bf16 %v7100_v59, %v7099_v32  ;;  %v4228_v28 = vpop.f32.mrb[151].mxu0  ;;  %7112 = vmatpush3.bf16.msra.mxu1 %v4290_v61 }
0x11fb   :  { %v4291_v11 = vpack.c.bf16 %v4228_v28, %v4225_v60 }
0x11fd   :  { %7113 = vmatprep.subr.bf16.mxu1 %v4291_v11 }
0x11fe   :  { %7114 = vmatpush3.bf16.msra.mxu1 %v4291_v11 }
0x11ff   :  { %v7103_v63 = vpop.f32.mrb[152].mxu0  ;;  %7115 = vmatprep.subr.bf16.mxu1 %v4292_v37 }
0x1200   :  { %v4241_v40 = vpop.f32.mrb[153].mxu0 }
0x1201   :  { %v7104_v2 = vpop.f32.mrb[154].mxu0 }
0x1202   :  { %v4294_v27 = vpack.c.bf16 %v7104_v2, %v7103_v63  ;;  %v4244_v6 = vpop.f32.mrb[155].mxu0  ;;  %7116 = vmatpush3.bf16.msra.mxu1 %v4292_v37 }
0x1203   :  { %v4293_v54 = vpack.c.bf16 %v4244_v6, %v4241_v40 }
0x1205   :  { %7117 = vmatprep.subr.bf16.mxu1 %v4293_v54 }
0x1206   :  { %7118 = vmatpush3.bf16.msra.mxu1 %v4293_v54 }
0x1207   :  { %v7107_v8 = vpop.f32.mrb[156].mxu0  ;;  %7119 = vmatprep.subr.bf16.mxu1 %v4294_v27 }
0x1208   :  { %v4257_v7 = vpop.f32.mrb[157].mxu0 }
0x1209   :  { %v7108_v29 = vpop.f32.mrb[158].mxu0 }
0x120a   :  { %v4296_v4 = vpack.c.bf16 %v7108_v29, %v7107_v8  ;;  %v4260_v24 = vpop.f32.mrb[159].mxu0  ;;  %7120 = vmatpush3.bf16.msra.mxu1 %v4294_v27 }
0x120b   :  { %v4295_v14 = vpack.c.bf16 %v4260_v24, %v4257_v7 }
0x120d   :  { %7121 = vmatprep.subr.bf16.mxu1 %v4295_v14 }
0x120e   :  { %7122 = vmatpush3.bf16.msra.mxu1 %v4295_v14 }
0x120f   :  { %7123 = vmatprep.subr.bf16.mxu1 %v4296_v4 }
0x1212   :  { %7124 = vmatpush3.bf16.msra.mxu1 %v4296_v4 }
0x1213   :  { %7173 = vmatprep.subr.bf16.mxu1 %v9098_v41 }
0x1215   :  { %7126 = vmatmul.mubr.bf16.vlgmr.msra.gmra.mrb[144].mxu1 %v7388_v15 }
0x1216   :  { %7129 = vmatprep.mubr.bf16.mxu1 %v7389_v21  ;;  %7174 = vmatpush3.bf16.msra.mxu1 %v9098_v41  ;;  %v7392_v41 = vld [vmem:[%s9410_s2 + $0x1a8] sm:$0xff]  }
0x1217   :  { %7175 = vmatprep.subr.bf16.mxu1 %v9105_v26 }
0x121a   :  { %7176 = vmatpush3.bf16.msra.mxu1 %v9105_v26  ;;  %v7394_v26 = vld [vmem:[%s9410_s2 + $0x1b8] sm:$0xff]  }
0x121b   :  { %7177 = vmatprep.subr.bf16.mxu1 %v9118_v20 }
0x121d   :  { %7130 = vmatmul.mubr.bf16.gmra.mrb[148].mxu1 %v7390_v58 }
0x121e   :  { %7133 = vmatprep.mubr.bf16.mxu1 %v7391_v42  ;;  %7178 = vmatpush3.bf16.msra.mxu1 %v9118_v20  ;;  %v7395_v20 = vld [vmem:[%s9412_s4 + $0x180] sm:$0xff]  }
0x121f   :  { %7179 = vmatprep.subr.bf16.mxu1 %v9125_v38  ;;  %7157 = vmatprep.mubr.bf16.mxu0 %v7395_v20 }
0x1222   :  { %7180 = vmatpush3.bf16.msra.mxu1 %v9125_v38  ;;  %v4317_v38 = vpop.permute.xlu0 %4316 }
0x1223   :  { %7181 = vmatprep.subr.bf16.mxu1 %v9232_v35 }
0x1225   :  { %7134 = vmatmul.mubr.bf16.gmra.mrb[152].mxu1 %v7392_v41 }
0x1226   :  { %7137 = vmatprep.mubr.bf16.mxu1 %v7393_v3  ;;  %7182 = vmatpush3.bf16.msra.mxu1 %v9232_v35  ;;  %v4322_v35 = vpop.permute.xlu1 %4321  ;;  %v4327_v57 = vpop.permute.xlu0 %4326 }
0x1227   :  { %7183 = vmatprep.subr.bf16.mxu1 %v9239_v55 }
0x122a   :  { %7184 = vmatpush3.bf16.msra.mxu1 %v9239_v55  ;;  %v4332_v50 = vpop.permute.xlu1 %4331  ;;  %v4337_v13 = vpop.permute.xlu0 %4336 }
0x122b   :  { %7185 = vmatprep.subr.bf16.mxu1 %v9249_v9 }
0x122d   :  { %7138 = vmatmul.mubr.bf16.gmra.mrb[156].mxu1 %v7394_v26 }
0x122e   :  { %7186 = vmatpush3.bf16.msra.mxu1 %v9249_v9  ;;  %v4342_v55 = vpop.permute.xlu1 %4341  ;;  %v4347_v17 = vpop.permute.xlu0 %4346 }
0x122f   :  { %7187 = vmatprep.subr.bf16.mxu1 %v9256_v62 }
0x1232   :  { %7188 = vmatpush3.bf16.msra.mxu1 %v9256_v62  ;;  %v4352_v9 = vpop.permute.xlu1 %4351  ;;  %v4357_v34 = vpop.permute.xlu0 %4356 }
0x1236   :  { %v4362_v10 = vpop.permute.xlu1 %4361  ;;  %v4367_v18 = vpop.permute.xlu0 %4366 }
0x123a   :  { %v4372_v61 = vpop.permute.xlu1 %4371  ;;  %v4377_v11 = vpop.permute.xlu0 %4376 }
0x123e   :  { %v4382_v6 = vpop.permute.xlu1 %4381  ;;  %v4387_v14 = vpop.permute.xlu0 %4386 }
0x1242   :  { %v4392_v41 = vpop.permute.xlu1 %4391 }
0x12e8   :  { %v7127_v51 = vpop.f32.mrb[144].mxu1 }
0x12e9   :  { %v4485_v19 = vadd.f32 %v7127_v51, %v4327_v57  ;;  %v4476_v16 = vpop.f32.mrb[145].mxu1 }
0x12ea   :  { %v4477_v53 = vadd.f32 %v4476_v16, %v4317_v38  ;;  %v7128_v56 = vpop.f32.mrb[146].mxu1  ;;  %v7397_v16 = vld [vmem:[%s9412_s4 + $0x190] sm:$0xff]  }
0x12eb   :  { %v4488_v52 = vadd.f32 %v7128_v56, %v4332_v50  ;;  %v4479_v62 = vpop.f32.mrb[147].mxu1  ;;  %v4541_v23 = vmax.f32 %v4485_v19, 0.0  ;;  %v7396_v19 = vld [vmem:[%s9412_s4 + $0x188] sm:$0xff]  }
0x12ec   :  { %v4480_v12 = vadd.f32 %v4479_v62, %v4322_v35  ;;  %v4539_v25 = vmax.f32 %v4477_v53, 0.0  ;;  %v7399_v53 = vld [vmem:[%s9412_s4 + $0x1a0] sm:$0xff]   ;;  %v7400_v56 = vld [vmem:[%s9412_s4 + $0x1a8] sm:$0xff]   ;;  %v7402_v62 = vld [vmem:[%s9412_s4 + $0x1b8] sm:$0xff]  }
0x12ed   :  { %v4542_v33 = vmax.f32 %v4488_v52, 0.0  ;;  %v7401_v52 = vld [vmem:[%s9412_s4 + $0x1b0] sm:$0xff]  }
0x12ee   :  { %v4540_v30 = vmax.f32 %v4480_v12, 0.0  ;;  %v4600_v12 = vpop.permute.xlu0 %4599 }
0x12ef   :  { %v4573_v22 = vpack.c.bf16 %v4542_v33, %v4541_v23  ;;  %v4605_v23 = vpop.permute.xlu1 %4604 }
0x12f0   :  { %v4572_v44 = vpack.c.bf16 %v4540_v30, %v4539_v25  ;;  %v7131_v36 = vpop.f32.mrb[148].mxu1 }
0x12f1   :  { %v4501_v43 = vadd.f32 %v7131_v36, %v4347_v17  ;;  %v4492_v31 = vpop.f32.mrb[149].mxu1 }
0x12f2   :  { %v4493_v5 = vadd.f32 %v4492_v31, %v4337_v13  ;;  %v7132_v39 = vpop.f32.mrb[150].mxu1  ;;  %7141 = vmatprep.subr.bf16.mxu0 %v4572_v44  ;;  %v4610_v33 = vpop.permute.xlu0 %4609 }
0x12f3   :  { %v4504_v48 = vadd.f32 %v7132_v39, %v4352_v9  ;;  %v4495_v49 = vpop.f32.mrb[151].mxu1  ;;  %7142 = vmatpush3.bf16.msra.mxu0 %v4572_v44  ;;  %v4545_v47 = vmax.f32 %v4501_v43, 0.0  ;;  %v7398_v9 = vld [vmem:[%s9412_s4 + $0x198] sm:$0xff]  }
0x12f4   :  { %v4496_v45 = vadd.f32 %v4495_v49, %v4342_v55  ;;  %7143 = vmatprep.subr.bf16.mxu0 %v4573_v22  ;;  %v4543_v46 = vmax.f32 %v4493_v5, 0.0 }
0x12f5   :  { %v4546_v1 = vmax.f32 %v4504_v48, 0.0 }
0x12f6   :  { %v4544_v0 = vmax.f32 %v4496_v45, 0.0  ;;  %v4620_v25 = vpop.permute.xlu0 %4619 }
0x12f7   :  { %v4575_v32 = vpack.c.bf16 %v4546_v1, %v4545_v47  ;;  %7144 = vmatpush3.bf16.msra.mxu0 %v4573_v22 }
0x12f8   :  { %v4574_v60 = vpack.c.bf16 %v4544_v0, %v4543_v46  ;;  %v7135_v59 = vpop.f32.mrb[152].mxu1 }
0x12f9   :  { %v4517_v37 = vadd.f32 %v7135_v59, %v4367_v18  ;;  %v4508_v28 = vpop.f32.mrb[153].mxu1 }
0x12fa   :  { %v4509_v63 = vadd.f32 %v4508_v28, %v4357_v34  ;;  %v7136_v40 = vpop.f32.mrb[154].mxu1  ;;  %7145 = vmatprep.subr.bf16.mxu0 %v4574_v60  ;;  %v4615_v34 = vpop.permute.xlu1 %4614 }
0x12fb   :  { %v4520_v2 = vadd.f32 %v7136_v40, %v4372_v61  ;;  %v4511_v27 = vpop.f32.mrb[155].mxu1  ;;  %7146 = vmatpush3.bf16.msra.mxu0 %v4574_v60  ;;  %v4549_v8 = vmax.f32 %v4517_v37, 0.0  ;;  %v4630_v22 = vpop.permute.xlu0 %4629 }
0x12fc   :  { %v4512_v54 = vadd.f32 %v4511_v27, %v4362_v10  ;;  %7147 = vmatprep.subr.bf16.mxu0 %v4575_v32  ;;  %v4547_v29 = vmax.f32 %v4509_v63, 0.0 }
0x12fd   :  { %v4550_v7 = vmax.f32 %v4520_v2, 0.0 }
0x12fe   :  { %v4548_v4 = vmax.f32 %v4512_v54, 0.0  ;;  %v4625_v30 = vpop.permute.xlu1 %4624 }
0x12ff   :  { %v4577_v24 = vpack.c.bf16 %v4550_v7, %v4549_v8  ;;  %7148 = vmatpush3.bf16.msra.mxu0 %v4575_v32  ;;  %v4640_v47 = vpop.permute.xlu0 %4639 }
0x1300   :  { %v4576_v15 = vpack.c.bf16 %v4548_v4, %v4547_v29  ;;  %v7139_v21 = vpop.f32.mrb[156].mxu1 }
0x1301   :  { %v4533_v58 = vadd.f32 %v7139_v21, %v4387_v14  ;;  %v4524_v42 = vpop.f32.mrb[157].mxu1 }
0x1302   :  { %v4525_v3 = vadd.f32 %v4524_v42, %v4377_v11  ;;  %v7140_v26 = vpop.f32.mrb[158].mxu1  ;;  %7149 = vmatprep.subr.bf16.mxu0 %v4576_v15  ;;  %v4635_v43 = vpop.permute.xlu1 %4634 }
0x1303   :  { %v4536_v20 = vadd.f32 %v7140_v26, %v4392_v41  ;;  %v4527_v38 = vpop.f32.mrb[159].mxu1  ;;  %7150 = vmatpush3.bf16.msra.mxu0 %v4576_v15  ;;  %v4553_v57 = vmax.f32 %v4533_v58, 0.0  ;;  %v4650_v2 = vpop.permute.xlu0 %4649 }
0x1304   :  { %v4528_v35 = vadd.f32 %v4527_v38, %v4382_v6  ;;  %7151 = vmatprep.subr.bf16.mxu0 %v4577_v24  ;;  %v4551_v13 = vmax.f32 %v4525_v3, 0.0 }
0x1305   :  { %v4554_v50 = vmax.f32 %v4536_v20, 0.0 }
0x1306   :  { %v4552_v55 = vmax.f32 %v4528_v35, 0.0  ;;  %v4645_v0 = vpop.permute.xlu1 %4644 }
0x1307   :  { %v4579_v17 = vpack.c.bf16 %v4554_v50, %v4553_v57  ;;  %7152 = vmatpush3.bf16.msra.mxu0 %v4577_v24  ;;  %v4660_v58 = vpop.permute.xlu0 %4659 }
0x1308   :  { %v4578_v51 = vpack.c.bf16 %v4552_v55, %v4551_v13 }
0x130a   :  { %7153 = vmatprep.subr.bf16.mxu0 %v4578_v51  ;;  %v4655_v8 = vpop.permute.xlu1 %4654 }
0x130b   :  { %7154 = vmatpush3.bf16.msra.mxu0 %v4578_v51 }
0x130c   :  { %7155 = vmatprep.subr.bf16.mxu0 %v4579_v17 }
0x130e   :  { %v4665_v20 = vpop.permute.xlu1 %4664 }
0x130f   :  { %7156 = vmatpush3.bf16.msra.mxu0 %v4579_v17  ;;  %v4670_v17 = vpop.permute.xlu0 %4669 }
0x1312   :  { %7158 = vmatmul.mubr.bf16.vlgmr.msra.gmra.mrb[160].mxu0 %v7396_v19 }
0x1313   :  { %7161 = vmatprep.mubr.bf16.mxu0 %v7397_v16 }
0x131a   :  { %7162 = vmatmul.mubr.bf16.gmra.mrb[164].mxu0 %v7398_v9 }
0x131b   :  { %7165 = vmatprep.mubr.bf16.mxu0 %v7399_v53  ;;  %v4675_v53 = vpop.permute.xlu1 %4674 }
0x1322   :  { %7166 = vmatmul.mubr.bf16.gmra.mrb[168].mxu0 %v7400_v56 }
0x1323   :  { %7169 = vmatprep.mubr.bf16.mxu0 %v7401_v52 }
0x132a   :  { %7170 = vmatmul.mubr.bf16.gmra.mrb[172].mxu0 %v7402_v62 }
0x13e5   :  { %v7159_v10 = vpop.f32.mrb[160].mxu0 }
0x13e6   :  { %v4768_v44 = vadd.f32 %v7159_v10, %v4610_v33  ;;  %v4759_v36 = vpop.f32.mrb[161].mxu0 }
0x13e7   :  { %v4760_v31 = vadd.f32 %v4759_v36, %v4600_v12  ;;  %v7160_v5 = vpop.f32.mrb[162].mxu0 }
0x13e8   :  { %v4771_v39 = vadd.f32 %v7160_v5, %v4615_v34  ;;  %v4762_v48 = vpop.f32.mrb[163].mxu0  ;;  %v4824_v18 = vmax.f32 %v4768_v44, 0.0  ;;  %v7403_v44 = vld [vmem:[%s9410_s2 + $0x1c0] sm:$0xff]  }
0x13e9   :  { %v4763_v49 = vadd.f32 %v4762_v48, %v4605_v23  ;;  %v4822_v1 = vmax.f32 %v4760_v31, 0.0  ;;  %7221 = vmatprep.mubr.bf16.mxu0 %v7403_v44 }
0x13ea   :  { %v4825_v45 = vmax.f32 %v4771_v39, 0.0 }
0x13eb   :  { %v4823_v61 = vmax.f32 %v4763_v49, 0.0 }
0x13ec   :  { %v4839_v46 = vpack.c.bf16 %v4825_v45, %v4824_v18 }
0x13ed   :  { %v4838_v32 = vpack.c.bf16 %v4823_v61, %v4822_v1  ;;  %v7163_v60 = vpop.f32.mrb[164].mxu0 }
0x13ee   :  { %v4784_v59 = vadd.f32 %v7163_v60, %v4630_v22  ;;  %v4775_v37 = vpop.f32.mrb[165].mxu0 }
0x13ef   :  { %v4776_v28 = vadd.f32 %v4775_v37, %v4620_v25  ;;  %v7164_v11 = vpop.f32.mrb[166].mxu0  ;;  %7189 = vmatprep.mubr.bf16.mxu1 %v4838_v32 }
0x13f0   :  { %v4787_v63 = vadd.f32 %v7164_v11, %v4635_v43  ;;  %v4778_v40 = vpop.f32.mrb[167].mxu0  ;;  %7190 = vmatmul.mubr.bf16.vlgmr.msra.gmra.mrb[160].mxu1 %v4839_v46  ;;  %v4828_v6 = vmax.f32 %v4784_v59, 0.0 }
0x13f1   :  { %v4779_v27 = vadd.f32 %v4778_v40, %v4625_v30  ;;  %v4826_v7 = vmax.f32 %v4776_v28, 0.0 }
0x13f2   :  { %v4829_v54 = vmax.f32 %v4787_v63, 0.0 }
0x13f3   :  { %v4827_v29 = vmax.f32 %v4779_v27, 0.0 }
0x13f4   :  { %v4841_v4 = vpack.c.bf16 %v4829_v54, %v4828_v6  ;;  %v7404_v6 = vld [vmem:[%s9410_s2 + $0x1c8] sm:$0xff]   ;;  %v7405_v54 = vld [vmem:[%s9410_s2 + $0x1d0] sm:$0xff]  }
0x13f5   :  { %v4840_v24 = vpack.c.bf16 %v4827_v29, %v4826_v7  ;;  %v7167_v14 = vpop.f32.mrb[168].mxu0  ;;  %v7407_v7 = vld [vmem:[%s9410_s2 + $0x1e0] sm:$0xff]   ;;  %v7408_v29 = vld [vmem:[%s9410_s2 + $0x1e8] sm:$0xff]  }
0x13f6   :  { %v4800_v15 = vadd.f32 %v7167_v14, %v4650_v2  ;;  %v4791_v21 = vpop.f32.mrb[169].mxu0  ;;  %v7411_v14 = vld [vmem:[%s9412_s4 + $0x1c0] sm:$0xff]  }
0x13f7   :  { %v4792_v42 = vadd.f32 %v4791_v21, %v4640_v47  ;;  %v7168_v41 = vpop.f32.mrb[170].mxu0  ;;  %7193 = vmatprep.mubr.bf16.mxu1 %v4840_v24  ;;  %v7410_v24 = vld [vmem:[%s9410_s2 + $0x1f8] sm:$0xff]   ;;  %v4993_v21 = vpop.permute.xlu1 %4992 }
0x13f8   :  { %v4803_v3 = vadd.f32 %v7168_v41, %v4655_v8  ;;  %v4794_v26 = vpop.f32.mrb[171].mxu0  ;;  %7194 = vmatmul.mubr.bf16.gmra.mrb[164].mxu1 %v4841_v4  ;;  %v4832_v35 = vmax.f32 %v4800_v15, 0.0  ;;  %v7406_v8 = vld [vmem:[%s9410_s2 + $0x1d8] sm:$0xff]   ;;  %v7409_v4 = vld [vmem:[%s9410_s2 + $0x1f0] sm:$0xff]   ;;  %v4988_v15 = vpop.permute.xlu0 %4987 }
0x13f9   :  { %v4795_v38 = vadd.f32 %v4794_v26, %v4645_v0  ;;  %v4830_v50 = vmax.f32 %v4792_v42, 0.0 }
0x13fa   :  { %v4833_v57 = vmax.f32 %v4803_v3, 0.0 }
0x13fb   :  { %v4831_v13 = vmax.f32 %v4795_v38, 0.0  ;;  %v5003_v42 = vpop.permute.xlu1 %5002 }
0x13fc   :  { %v4843_v55 = vpack.c.bf16 %v4833_v57, %v4832_v35 }
0x13fd   :  { %v4842_v51 = vpack.c.bf16 %v4831_v13, %v4830_v50  ;;  %v7171_v19 = vpop.f32.mrb[172].mxu0 }
0x13fe   :  { %v4816_v16 = vadd.f32 %v7171_v19, %v4670_v17  ;;  %v4807_v9 = vpop.f32.mrb[173].mxu0 }
0x13ff   :  { %v4808_v56 = vadd.f32 %v4807_v9, %v4660_v58  ;;  %v7172_v52 = vpop.f32.mrb[174].mxu0  ;;  %7197 = vmatprep.mubr.bf16.mxu1 %v4842_v51  ;;  %v4998_v58 = vpop.permute.xlu0 %4997 }
0x1400   :  { %v4819_v62 = vadd.f32 %v7172_v52, %v4675_v53  ;;  %v4810_v12 = vpop.f32.mrb[175].mxu0  ;;  %7198 = vmatmul.mubr.bf16.gmra.mrb[168].mxu1 %v4843_v55  ;;  %v4836_v33 = vmax.f32 %v4816_v16, 0.0  ;;  %v5013_v3 = vpop.permute.xlu1 %5012 }
0x1401   :  { %v4811_v23 = vadd.f32 %v4810_v12, %v4665_v20  ;;  %v4834_v25 = vmax.f32 %v4808_v56, 0.0 }
0x1402   :  { %v4837_v34 = vmax.f32 %v4819_v62, 0.0 }
0x1403   :  { %v4835_v30 = vmax.f32 %v4811_v23, 0.0  ;;  %v5008_v41 = vpop.permute.xlu0 %5007 }
0x1404   :  { %v4845_v22 = vpack.c.bf16 %v4837_v34, %v4836_v33  ;;  %v5023_v57 = vpop.permute.xlu1 %5022 }
0x1405   :  { %v4844_v10 = vpack.c.bf16 %v4835_v30, %v4834_v25 }
0x1407   :  { %7201 = vmatprep.mubr.bf16.mxu1 %v4844_v10  ;;  %v5018_v26 = vpop.permute.xlu0 %5017 }
0x1408   :  { %7202 = vmatmul.mubr.bf16.gmra.mrb[172].mxu1 %v4845_v22  ;;  %v5033_v62 = vpop.permute.xlu1 %5032 }
0x1409   :  { %7253 = vmatprep.mubr.bf16.mxu1 %v7411_v14 }
0x140b   :  { %v5028_v9 = vpop.permute.xlu0 %5027 }
0x140f   :  { %v5038_v44 = vpop.permute.xlu0 %5037 }
0x14c3   :  { %v7191_v36 = vpop.f32.mrb[160].mxu1 }
0x14c4   :  { %v4880_v43 = vpop.f32.mrb[161].mxu1 }
0x14c5   :  { %v7192_v31 = vpop.f32.mrb[162].mxu1 }
0x14c6   :  { %v4961_v5 = vpack.c.bf16 %v7192_v31, %v7191_v36  ;;  %v4883_v39 = vpop.f32.mrb[163].mxu1 }
0x14c7   :  { %v4960_v48 = vpack.c.bf16 %v4883_v39, %v4880_v43 }
0x14c9   :  { %7205 = vmatprep.subr.bf16.mxu0 %v4960_v48 }
0x14ca   :  { %7206 = vmatpush3.bf16.msra.mxu0 %v4960_v48 }
0x14cb   :  { %v7195_v49 = vpop.f32.mrb[164].mxu1  ;;  %7207 = vmatprep.subr.bf16.mxu0 %v4961_v5 }
0x14cc   :  { %v4896_v18 = vpop.f32.mrb[165].mxu1 }
0x14cd   :  { %v7196_v45 = vpop.f32.mrb[166].mxu1 }
0x14ce   :  { %v4963_v47 = vpack.c.bf16 %v7196_v45, %v7195_v49  ;;  %v4899_v1 = vpop.f32.mrb[167].mxu1  ;;  %7208 = vmatpush3.bf16.msra.mxu0 %v4961_v5  ;;  %v5043_v5 = vpop.permute.xlu1 %5042 }
0x14cf   :  { %v4962_v61 = vpack.c.bf16 %v4899_v1, %v4896_v18 }
0x14d1   :  { %7209 = vmatprep.subr.bf16.mxu0 %v4962_v61 }
0x14d2   :  { %7210 = vmatpush3.bf16.msra.mxu0 %v4962_v61  ;;  %v5048_v61 = vpop.permute.xlu0 %5047 }
0x14d3   :  { %v7199_v46 = vpop.f32.mrb[168].mxu1  ;;  %7211 = vmatprep.subr.bf16.mxu0 %v4963_v47 }
0x14d4   :  { %v4912_v0 = vpop.f32.mrb[169].mxu1 }
0x14d5   :  { %v7200_v32 = vpop.f32.mrb[170].mxu1 }
0x14d6   :  { %v4965_v60 = vpack.c.bf16 %v7200_v32, %v7199_v46  ;;  %v4915_v59 = vpop.f32.mrb[171].mxu1  ;;  %7212 = vmatpush3.bf16.msra.mxu0 %v4963_v47 }
0x14d7   :  { %v4964_v37 = vpack.c.bf16 %v4915_v59, %v4912_v0  ;;  %v5053_v59 = vpop.permute.xlu1 %5052 }
0x14d9   :  { %7213 = vmatprep.subr.bf16.mxu0 %v4964_v37 }
0x14da   :  { %7214 = vmatpush3.bf16.msra.mxu0 %v4964_v37 }
0x14db   :  { %v7203_v28 = vpop.f32.mrb[172].mxu1  ;;  %7215 = vmatprep.subr.bf16.mxu0 %v4965_v60 }
0x14dc   :  { %v4928_v11 = vpop.f32.mrb[173].mxu1 }
0x14dd   :  { %v7204_v63 = vpop.f32.mrb[174].mxu1 }
0x14de   :  { %v4967_v40 = vpack.c.bf16 %v7204_v63, %v7203_v28  ;;  %v4931_v2 = vpop.f32.mrb[175].mxu1  ;;  %7216 = vmatpush3.bf16.msra.mxu0 %v4965_v60 }
0x14df   :  { %v4966_v27 = vpack.c.bf16 %v4931_v2, %v4928_v11 }
0x14e1   :  { %7217 = vmatprep.subr.bf16.mxu0 %v4966_v27 }
0x14e2   :  { %7218 = vmatpush3.bf16.msra.mxu0 %v4966_v27  ;;  %v5058_v27 = vpop.permute.xlu0 %5057 }
0x14e3   :  { %7219 = vmatprep.subr.bf16.mxu0 %v4967_v40 }
0x14e6   :  { %7220 = vmatpush3.bf16.msra.mxu0 %v4967_v40 }
0x14e9   :  { %7222 = vmatmul.mubr.bf16.vlgmr.msra.gmra.mrb[176].mxu0 %v7404_v6 }
0x14ea   :  { %7225 = vmatprep.mubr.bf16.mxu0 %v7405_v54 }
0x14f1   :  { %7226 = vmatmul.mubr.bf16.gmra.mrb[180].mxu0 %v7406_v8 }
0x14f2   :  { %7229 = vmatprep.mubr.bf16.mxu0 %v7407_v7 }
0x14f9   :  { %7230 = vmatmul.mubr.bf16.gmra.mrb[184].mxu0 %v7408_v29  ;;  %v5063_v29 = vpop.permute.xlu1 %5062 }
0x14fa   :  { %7233 = vmatprep.mubr.bf16.mxu0 %v7409_v4 }
0x1501   :  { %7234 = vmatmul.mubr.bf16.gmra.mrb[188].mxu0 %v7410_v24 }
0x15bc   :  { %v7223_v20 = vpop.f32.mrb[176].mxu0 }
0x15bd   :  { %v5156_v38 = vadd.f32 %v7223_v20, %v4998_v58  ;;  %v5147_v35 = vpop.f32.mrb[177].mxu0 }
0x15be   :  { %v5148_v50 = vadd.f32 %v5147_v35, %v4988_v15  ;;  %v7224_v13 = vpop.f32.mrb[178].mxu0  ;;  %v7413_v35 = vld [vmem:[%s9412_s4 + $0x1d0] sm:$0xff]  }
0x15bf   :  { %v5159_v55 = vadd.f32 %v7224_v13, %v5003_v42  ;;  %v5150_v17 = vpop.f32.mrb[179].mxu0  ;;  %v5212_v19 = vmax.f32 %v5156_v38, 0.0  ;;  %v7412_v38 = vld [vmem:[%s9412_s4 + $0x1c8] sm:$0xff]  }
0x15c0   :  { %v5151_v51 = vadd.f32 %v5150_v17, %v4993_v21  ;;  %v5210_v53 = vmax.f32 %v5148_v50, 0.0  ;;  %v7415_v50 = vld [vmem:[%s9412_s4 + $0x1e0] sm:$0xff]   ;;  %v7416_v13 = vld [vmem:[%s9412_s4 + $0x1e8] sm:$0xff]   ;;  %v7418_v17 = vld [vmem:[%s9412_s4 + $0x1f8] sm:$0xff]  }
0x15c1   :  { %v5213_v16 = vmax.f32 %v5159_v55, 0.0  ;;  %v7417_v55 = vld [vmem:[%s9412_s4 + $0x1f0] sm:$0xff]  }
0x15c2   :  { %v5211_v56 = vmax.f32 %v5151_v51, 0.0  ;;  %v5271_v51 = vpop.permute.xlu0 %5270 }
0x15c3   :  { %v5244_v52 = vpack.c.bf16 %v5213_v16, %v5212_v19  ;;  %v5276_v19 = vpop.permute.xlu1 %5275 }
0x15c4   :  { %v5243_v12 = vpack.c.bf16 %v5211_v56, %v5210_v53  ;;  %v7227_v23 = vpop.f32.mrb[180].mxu0 }
0x15c5   :  { %v5172_v33 = vadd.f32 %v7227_v23, %v5018_v26  ;;  %v5163_v34 = vpop.f32.mrb[181].mxu0 }
0x15c6   :  { %v5164_v25 = vadd.f32 %v5163_v34, %v5008_v41  ;;  %v7228_v30 = vpop.f32.mrb[182].mxu0  ;;  %7237 = vmatprep.subr.bf16.mxu1 %v5243_v12  ;;  %v5281_v16 = vpop.permute.xlu0 %5280 }
0x15c7   :  { %v5175_v22 = vadd.f32 %v7228_v30, %v5023_v57  ;;  %v5166_v10 = vpop.f32.mrb[183].mxu0  ;;  %7238 = vmatpush3.bf16.msra.mxu1 %v5243_v12  ;;  %v5216_v43 = vmax.f32 %v5172_v33, 0.0  ;;  %v7414_v57 = vld [vmem:[%s9412_s4 + $0x1d8] sm:$0xff]   ;;  %s7468_s4 = smov [#allocation2]  }
0x15c8   :  { %v5167_v36 = vadd.f32 %v5166_v10, %v5013_v3  ;;  %7239 = vmatprep.subr.bf16.mxu1 %v5244_v52  ;;  %v5214_v39 = vmax.f32 %v5164_v25, 0.0  ;;  %s5514_s23 = sshll.u32 %s7468_s4, 4  ;;  %s5515_s23 = int_to_ptr.vmem [resolvable:$true] %s5514_s23 }
0x15c9   :  { %v5217_v31 = vmax.f32 %v5175_v22, 0.0  ;;  %s7443_s24 = scalar_lea.vmem %s5515_s23, 2048  ;;  %p7448_p1 = scmp.lt.s32.totalorder %s5515_s23, %s5515_s23 }
0x15ca   :  { %v5215_v48 = vmax.f32 %v5167_v36, 0.0  ;;  %v5291_v53 = vpop.permute.xlu0 %5290  ;;  %p7444_p0 = scmp.ne.s32.totalorder %s5515_s23, %s7443_s24  ;;  %p7449_p2 = scmp.lt.s32.totalorder %s7443_s24, %s7443_s24 }
0x15cb   :  { %v5246_v49 = vpack.c.bf16 %v5217_v31, %v5216_v43  ;;  %7240 = vmatpush3.bf16.msra.mxu1 %v5244_v52 }
0x15cc   :  { %v5245_v18 = vpack.c.bf16 %v5215_v48, %v5214_v39  ;;  %v7231_v45 = vpop.f32.mrb[184].mxu0  ;;  %p7450_p3 = por %p7449_p2, %p7448_p1 }
0x15cd   :  { %v5188_v47 = vadd.f32 %v7231_v45, %v5038_v44  ;;  %v5179_v1 = vpop.f32.mrb[185].mxu0 }
0x15ce   :  { %v5180_v46 = vadd.f32 %v5179_v1, %v5028_v9  ;;  %v7232_v0 = vpop.f32.mrb[186].mxu0  ;;  %7241 = vmatprep.subr.bf16.mxu1 %v5245_v18  ;;  %v5286_v9 = vpop.permute.xlu1 %5285  ;;  %p7451_p4 = pnand %p7450_p3, %p7444_p0 }
0x15cf   :  { %v5191_v32 = vadd.f32 %v7232_v0, %v5043_v5  ;;  %v5182_v60 = vpop.f32.mrb[187].mxu0  ;;  %7242 = vmatpush3.bf16.msra.mxu1 %v5245_v18  ;;  %v5220_v28 = vmax.f32 %v5188_v47, 0.0  ;;  %v5301_v52 = vpop.permute.xlu0 %5300 }
0x15d0   :  { %v5183_v37 = vadd.f32 %v5182_v60, %v5033_v62  ;;  %7243 = vmatprep.subr.bf16.mxu1 %v5246_v49  ;;  %v5218_v63 = vmax.f32 %v5180_v46, 0.0 }
0x15d1   :  { %v5221_v11 = vmax.f32 %v5191_v32, 0.0 }
0x15d2   :  { %v5219_v40 = vmax.f32 %v5183_v37, 0.0  ;;  %v5296_v56 = vpop.permute.xlu1 %5295 }
0x15d3   :  { %v5248_v2 = vpack.c.bf16 %v5221_v11, %v5220_v28  ;;  %7244 = vmatpush3.bf16.msra.mxu1 %v5246_v49  ;;  %v5311_v44 = vpop.permute.xlu0 %5310 }
0x15d4   :  { %v5247_v6 = vpack.c.bf16 %v5219_v40, %v5218_v63  ;;  %v7235_v54 = vpop.f32.mrb[188].mxu0 }
0x15d5   :  { %v5204_v8 = vadd.f32 %v7235_v54, %v5058_v27  ;;  %v5195_v7 = vpop.f32.mrb[189].mxu0 }
0x15d6   :  { %v5196_v4 = vadd.f32 %v5195_v7, %v5048_v61  ;;  %v7236_v24 = vpop.f32.mrb[190].mxu0  ;;  %7245 = vmatprep.subr.bf16.mxu1 %v5247_v6  ;;  %v5306_v33 = vpop.permute.xlu1 %5305 }
0x15d7   :  { %v5207_v14 = vadd.f32 %v7236_v24, %v5063_v29  ;;  %v5198_v15 = vpop.f32.mrb[191].mxu0  ;;  %7246 = vmatpush3.bf16.msra.mxu1 %v5247_v6  ;;  %v5224_v58 = vmax.f32 %v5204_v8, 0.0  ;;  %v5321_v45 = vpop.permute.xlu0 %5320 }
0x15d8   :  { %v5199_v21 = vadd.f32 %v5198_v15, %v5053_v59  ;;  %7247 = vmatprep.subr.bf16.mxu1 %v5248_v2  ;;  %v5222_v41 = vmax.f32 %v5196_v4, 0.0 }
0x15d9   :  { %v5225_v42 = vmax.f32 %v5207_v14, 0.0 }
0x15da   :  { %v5223_v3 = vmax.f32 %v5199_v21, 0.0  ;;  %v5316_v36 = vpop.permute.xlu1 %5315 }
0x15db   :  { %v5250_v26 = vpack.c.bf16 %v5225_v42, %v5224_v58  ;;  %7248 = vmatpush3.bf16.msra.mxu1 %v5248_v2  ;;  %v5331_v32 = vpop.permute.xlu0 %5330 }
0x15dc   :  { %v5249_v20 = vpack.c.bf16 %v5223_v3, %v5222_v41 }
0x15de   :  { %7249 = vmatprep.subr.bf16.mxu1 %v5249_v20  ;;  %v5326_v1 = vpop.permute.xlu1 %5325 }
0x15df   :  { %7250 = vmatpush3.bf16.msra.mxu1 %v5249_v20  ;;  %v5341_v40 = vpop.permute.xlu0 %5340 }
0x15e0   :  { %7251 = vmatprep.subr.bf16.mxu1 %v5250_v26 }
0x15e2   :  { %v5336_v11 = vpop.permute.xlu1 %5335 }
0x15e3   :  { %7252 = vmatpush3.bf16.msra.mxu1 %v5250_v26 }
0x15e6   :  { %7254 = vmatmul.mubr.bf16.vlgmr.msra.gmra.mrb[176].mxu1 %v7412_v38  ;;  %v5346_v54 = vpop.permute.xlu1 %5345 }
0x15e7   :  { %7257 = vmatprep.mubr.bf16.mxu1 %v7413_v35 }
0x15ee   :  { %7258 = vmatmul.mubr.bf16.gmra.mrb[180].mxu1 %v7414_v57 }
0x15ef   :  { %7261 = vmatprep.mubr.bf16.mxu1 %v7415_v50 }
0x15f6   :  { %7262 = vmatmul.mubr.bf16.gmra.mrb[184].mxu1 %v7416_v13 }
0x15f7   :  { %7265 = vmatprep.mubr.bf16.mxu1 %v7417_v55 }
0x15fe   :  { %7266 = vmatmul.mubr.bf16.gmra.mrb[188].mxu1 %v7418_v17 }
0x16b9   :  { %v7255_v62 = vpop.f32.mrb[176].mxu1 }
0x16ba   :  { %v5439_v12 = vadd.f32 %v7255_v62, %v5281_v16  ;;  %v5430_v23 = vpop.f32.mrb[177].mxu1 }
0x16bb   :  { %v5431_v34 = vadd.f32 %v5430_v23, %v5271_v51  ;;  %v7256_v25 = vpop.f32.mrb[178].mxu1 }
0x16bc   :  { %5495 = vst [vmem:[#allocation2 + $0x10] sm:$0xff] %v5439_v12  ;;  %v5442_v30 = vadd.f32 %v7256_v25, %v5286_v9  ;;  %v5433_v22 = vpop.f32.mrb[179].mxu1 }
0x16bd   :  { %5493 = vst [vmem:[#allocation2] sm:$0xff] %v5431_v34  ;;  %v5434_v10 = vadd.f32 %v5433_v22, %v5276_v19 }
0x16be   :  { %5496 = vst [vmem:[#allocation2 + $0x18] sm:$0xff] %v5442_v30 }
0x16bf   :  { %5494 = vst [vmem:[#allocation2 + $0x8] sm:$0xff] %v5434_v10 }
0x16c1   :  { %v7259_v43 = vpop.f32.mrb[180].mxu1 }
0x16c2   :  { %v5455_v31 = vadd.f32 %v7259_v43, %v5301_v52  ;;  %v5446_v5 = vpop.f32.mrb[181].mxu1 }
0x16c3   :  { %v5447_v39 = vadd.f32 %v5446_v5, %v5291_v53  ;;  %v7260_v48 = vpop.f32.mrb[182].mxu1 }
0x16c4   :  { %5499 = vst [vmem:[#allocation2 + $0x30] sm:$0xff] %v5455_v31  ;;  %v5458_v49 = vadd.f32 %v7260_v48, %v5306_v33  ;;  %v5449_v18 = vpop.f32.mrb[183].mxu1 }
0x16c5   :  { %5497 = vst [vmem:[#allocation2 + $0x20] sm:$0xff] %v5447_v39  ;;  %v5450_v47 = vadd.f32 %v5449_v18, %v5296_v56 }
0x16c6   :  { %5500 = vst [vmem:[#allocation2 + $0x38] sm:$0xff] %v5458_v49 }
0x16c7   :  { %5498 = vst [vmem:[#allocation2 + $0x28] sm:$0xff] %v5450_v47 }
0x16c9   :  { %v7263_v61 = vpop.f32.mrb[184].mxu1 }
0x16ca   :  { %v5471_v46 = vadd.f32 %v7263_v61, %v5321_v45  ;;  %v5462_v0 = vpop.f32.mrb[185].mxu1 }
0x16cb   :  { %v5463_v60 = vadd.f32 %v5462_v0, %v5311_v44  ;;  %v7264_v59 = vpop.f32.mrb[186].mxu1 }
0x16cc   :  { %5503 = vst [vmem:[#allocation2 + $0x50] sm:$0xff] %v5471_v46  ;;  %v5474_v37 = vadd.f32 %v7264_v59, %v5326_v1  ;;  %v5465_v28 = vpop.f32.mrb[187].mxu1 }
0x16cd   :  { %5501 = vst [vmem:[#allocation2 + $0x40] sm:$0xff] %v5463_v60  ;;  %v5466_v63 = vadd.f32 %v5465_v28, %v5316_v36 }
0x16ce   :  { %5504 = vst [vmem:[#allocation2 + $0x58] sm:$0xff] %v5474_v37 }
0x16cf   :  { %5502 = vst [vmem:[#allocation2 + $0x48] sm:$0xff] %v5466_v63 }
0x16d1   :  { %v7267_v2 = vpop.f32.mrb[188].mxu1 }
0x16d2   :  { %v5487_v27 = vadd.f32 %v7267_v2, %v5341_v40  ;;  %v5478_v6 = vpop.f32.mrb[189].mxu1 }
0x16d3   :  { %v5479_v8 = vadd.f32 %v5478_v6, %v5331_v32  ;;  %v7268_v7 = vpop.f32.mrb[190].mxu1 }
0x16d4   :  { %5507 = vst [vmem:[#allocation2 + $0x70] sm:$0xff] %v5487_v27  ;;  %v5490_v29 = vadd.f32 %v7268_v7, %v5346_v54  ;;  %v5481_v4 = vpop.f32.mrb[191].mxu1 }
0x16d5   :  { %5505 = vst [vmem:[#allocation2 + $0x60] sm:$0xff] %v5479_v8  ;;  %v5482_v24 = vadd.f32 %v5481_v4, %v5336_v11 }
0x16d6   :  { %5508 = vst [vmem:[#allocation2 + $0x78] sm:$0xff] %v5490_v29 }
0x16d7   :  { %5506 = vst [vmem:[#allocation2 + $0x68] sm:$0xff] %v5482_v24 }
0x16d8   :  { %7454 = shalt.err (!%p7451_p4)
}
0x16d9   :  { %s7455_s5 = scalar_lea.hbm %s9414_s6, 2048 }
0x16da   :  { %p7456_p5 = scmp.ne.s32.totalorder %s9414_s6, %s7455_s5  ;;  %p7459_p6 = scmp.lt.u32.totalorder %s7455_s5, %s9414_s6 }
0x16dc   :  { %p7461_p7 = pnand %p7459_p6, %p7456_p5 }
0x16de   :  { %7464 = shalt.err (!%p7461_p7)
}
0x16df   :  { %s7469_s28 = smov 128   ;;  %s7470_s29 = smov 8  }
0x16e0   :  { %5520 = dma.vmem_to_hbm [thread:$0]  %s5515_s23, 2048, %s9414_s6, [#allocation3], %s7469_s28, %s7469_s28, %s7470_s29  }
0x16e1   :  { %7465 = dma.done.wait [#allocation3], 2048  }
0x16e2   :  { %7466 = vsyncadd [#allocation3], 4294965248 }
0x16e3   :  { %5524 = vsyncpa [#allocation3], 1 }

</bundles_post_ra>
